<compile_context>
chip_gen: v5e
topology: v5e:2x2
jax: 0.10.0
libtpu: 0.0.40
codegen_flags: <defaults>
</compile_context>

<pallas_src>
import jax
import jax.numpy as jnp
from jax.experimental import pallas as pl
from jax.experimental.pallas import tpu as pltpu


def _add_conv1x1_kernel(a_ref, b_ref, w_ref, o_ref):
    # a_ref, b_ref: (Cin, M)       resident f32 activation blocks (M = N*H*W)
    # w_ref:        (tile_cout, Cin) bf16 weight block for this grid step / core
    # o_ref:        (tile_cout, M)   f32 output block
    x = (a_ref[...] + b_ref[...]).astype(w_ref.dtype)   # f32 add, bf16 cast (VPU, free)
    o_ref[...] = jnp.dot(
        w_ref[...], x, preferred_element_type=jnp.float32
    ).astype(o_ref.dtype)


def _tensorcores_per_chip() -> int:
    """2 TensorCores/chip on v7x; 1 on v5e/v6e. Conservative fallback = 1."""
    try:
        kind = jax.devices()[0].device_kind.lower()
    except Exception:
        return 1
    return 2 if ("v7" in kind or "7x" in kind) else 1


def add_conv1x1(x383, x368, weight, *, weight_dtype=jnp.bfloat16):
    """x383, x368: NCHW float32 (N, Cin, H, W); weight: (Cout, Cin, 1, 1).

    Returns NCHW (N, Cout, H, W) float32, matching the PyTorch module.
    """
    N, Cin, H, W = x383.shape
    Cout = weight.shape[0]
    M = N * H * W

    # ---- Glue (transpose-free for N == 1) --------------------------------
    if N == 1:
        a = x383.reshape(Cin, M)                     # free reshape
        b = x368.reshape(Cin, M)                     # free reshape
    else:
        a = jnp.transpose(x383, (1, 0, 2, 3)).reshape(Cin, M)
        b = jnp.transpose(x368, (1, 0, 2, 3)).reshape(Cin, M)
    # bf16 weight: halves the dominant HBM read; one-time cast (stored bf16 in real use)
    w = weight.reshape(Cout, Cin).astype(weight_dtype)

    # ---- Grid selection (generation-dependent) ---------------------------
    # v5e/v6e: single TC -> one whole-array block, no grid overhead.
    # v7x:     2 TCs     -> 2-way Cout split sharded with CORE_PARALLEL.
    n_tc = _tensorcores_per_chip()
    if n_tc >= 2 and Cout % (2 * 8) == 0:
        grid_n = 2
        dim_sem = (pltpu.CORE_PARALLEL,)
    else:
        grid_n = 1
        dim_sem = ("arbitrary",)
    tile_cout = Cout // grid_n

    cost = pl.CostEstimate(
        flops=2 * M * Cin * Cout,
        transcendentals=0,
        bytes_accessed=(2 * 4 * Cin * M            # two f32 activation reads
                        + w.dtype.itemsize * Cout * Cin   # bf16 weight read
                        + 4 * Cout * M),           # f32 output write
    )

    out_flat = pl.pallas_call(
        _add_conv1x1_kernel,
        out_shape=jax.ShapeDtypeStruct((Cout, M), jnp.float32),
        grid=(grid_n,),
        in_specs=[
            # activations: same block every step -> stay resident in VMEM
            pl.BlockSpec((Cin, M), lambda j: (0, 0)),
            pl.BlockSpec((Cin, M), lambda j: (0, 0)),
            # weight: (possibly) tiled over Cout
            pl.BlockSpec((tile_cout, Cin), lambda j: (j, 0)),
        ],
        out_specs=pl.BlockSpec((tile_cout, M), lambda j: (j, 0)),
        compiler_params=pltpu.CompilerParams(dimension_semantics=dim_sem),
        cost_estimate=cost,
    )(a, b, w)

    # ---- Glue back to NCHW (transpose-free for N == 1) -------------------
    if N == 1:
        return out_flat.reshape(N, Cout, H, W)       # free reshape
    return jnp.transpose(out_flat.reshape(Cout, N, H, W), (1, 0, 2, 3))


if __name__ == "__main__":
    key = jax.random.PRNGKey(0)
    k1, k2, k3 = jax.random.split(key, 3)

    # Shapes exactly as in the module's forward
    N, Cin, H, W = 1, 200, 14, 14
    Cout = 1200

    x383 = jax.random.normal(k1, (N, Cin, H, W), dtype=jnp.float32)
    x368 = jax.random.normal(k2, (N, Cin, H, W), dtype=jnp.float32)
    # Conv2d(200 -> 1200, kernel 1x1, bias=False) weight
    weight = jax.random.normal(k3, (Cout, Cin, 1, 1), dtype=jnp.float32) * 0.05

    out = add_conv1x1(x383, x368, weight)
    out = jax.block_until_ready(out)

    # Sanity check against plain-JAX f32 reference (tolerance accounts for the
    # bf16 weight/activation quantization inside the kernel; f32 accumulation).
    ref = jnp.einsum(
        "nchw,oc->nohw", x383 + x368, weight.reshape(Cout, Cin)
    )
    assert out.shape == (N, Cout, H, W)
    assert jnp.allclose(out, ref, atol=5e-2, rtol=5e-2)

    print("KERNEL_OK")
</pallas_src>

<mosaic_0001>
module attributes {stable_mosaic.version = 11 : i64} {
  func.func @_add_conv1x1_kernel(%arg0: i32, %arg1: memref<200x196xf32, #tpu.memory_space<vmem>>, %arg2: memref<200x196xf32, #tpu.memory_space<vmem>>, %arg3: memref<1200x200xbf16, #tpu.memory_space<vmem>>, %arg4: memref<1200x196xf32, #tpu.memory_space<vmem>>) attributes {dimension_semantics = [#tpu.dimension_semantics<arbitrary>], iteration_bounds = array<i64: 1>, scalar_prefetch = 0 : i64, scratch_operands = 0 : i64, tpu.core_type = #tpu.core_type<tc>, window_params = [{pipeline_mode = #tpu.pipeline_mode<synchronous>, transform_indices = @transform_0, window_bounds = array<i64: 200, 196>}, {pipeline_mode = #tpu.pipeline_mode<synchronous>, transform_indices = @transform_1, window_bounds = array<i64: 200, 196>}, {transform_indices = @transform_2, window_bounds = array<i64: 1200, 200>}, {transform_indices = @transform_3, window_bounds = array<i64: 1200, 196>}]} {
    %c0 = arith.constant 0 : index
    %c0_0 = arith.constant 0 : index
    %0 = vector.load %arg1[%c0, %c0_0] : memref<200x196xf32, #tpu.memory_space<vmem>>, vector<200x196xf32>
    %c0_1 = arith.constant 0 : index
    %c0_2 = arith.constant 0 : index
    %1 = vector.load %arg2[%c0_1, %c0_2] : memref<200x196xf32, #tpu.memory_space<vmem>>, vector<200x196xf32>
    %2 = arith.addf %0, %1 : vector<200x196xf32>
    %3 = arith.truncf %2 : vector<200x196xf32> to vector<200x196xbf16>
    %c0_3 = arith.constant 0 : index
    %c0_4 = arith.constant 0 : index
    %4 = vector.load %arg3[%c0_3, %c0_4] : memref<1200x200xbf16, #tpu.memory_space<vmem>>, vector<1200x200xbf16>
    %cst = arith.constant dense<0.000000e+00> : vector<1200x196xf32>
    %5 = tpu.matmul %4, %3, %cst {dimension_numbers = #tpu.dot_dimension_numbers<[1], [0], [0], [1], [0, 0, 1, 1], [], []>} : vector<1200x200xbf16>, vector<200x196xbf16>, vector<1200x196xf32> -> vector<1200x196xf32>
    %c0_5 = arith.constant 0 : index
    %c0_6 = arith.constant 0 : index
    %6 = vector.load %arg4[%c0_5, %c0_6] : memref<1200x196xf32, #tpu.memory_space<vmem>>, vector<1200x196xf32>
    tpu.vector_store %arg4[%c0_5, %c0_6], %5 {strides = array<i32>} : memref<1200x196xf32, #tpu.memory_space<vmem>>, vector<1200x196xf32>,
    return
  }
  func.func @transform_0(%arg0: i32) -> (i32, i32) {
    %c0_i32 = arith.constant 0 : i32
    %c0_i32_0 = arith.constant 0 : i32
    %c0_i32_1 = arith.constant 0 : i32
    return %c0_i32, %c0_i32_0 : i32, i32
  }
  func.func @transform_1(%arg0: i32) -> (i32, i32) {
    %c0_i32 = arith.constant 0 : i32
    %c0_i32_0 = arith.constant 0 : i32
    %c0_i32_1 = arith.constant 0 : i32
    return %c0_i32, %c0_i32_0 : i32, i32
  }
  func.func @transform_2(%arg0: i32) -> (i32, i32) {
    %c0_i32 = arith.constant 0 : i32
    %c0_i32_0 = arith.constant 0 : i32
    return %arg0, %c0_i32 : i32, i32
  }
  func.func @transform_3(%arg0: i32) -> (i32, i32) {
    %c0_i32 = arith.constant 0 : i32
    %c0_i32_0 = arith.constant 0 : i32
    return %arg0, %c0_i32 : i32, i32
  }
}

</mosaic_0001>

<bundles_post_ra>
// kernel: tpu_custom_call.1
= control target key start
LH: loop header
LB: loop body
LE: loop exit
PB: predicated region body
PF: predicated region fallthrough
CT: control target
= control target key end

     0   :  { %vm1242_vm0 = vcmask 1043456   ;;  %vm1016_vm1 = vcmask 588800   ;;  %vm2786_vm2 = vcmask 556032   ;;  %s6412_s0 = inlined_call_operand.vmem [shape: f32[200,196], index: 0, kind: input, shape index: {}]   ;;  %s6413_s1 = inlined_call_operand.vmem [shape: f32[200,196], index: 1, kind: input, shape index: {}]   ;;  %s6414_s2 = inlined_call_operand.vmem [shape: bf16[1200,200], index: 2, kind: input, shape index: {}]   ;;  %s6415_s3 = inlined_call_operand.vmem [shape: f32[1200,196], index: 3, kind: output, shape index: {}]  }
   0x1   :  { %v43_v0 = vld [vmem:[%s6412_s0 + $0xe0] sm:$0xff]  ;;  %v45_v1 = vld [vmem:[%s6412_s0 + $0xf0] sm:$0xff]  ;;  %v44_v5 = vld [vmem:[%s6412_s0 + $0xe8] sm:$0xff] }
   0x2   :  { %v93_v2 = vld [vmem:[%s6413_s1 + $0xe0] sm:$0xff]  ;;  %v95_v3 = vld [vmem:[%s6413_s1 + $0xf0] sm:$0xff]  ;;  %v46_v6 = vld [vmem:[%s6412_s0 + $0xf8] sm:$0xff] }
   0x3   :  { %v143_v4 = vadd.f32 %v93_v2, %v43_v0  ;;  %v145_v7 = vadd.f32 %v95_v3, %v45_v1  ;;  %v94_v8 = vld [vmem:[%s6413_s1 + $0xe8] sm:$0xff]  ;;  %v96_v9 = vld [vmem:[%s6413_s1 + $0xf8] sm:$0xff]  ;;  %v39_v10 = vld [vmem:[%s6412_s0 + $0xc0] sm:$0xff] }
   0x4   :  { %v144_v11 = vadd.f32 %v94_v8, %v44_v5  ;;  %v146_v12 = vadd.f32 %v96_v9, %v46_v6  ;;  %v41_v13 = vld [vmem:[%s6412_s0 + $0xd0] sm:$0xff]  ;;  %v89_v14 = vld [vmem:[%s6413_s1 + $0xc0] sm:$0xff]  ;;  %v40_v19 = vld [vmem:[%s6412_s0 + $0xc8] sm:$0xff] }
   0x5   :  { %v91_v15 = vld [vmem:[%s6413_s1 + $0xd0] sm:$0xff]  ;;  %v179_v16 = vpack.c.bf16 %v145_v7, %v143_v4  ;;  %v139_v17 = vadd.f32 %v89_v14, %v39_v10  ;;  %v42_v20 = vld [vmem:[%s6412_s0 + $0xd8] sm:$0xff]  ;;  %v90_v21 = vld [vmem:[%s6413_s1 + $0xc8] sm:$0xff] }
   0x6   :  { %v141_v18 = vadd.f32 %v91_v15, %v41_v13  ;;  %v180_v22 = vpack.c.bf16 %v146_v12, %v144_v11  ;;  %v92_v23 = vld [vmem:[%s6413_s1 + $0xd8] sm:$0xff]  ;;  %v140_v24 = vadd.f32 %v90_v21, %v40_v19  ;;  %v64_v25 = vld [vmem:[%s6412_s0 + $0x188] sm:$0xff]  ;;  %v35_v30 = vld [vmem:[%s6412_s0 + $0xa0] sm:$0xff] }
   0x7   :  { %v114_v26 = vld [vmem:[%s6413_s1 + $0x188] sm:$0xff]  ;;  %1249 = vmatpush.bf16.msra.mxu0 %v179_v16  ;;  %v142_v28 = vadd.f32 %v92_v23, %v42_v20  ;;  %v37_v31 = vld [vmem:[%s6412_s0 + $0xb0] sm:$0xff]  ;;  %v85_v32 = vld [vmem:[%s6413_s1 + $0xa0] sm:$0xff] }
   0x8   :  { %v177_v27 = vpack.c.bf16 %v141_v18, %v139_v17  ;;  %v164_v29 = vadd.f32 %v114_v26, %v64_v25  ;;  %2017 = vmatpush.bf16.msra.mxu2 %v180_v22  ;;  %v87_v33 = vld [vmem:[%s6413_s1 + $0xb0] sm:$0xff]  ;;  %v135_v34 = vadd.f32 %v85_v32, %v35_v30  ;;  %v36_v35 = vld [vmem:[%s6412_s0 + $0xa8] sm:$0xff]  ;;  %v38_v36 = vld [vmem:[%s6412_s0 + $0xb8] sm:$0xff] }
   0x9   :  { %v178_v37 = vpack.c.bf16 %v142_v28, %v140_v24  ;;  %v137_v39 = vadd.f32 %v87_v33, %v37_v31  ;;  %v86_v40 = vld [vmem:[%s6413_s1 + $0xa8] sm:$0xff]  ;;  %v88_v41 = vld [vmem:[%s6413_s1 + $0xb8] sm:$0xff]  ;;  %v63_v52 = vld [vmem:[%s6412_s0 + $0x180] sm:$0xff] }
   0xa   :  { %v190_v38 = vpack.c.bf16 %v164_v29, %v164_v29  ;;  %v60_v42 = vld [vmem:[%s6412_s0 + $0x168] sm:$0xff]  ;;  %v136_v43 = vadd.f32 %v86_v40, %v36_v35  ;;  %v138_v44 = vadd.f32 %v88_v41, %v38_v36  ;;  %v62_v45 = vld [vmem:[%s6412_s0 + $0x178] sm:$0xff]  ;;  %v113_v53 = vld [vmem:[%s6413_s1 + $0x180] sm:$0xff] }
   0xb   :  { %v110_v46 = vld [vmem:[%s6413_s1 + $0x168] sm:$0xff]  ;;  %v112_v47 = vld [vmem:[%s6413_s1 + $0x178] sm:$0xff]  ;;  %1250 = vmatpush.bf16.msra.mxu0 %v177_v27  ;;  %v175_v49 = vpack.c.bf16 %v137_v39, %v135_v34  ;;  %v31_v54 = vld [vmem:[%s6412_s0 + $0x80] sm:$0xff]  ;;  %v163_v56 = vadd.f32 %v113_v53, %v63_v52 }
   0xc   :  { %v1247_v48 = vsel %vm1242_vm0, %v190_v38, 0  ;;  %v160_v50 = vadd.f32 %v110_v46, %v60_v42  ;;  %v162_v51 = vadd.f32 %v112_v47, %v62_v45  ;;  %2018 = vmatpush.bf16.msra.mxu2 %v178_v37  ;;  %v176_v55 = vpack.c.bf16 %v138_v44, %v136_v43  ;;  %v33_v57 = vld [vmem:[%s6412_s0 + $0x90] sm:$0xff]  ;;  %v81_v58 = vld [vmem:[%s6413_s1 + $0x80] sm:$0xff]  ;;  %v32_v63 = vld [vmem:[%s6412_s0 + $0x88] sm:$0xff] }
   0xd   :  { %2404 = vmatpush.bf16.msra.mxu3 %v1247_v48  ;;  %v83_v59 = vld [vmem:[%s6413_s1 + $0x90] sm:$0xff]  ;;  %v131_v61 = vadd.f32 %v81_v58, %v31_v54  ;;  %v34_v0 = vld [vmem:[%s6412_s0 + $0x98] sm:$0xff]  ;;  %v82_v1 = vld [vmem:[%s6413_s1 + $0x88] sm:$0xff]  ;;  %v189_v2 = vpack.c.bf16 %v163_v56, %v163_v56 }
   0xe   :  { %v188_v60 = vpack.c.bf16 %v162_v51, %v160_v50  ;;  %v133_v62 = vadd.f32 %v83_v59, %v33_v57  ;;  %v84_v3 = vld [vmem:[%s6413_s1 + $0x98] sm:$0xff]  ;;  %v132_v4 = vadd.f32 %v82_v1, %v32_v63  ;;  %v56_v5 = vld [vmem:[%s6412_s0 + $0x148] sm:$0xff]  ;;  %v59_v11 = vld [vmem:[%s6412_s0 + $0x160] sm:$0xff] }
   0xf   :  { %v58_v6 = vld [vmem:[%s6412_s0 + $0x158] sm:$0xff]  ;;  %1251 = vmatpush.bf16.msra.mxu0 %v175_v49  ;;  %v134_v8 = vadd.f32 %v84_v3, %v34_v0  ;;  %v106_v9 = vld [vmem:[%s6413_s1 + $0x148] sm:$0xff]  ;;  %v1244_v12 = vsel %vm1242_vm0, %v189_v2, 0  ;;  %v61_v15 = vld [vmem:[%s6412_s0 + $0x170] sm:$0xff] }
  0x10   :  { %v173_v7 = vpack.c.bf16 %v133_v62, %v131_v61  ;;  %v108_v10 = vld [vmem:[%s6413_s1 + $0x158] sm:$0xff]  ;;  %2019 = vmatpush.bf16.msra.mxu2 %v176_v55  ;;  %v156_v13 = vadd.f32 %v106_v9, %v56_v5  ;;  %v109_v16 = vld [vmem:[%s6413_s1 + $0x160] sm:$0xff]  ;;  %v111_v17 = vld [vmem:[%s6413_s1 + $0x170] sm:$0xff]  ;;  %1636 = vmatpush.bf16.msra.mxu1 %v1244_v12 }
  0x11   :  { %2405 = vmatpush.bf16.msra.mxu3 %v188_v60  ;;  %v158_v14 = vadd.f32 %v108_v10, %v58_v6  ;;  %v174_v18 = vpack.c.bf16 %v134_v8, %v132_v4  ;;  %v159_v19 = vadd.f32 %v109_v16, %v59_v11  ;;  %v161_v20 = vadd.f32 %v111_v17, %v61_v15  ;;  %v27_v21 = vld [vmem:[%s6412_s0 + $0x60] sm:$0xff]  ;;  %v29_v22 = vld [vmem:[%s6412_s0 + $0x70] sm:$0xff]  ;;  %v28_v27 = vld [vmem:[%s6412_s0 + $0x68] sm:$0xff] }
  0x12   :  { %v77_v23 = vld [vmem:[%s6413_s1 + $0x60] sm:$0xff]  ;;  %v79_v25 = vld [vmem:[%s6413_s1 + $0x70] sm:$0xff]  ;;  %v30_v28 = vld [vmem:[%s6412_s0 + $0x78] sm:$0xff] }
  0x13   :  { %v186_v24 = vpack.c.bf16 %v158_v14, %v156_v13  ;;  %v127_v26 = vadd.f32 %v77_v23, %v27_v21  ;;  %1252 = vmatpush.bf16.msra.mxu0 %v173_v7  ;;  %v187_v29 = vpack.c.bf16 %v161_v20, %v159_v19  ;;  %v129_v30 = vadd.f32 %v79_v25, %v29_v22  ;;  %v78_v31 = vld [vmem:[%s6413_s1 + $0x68] sm:$0xff]  ;;  %v80_v32 = vld [vmem:[%s6413_s1 + $0x78] sm:$0xff]  ;;  %v55_v42 = vld [vmem:[%s6412_s0 + $0x140] sm:$0xff] }
  0x14   :  { %v52_v33 = vld [vmem:[%s6412_s0 + $0x128] sm:$0xff]  ;;  %2020 = vmatpush.bf16.msra.mxu2 %v174_v18  ;;  %v128_v34 = vadd.f32 %v78_v31, %v28_v27  ;;  %v130_v35 = vadd.f32 %v80_v32, %v30_v28  ;;  %v54_v36 = vld [vmem:[%s6412_s0 + $0x138] sm:$0xff]  ;;  %v57_v43 = vld [vmem:[%s6412_s0 + $0x150] sm:$0xff] }
  0x15   :  { %2406 = vmatpush.bf16.msra.mxu3 %v186_v24  ;;  %v102_v37 = vld [vmem:[%s6413_s1 + $0x128] sm:$0xff]  ;;  %v104_v38 = vld [vmem:[%s6413_s1 + $0x138] sm:$0xff]  ;;  %1637 = vmatpush.bf16.msra.mxu1 %v187_v29  ;;  %v171_v39 = vpack.c.bf16 %v129_v30, %v127_v26  ;;  %v105_v44 = vld [vmem:[%s6413_s1 + $0x140] sm:$0xff] }
  0x16   :  { %v152_v40 = vadd.f32 %v102_v37, %v52_v33  ;;  %v154_v41 = vadd.f32 %v104_v38, %v54_v36  ;;  %v172_v45 = vpack.c.bf16 %v130_v35, %v128_v34  ;;  %v107_v46 = vld [vmem:[%s6413_s1 + $0x150] sm:$0xff]  ;;  %v155_v47 = vadd.f32 %v105_v44, %v55_v42  ;;  %v23_v48 = vld [vmem:[%s6412_s0 + $0x40] sm:$0xff]  ;;  %v24_v54 = vld [vmem:[%s6412_s0 + $0x48] sm:$0xff] }
  0x17   :  { %v25_v49 = vld [vmem:[%s6412_s0 + $0x50] sm:$0xff]  ;;  %1253 = vmatpush.bf16.msra.mxu0 %v171_v39  ;;  %v157_v51 = vadd.f32 %v107_v46, %v57_v43  ;;  %v73_v52 = vld [vmem:[%s6413_s1 + $0x40] sm:$0xff]  ;;  %v26_v57 = vld [vmem:[%s6412_s0 + $0x58] sm:$0xff] }
  0x18   :  { %v184_v50 = vpack.c.bf16 %v154_v41, %v152_v40  ;;  %v75_v53 = vld [vmem:[%s6413_s1 + $0x50] sm:$0xff]  ;;  %2021 = vmatpush.bf16.msra.mxu2 %v172_v45  ;;  %v123_v55 = vadd.f32 %v73_v52, %v23_v48  ;;  %v74_v58 = vld [vmem:[%s6413_s1 + $0x48] sm:$0xff]  ;;  %v76_v59 = vld [vmem:[%s6413_s1 + $0x58] sm:$0xff] }
  0x19   :  { %v125_v56 = vadd.f32 %v75_v53, %v25_v49  ;;  %v185_v60 = vpack.c.bf16 %v157_v51, %v155_v47  ;;  %v124_v61 = vadd.f32 %v74_v58, %v24_v54  ;;  %v126_v62 = vadd.f32 %v76_v59, %v26_v57  ;;  %v48_v63 = vld [vmem:[%s6412_s0 + $0x108] sm:$0xff]  ;;  %v50_v0 = vld [vmem:[%s6412_s0 + $0x118] sm:$0xff]  ;;  %v51_v5 = vld [vmem:[%s6412_s0 + $0x120] sm:$0xff] }
  0x1a   :  { %2407 = vmatpush.bf16.msra.mxu3 %v184_v50  ;;  %v98_v1 = vld [vmem:[%s6413_s1 + $0x108] sm:$0xff]  ;;  %v100_v3 = vld [vmem:[%s6413_s1 + $0x118] sm:$0xff]  ;;  %v53_v6 = vld [vmem:[%s6412_s0 + $0x130] sm:$0xff] }
  0x1b   :  { %v169_v2 = vpack.c.bf16 %v125_v56, %v123_v55  ;;  %v148_v4 = vadd.f32 %v98_v1, %v48_v63  ;;  %1638 = vmatpush.bf16.msra.mxu1 %v185_v60  ;;  %v170_v7 = vpack.c.bf16 %v126_v62, %v124_v61  ;;  %v150_v8 = vadd.f32 %v100_v3, %v50_v0  ;;  %v101_v9 = vld [vmem:[%s6413_s1 + $0x120] sm:$0xff]  ;;  %v103_v10 = vld [vmem:[%s6413_s1 + $0x130] sm:$0xff]  ;;  %v3094_v14 = vld [vmem:[%s6414_s2 + $0x8] sm:$0xf0] }
  0x1c   :  { %v3840_v11 = vld [vmem:[%s6414_s2 + $0x4] sm:$0xf]  ;;  %v151_v12 = vadd.f32 %v101_v9, %v51_v5  ;;  %v153_v13 = vadd.f32 %v103_v10, %v53_v6  ;;  %v21_v16 = vld [vmem:[%s6412_s0 + $0x30] sm:$0xff]  ;;  %v20_v20 = vld [vmem:[%s6412_s0 + $0x28] sm:$0xff] }
  0x1d   :  { %1254 = vmatpush.bf16.msra.mxu0 %v169_v2  ;;  %v19_v15 = vld [vmem:[%s6412_s0 + $0x20] sm:$0xff]  ;;  %2022 = vmatpush.bf16.msra.mxu2 %v170_v7  ;;  %v182_v17 = vpack.c.bf16 %v150_v8, %v148_v4  ;;  %v71_v19 = vld [vmem:[%s6413_s1 + $0x30] sm:$0xff]  ;;  %v3097_v22 = vor.u32 %v3840_v11, %v3094_v14  ;;  %v22_v25 = vld [vmem:[%s6412_s0 + $0x38] sm:$0xff] }
  0x1e   :  { %v69_v18 = vld [vmem:[%s6413_s1 + $0x20] sm:$0xff]  ;;  %v183_v21 = vpack.c.bf16 %v153_v13, %v151_v12  ;;  %v121_v24 = vadd.f32 %v71_v19, %v21_v16  ;;  %v70_v26 = vld [vmem:[%s6413_s1 + $0x28] sm:$0xff]  ;;  %v72_v27 = vld [vmem:[%s6413_s1 + $0x38] sm:$0xff] }
  0x1f   :  { %v119_v23 = vadd.f32 %v69_v18, %v19_v15  ;;  %2408 = vmatpush.bf16.msra.mxu3 %v182_v17  ;;  %v120_v28 = vadd.f32 %v70_v26, %v20_v20  ;;  %v122_v29 = vadd.f32 %v72_v27, %v22_v25  ;;  %v47_v30 = vld [vmem:[%s6412_s0 + $0x100] sm:$0xff]  ;;  %v49_v31 = vld [vmem:[%s6412_s0 + $0x110] sm:$0xff]  ;;  %v16_v42 = vld [vmem:[%s6412_s0 + $0x8] sm:$0xff] }
  0x20   :  { %v97_v32 = vld [vmem:[%s6413_s1 + $0x100] sm:$0xff]  ;;  %1639 = vmatpush.bf16.msra.mxu1 %v183_v21  ;;  %v99_v34 = vld [vmem:[%s6413_s1 + $0x110] sm:$0xff]  ;;  %v18_v45 = vld [vmem:[%s6412_s0 + $0x18] sm:$0xff] }
  0x21   :  { %v167_v33 = vpack.c.bf16 %v121_v24, %v119_v23  ;;  %v147_v35 = vadd.f32 %v97_v32, %v47_v30  ;;  %v15_v36 = vld [vmem:[%s6412_s0] sm:$0xff]  ;;  %v17_v37 = vld [vmem:[%s6412_s0 + $0x10] sm:$0xff]  ;;  %v168_v38 = vpack.c.bf16 %v122_v29, %v120_v28  ;;  %v149_v39 = vadd.f32 %v99_v34, %v49_v31  ;;  %v66_v46 = vld [vmem:[%s6413_s1 + $0x8] sm:$0xff] }
  0x22   :  { %v65_v40 = vld [vmem:[%s6413_s1] sm:$0xff]  ;;  %v67_v41 = vld [vmem:[%s6413_s1 + $0x10] sm:$0xff]  ;;  %3765 = vmatmul.msk.bf16.vlgmr.msra.gmra.mxu3 %vm1016_vm1, %v3097_v22  ;;  %v68_v47 = vld [vmem:[%s6413_s1 + $0x18] sm:$0xff]  ;;  %v116_v49 = vadd.f32 %v66_v46, %v16_v42 }
  0x23   :  { %1255 = vmatpush.bf16.msra.mxu0 %v167_v33  ;;  %v115_v43 = vadd.f32 %v65_v40, %v15_v36  ;;  %v117_v44 = vadd.f32 %v67_v41, %v17_v37  ;;  %2023 = vmatpush.bf16.msra.mxu2 %v168_v38  ;;  %v181_v48 = vpack.c.bf16 %v149_v39, %v147_v35  ;;  %v3092_v51 = vld [vmem:[%s6414_s2] sm:$0xf]  ;;  %v3841_v52 = vld [vmem:[%s6414_s2 + $0x4] sm:$0xf0]  ;;  %v3842_v56 = vld [vmem:[%s6414_s2 + $0x14] sm:$0xf] }
  0x24   :  { %v118_v50 = vadd.f32 %v68_v47, %v18_v45  ;;  %v3093_v55 = vor.u32 %v3841_v52, %v3092_v51  ;;  %v3102_v57 = vld [vmem:[%s6414_s2 + $0x18] sm:$0xf0]  ;;  %v3100_v59 = vld [vmem:[%s6414_s2 + $0x10] sm:$0xf]  ;;  %v3843_v60 = vld [vmem:[%s6414_s2 + $0x14] sm:$0xf0] }
  0x25   :  { %v165_v53 = vpack.c.bf16 %v117_v44, %v115_v43  ;;  %1640 = vmatpush.bf16.msra.mxu1 %v181_v48  ;;  %v3105_v58 = vor.u32 %v3842_v56, %v3102_v57  ;;  %v3101_v61 = vor.u32 %v3843_v60, %v3100_v59  ;;  %v3844_v62 = vld [vmem:[%s6414_s2 + $0x24] sm:$0xf]  ;;  %v3110_v63 = vld [vmem:[%s6414_s2 + $0x28] sm:$0xf0]  ;;  %v3108_v1 = vld [vmem:[%s6414_s2 + $0x20] sm:$0xf] }
  0x26   :  { %v166_v54 = vpack.c.bf16 %v118_v50, %v116_v49  ;;  %v3113_v0 = vor.u32 %v3844_v62, %v3110_v63  ;;  %v3845_v2 = vld [vmem:[%s6414_s2 + $0x24] sm:$0xf0]  ;;  %v3846_v4 = vld [vmem:[%s6414_s2 + $0x34] sm:$0xf]  ;;  %v3118_v5 = vld [vmem:[%s6414_s2 + $0x38] sm:$0xf0] }
  0x27   :  { %1256 = vmatpush.bf16.msra.mxu0 %v165_v53  ;;  %v3109_v3 = vor.u32 %v3845_v2, %v3108_v1  ;;  %v3121_v6 = vor.u32 %v3846_v4, %v3118_v5  ;;  %v3116_v7 = vld [vmem:[%s6414_s2 + $0x30] sm:$0xf]  ;;  %v3847_v8 = vld [vmem:[%s6414_s2 + $0x34] sm:$0xf0]  ;;  %v3848_v10 = vld [vmem:[%s6414_s2 + $0x44] sm:$0xf] }
  0x28   :  { %2024 = vmatpush.bf16.msra.mxu2 %v166_v54  ;;  %3690 = vmatmul.msk.bf16.vlgmr.msra.gmra.mxu1 %vm1016_vm1, %v3097_v22  ;;  %v3117_v9 = vor.u32 %v3847_v8, %v3116_v7  ;;  %v3126_v11 = vld [vmem:[%s6414_s2 + $0x48] sm:$0xf0]  ;;  %v3124_v13 = vld [vmem:[%s6414_s2 + $0x40] sm:$0xf]  ;;  %v3849_v14 = vld [vmem:[%s6414_s2 + $0x44] sm:$0xf0] }
  0x29   :  { %v3129_v12 = vor.u32 %v3848_v10, %v3126_v11  ;;  %v3125_v15 = vor.u32 %v3849_v14, %v3124_v13  ;;  %v3850_v16 = vld [vmem:[%s6414_s2 + $0x54] sm:$0xf]  ;;  %v3134_v17 = vld [vmem:[%s6414_s2 + $0x58] sm:$0xf0]  ;;  %v3132_v19 = vld [vmem:[%s6414_s2 + $0x50] sm:$0xf] }
  0x2a   :  { %1257 = vmatmul.bf16.vlgmr.msra.gmra.mxu0 %v3093_v55  ;;  %v3137_v18 = vor.u32 %v3850_v16, %v3134_v17  ;;  %v3851_v20 = vld [vmem:[%s6414_s2 + $0x54] sm:$0xf0]  ;;  %v3852_v22 = vld [vmem:[%s6414_s2 + $0x64] sm:$0xf]  ;;  %v3142_v23 = vld [vmem:[%s6414_s2 + $0x68] sm:$0xf0] }
  0x2b   :  { %2025 = vmatmul.bf16.vlgmr.msra.gmra.mxu2 %v3093_v55  ;;  %v3133_v21 = vor.u32 %v3851_v20, %v3132_v19  ;;  %v3145_v24 = vor.u32 %v3852_v22, %v3142_v23  ;;  %v3140_v25 = vld [vmem:[%s6414_s2 + $0x60] sm:$0xf]  ;;  %v3853_v26 = vld [vmem:[%s6414_s2 + $0x64] sm:$0xf0]  ;;  %v3854_v28 = vld [vmem:[%s6414_s2 + $0x74] sm:$0xf] }
  0x2c   :  { %v3141_v27 = vor.u32 %v3853_v26, %v3140_v25  ;;  %v3150_v29 = vld [vmem:[%s6414_s2 + $0x78] sm:$0xf0]  ;;  %v3148_v31 = vld [vmem:[%s6414_s2 + $0x70] sm:$0xf]  ;;  %v3855_v32 = vld [vmem:[%s6414_s2 + $0x74] sm:$0xf0] }
  0x2d   :  { %v3153_v30 = vor.u32 %v3854_v28, %v3150_v29  ;;  %v3149_v33 = vor.u32 %v3855_v32, %v3148_v31  ;;  %v3856_v34 = vld [vmem:[%s6414_s2 + $0x84] sm:$0xf]  ;;  %v3158_v35 = vld [vmem:[%s6414_s2 + $0x88] sm:$0xf0]  ;;  %v3156_v37 = vld [vmem:[%s6414_s2 + $0x80] sm:$0xf] }
  0x2e   :  { %v3161_v36 = vor.u32 %v3856_v34, %v3158_v35  ;;  %v3857_v38 = vld [vmem:[%s6414_s2 + $0x84] sm:$0xf0]  ;;  %v3858_v44 = vld [vmem:[%s6414_s2 + $0x94] sm:$0xf]  ;;  %v3166_v45 = vld [vmem:[%s6414_s2 + $0x98] sm:$0xf0] }
  0x2f   :  { %v3157_v41 = vor.u32 %v3857_v38, %v3156_v37  ;;  %v3169_v51 = vor.u32 %v3858_v44, %v3166_v45  ;;  %v3164_v53 = vld [vmem:[%s6414_s2 + $0x90] sm:$0xf]  ;;  %v3859_v54 = vld [vmem:[%s6414_s2 + $0x94] sm:$0xf0]  ;;  %v3860_v62 = vld [vmem:[%s6414_s2 + $0xa4] sm:$0xf] }
  0x30   :  { %v3165_v57 = vor.u32 %v3859_v54, %v3164_v53  ;;  %v3174_v63 = vld [vmem:[%s6414_s2 + $0xa8] sm:$0xf0]  ;;  %v3172_v7 = vld [vmem:[%s6414_s2 + $0xa0] sm:$0xf]  ;;  %v3861_v8 = vld [vmem:[%s6414_s2 + $0xa4] sm:$0xf0] }
  0x31   :  { %v3177_v5 = vor.u32 %v3860_v62, %v3174_v63  ;;  %v3173_v11 = vor.u32 %v3861_v8, %v3172_v7  ;;  %v3862_v16 = vld [vmem:[%s6414_s2 + $0xb4] sm:$0xf]  ;;  %v3182_v17 = vld [vmem:[%s6414_s2 + $0xb8] sm:$0xf0]  ;;  %v3180_v25 = vld [vmem:[%s6414_s2 + $0xb0] sm:$0xf] }
  0x32   :  { %3766 = vmatmul.msk.bf16.gmra.mxu3 %vm1016_vm1, %v3105_v58  ;;  %v3185_v23 = vor.u32 %v3862_v16, %v3182_v17  ;;  %v3863_v26 = vld [vmem:[%s6414_s2 + $0xb4] sm:$0xf0]  ;;  %v3864_v34 = vld [vmem:[%s6414_s2 + $0xc4] sm:$0xf]  ;;  %v3190_v35 = vld [vmem:[%s6414_s2 + $0xc8] sm:$0xf0] }
  0x33   :  { %v3181_v29 = vor.u32 %v3863_v26, %v3180_v25  ;;  %v3865_v44 = vld [vmem:[%s6414_s2 + $0xc4] sm:$0xf0]  ;;  %v3198_v53 = vld [vmem:[%s6414_s2 + $0xd8] sm:$0xf0]  ;;  %v3867_v62 = vld [vmem:[%s6414_s2 + $0xd4] sm:$0xf0] }
  0x34   :  { %v3206_v7 = vld [vmem:[%s6414_s2 + $0xe8] sm:$0xf0]  ;;  %v3869_v16 = vld [vmem:[%s6414_s2 + $0xe4] sm:$0xf0]  ;;  %v3214_v25 = vld [vmem:[%s6414_s2 + $0xf8] sm:$0xf0] }
  0x38   :  { %3691 = vmatmul.msk.bf16.gmra.mxu1 %vm1016_vm1, %v3105_v58 }
  0x3a   :  { %1262 = vmatmul.bf16.gmra.mxu0 %v3101_v61 }
  0x3b   :  { %2030 = vmatmul.bf16.gmra.mxu2 %v3101_v61 }
  0x42   :  { %3767 = vmatmul.msk.bf16.gmra.mxu3 %vm1016_vm1, %v3113_v0 }
  0x48   :  { %3692 = vmatmul.msk.bf16.gmra.mxu1 %vm1016_vm1, %v3113_v0 }
  0x4a   :  { %1267 = vmatmul.bf16.gmra.mxu0 %v3109_v3 }
  0x4b   :  { %2035 = vmatmul.bf16.gmra.mxu2 %v3109_v3 }
  0x52   :  { %3768 = vmatmul.msk.bf16.gmra.mxu3 %vm1016_vm1, %v3121_v6 }
  0x58   :  { %3693 = vmatmul.msk.bf16.gmra.mxu1 %vm1016_vm1, %v3121_v6 }
  0x5a   :  { %1272 = vmatmul.bf16.gmra.mxu0 %v3117_v9 }
  0x5b   :  { %2040 = vmatmul.bf16.gmra.mxu2 %v3117_v9 }
  0x62   :  { %3769 = vmatmul.msk.bf16.gmra.mxu3 %vm1016_vm1, %v3129_v12 }
  0x68   :  { %3694 = vmatmul.msk.bf16.gmra.mxu1 %vm1016_vm1, %v3129_v12 }
  0x6a   :  { %1277 = vmatmul.bf16.gmra.mxu0 %v3125_v15 }
  0x6b   :  { %2045 = vmatmul.bf16.gmra.mxu2 %v3125_v15 }
  0x72   :  { %3770 = vmatmul.msk.bf16.gmra.mxu3 %vm1016_vm1, %v3137_v18 }
  0x78   :  { %3695 = vmatmul.msk.bf16.gmra.mxu1 %vm1016_vm1, %v3137_v18 }
  0x7a   :  { %1282 = vmatmul.bf16.gmra.mxu0 %v3133_v21 }
  0x7b   :  { %2050 = vmatmul.bf16.gmra.mxu2 %v3133_v21 }
  0x82   :  { %3771 = vmatmul.msk.bf16.gmra.mxu3 %vm1016_vm1, %v3145_v24 }
  0x88   :  { %3696 = vmatmul.msk.bf16.gmra.mxu1 %vm1016_vm1, %v3145_v24 }
  0x8a   :  { %1287 = vmatmul.bf16.gmra.mxu0 %v3141_v27 }
  0x8b   :  { %2055 = vmatmul.bf16.gmra.mxu2 %v3141_v27 }
  0x92   :  { %3772 = vmatmul.msk.bf16.gmra.mxu3 %vm1016_vm1, %v3153_v30 }
  0x98   :  { %3697 = vmatmul.msk.bf16.gmra.mxu1 %vm1016_vm1, %v3153_v30 }
  0x9a   :  { %1292 = vmatmul.bf16.gmra.mxu0 %v3149_v33 }
  0x9b   :  { %2060 = vmatmul.bf16.gmra.mxu2 %v3149_v33 }
  0xa2   :  { %3773 = vmatmul.msk.bf16.gmra.mxu3 %vm1016_vm1, %v3161_v36 }
  0xa5   :  { %v1642_v39 = vpop.f32.mrf.mxu1  ;;  %v2410_v40 = vpop.f32.mrf.mxu3 }
  0xa7   :  { %v1258_v42 = vpop.f32.mrf.mxu0 }
  0xa8   :  { %v1643_v43 = vadd.f32 %v1642_v39, %v1258_v42  ;;  %3698 = vmatmul.msk.bf16.gmra.mxu1 %vm1016_vm1, %v3161_v36 }
  0xaa   :  { %2785 = vst [vmem:[%s6415_s3] sm:$0xff] %v1643_v43  ;;  %1297 = vmatmul.bf16.gmra.mxu0 %v3157_v41  ;;  %v3188_v43 = vld [vmem:[%s6414_s2 + $0xc0] sm:$0xf] }
  0xab   :  { %2065 = vmatmul.bf16.gmra.mxu2 %v3157_v41  ;;  %v3193_v41 = vor.u32 %v3864_v34, %v3190_v35  ;;  %v3871_v34 = vld [vmem:[%s6414_s2 + $0xf4] sm:$0xf0] }
  0xad   :  { %v1644_v46 = vpop.f32.mrf.mxu1  ;;  %v2412_v49 = vpop.f32.mrf.mxu3 }
  0xae   :  { %v2026_v47 = vpop.f32.mrf.mxu2 }
  0xaf   :  { %v2411_v48 = vadd.f32 %v2410_v40, %v2026_v47  ;;  %v1260_v50 = vpop.f32.mrf.mxu0  ;;  %v3189_v47 = vor.u32 %v3865_v44, %v3188_v43  ;;  %v3222_v43 = vld [vmem:[%s6414_s2 + $0x108] sm:$0xf0] }
  0xb0   :  { %v1645_v52 = vadd.f32 %v1644_v46, %v1260_v50 }
  0xb1   :  { %2787 = vst.msk [vmem:[%s6415_s3 + $0x8] sm:$0xff] %vm2786_vm2, %v2411_v48 }
  0xb2   :  { %2788 = vst [vmem:[%s6415_s3 + $0x10] sm:$0xff] %v1645_v52  ;;  %3774 = vmatmul.msk.bf16.gmra.mxu3 %vm1016_vm1, %v3169_v51  ;;  %v3866_v52 = vld [vmem:[%s6414_s2 + $0xd4] sm:$0xf] }
  0xb5   :  { %v1647_v55 = vpop.f32.mrf.mxu1  ;;  %v2415_v59 = vpop.f32.mrf.mxu3 }
  0xb6   :  { %v2028_v56 = vpop.f32.mrf.mxu2 }
  0xb7   :  { %v2413_v58 = vadd.f32 %v2412_v49, %v2028_v56  ;;  %v1263_v60 = vpop.f32.mrf.mxu0 }
  0xb8   :  { %v1648_v61 = vadd.f32 %v1647_v55, %v1263_v60  ;;  %3699 = vmatmul.msk.bf16.gmra.mxu1 %vm1016_vm1, %v3169_v51 }
  0xb9   :  { %2789 = vst.msk [vmem:[%s6415_s3 + $0x18] sm:$0xff] %vm2786_vm2, %v2413_v58 }
  0xba   :  { %2790 = vst [vmem:[%s6415_s3 + $0x20] sm:$0xff] %v1648_v61  ;;  %1302 = vmatmul.bf16.gmra.mxu0 %v3165_v57  ;;  %v3196_v61 = vld [vmem:[%s6414_s2 + $0xd0] sm:$0xf] }
  0xbb   :  { %2070 = vmatmul.bf16.gmra.mxu2 %v3165_v57 }
  0xbd   :  { %v1649_v0 = vpop.f32.mrf.mxu1  ;;  %v2417_v3 = vpop.f32.mrf.mxu3 }
  0xbe   :  { %v2031_v1 = vpop.f32.mrf.mxu2 }
  0xbf   :  { %v2416_v2 = vadd.f32 %v2415_v59, %v2031_v1  ;;  %v1265_v4 = vpop.f32.mrf.mxu0  ;;  %v3201_v59 = vor.u32 %v3866_v52, %v3198_v53  ;;  %v3197_v1 = vor.u32 %v3867_v62, %v3196_v61  ;;  %v3873_v52 = vld [vmem:[%s6414_s2 + $0x104] sm:$0xf0]  ;;  %v3230_v61 = vld [vmem:[%s6414_s2 + $0x118] sm:$0xf0] }
  0xc0   :  { %v1650_v6 = vadd.f32 %v1649_v0, %v1265_v4 }
  0xc1   :  { %2791 = vst.msk [vmem:[%s6415_s3 + $0x28] sm:$0xff] %vm2786_vm2, %v2416_v2 }
  0xc2   :  { %2792 = vst [vmem:[%s6415_s3 + $0x30] sm:$0xff] %v1650_v6  ;;  %3775 = vmatmul.msk.bf16.gmra.mxu3 %vm1016_vm1, %v3177_v5  ;;  %v3868_v6 = vld [vmem:[%s6414_s2 + $0xe4] sm:$0xf] }
  0xc5   :  { %v1652_v9 = vpop.f32.mrf.mxu1  ;;  %v2420_v13 = vpop.f32.mrf.mxu3 }
  0xc6   :  { %v2033_v10 = vpop.f32.mrf.mxu2 }
  0xc7   :  { %v2418_v12 = vadd.f32 %v2417_v3, %v2033_v10  ;;  %v1268_v14 = vpop.f32.mrf.mxu0 }
  0xc8   :  { %v1653_v15 = vadd.f32 %v1652_v9, %v1268_v14  ;;  %3700 = vmatmul.msk.bf16.gmra.mxu1 %vm1016_vm1, %v3177_v5 }
  0xc9   :  { %2793 = vst.msk [vmem:[%s6415_s3 + $0x38] sm:$0xff] %vm2786_vm2, %v2418_v12 }
  0xca   :  { %2794 = vst [vmem:[%s6415_s3 + $0x40] sm:$0xff] %v1653_v15  ;;  %1307 = vmatmul.bf16.gmra.mxu0 %v3173_v11  ;;  %v3204_v15 = vld [vmem:[%s6414_s2 + $0xe0] sm:$0xf] }
  0xcb   :  { %2075 = vmatmul.bf16.gmra.mxu2 %v3173_v11 }
  0xcd   :  { %v1654_v18 = vpop.f32.mrf.mxu1  ;;  %v2422_v21 = vpop.f32.mrf.mxu3 }
  0xce   :  { %v2036_v19 = vpop.f32.mrf.mxu2 }
  0xcf   :  { %v2421_v20 = vadd.f32 %v2420_v13, %v2036_v19  ;;  %v1270_v22 = vpop.f32.mrf.mxu0  ;;  %v3209_v13 = vor.u32 %v3868_v6, %v3206_v7  ;;  %v3205_v19 = vor.u32 %v3869_v16, %v3204_v15  ;;  %v3875_v6 = vld [vmem:[%s6414_s2 + $0x114] sm:$0xf0]  ;;  %v3238_v15 = vld [vmem:[%s6414_s2 + $0x128] sm:$0xf0] }
  0xd0   :  { %v1655_v24 = vadd.f32 %v1654_v18, %v1270_v22 }
  0xd1   :  { %2795 = vst.msk [vmem:[%s6415_s3 + $0x48] sm:$0xff] %vm2786_vm2, %v2421_v20 }
  0xd2   :  { %2796 = vst [vmem:[%s6415_s3 + $0x50] sm:$0xff] %v1655_v24  ;;  %3776 = vmatmul.msk.bf16.gmra.mxu3 %vm1016_vm1, %v3185_v23  ;;  %v3870_v24 = vld [vmem:[%s6414_s2 + $0xf4] sm:$0xf] }
  0xd5   :  { %v1657_v27 = vpop.f32.mrf.mxu1  ;;  %v2425_v31 = vpop.f32.mrf.mxu3 }
  0xd6   :  { %v2038_v28 = vpop.f32.mrf.mxu2 }
  0xd7   :  { %v2423_v30 = vadd.f32 %v2422_v21, %v2038_v28  ;;  %v1273_v32 = vpop.f32.mrf.mxu0 }
  0xd8   :  { %v1658_v33 = vadd.f32 %v1657_v27, %v1273_v32  ;;  %3701 = vmatmul.msk.bf16.gmra.mxu1 %vm1016_vm1, %v3185_v23 }
  0xd9   :  { %2797 = vst.msk [vmem:[%s6415_s3 + $0x58] sm:$0xff] %vm2786_vm2, %v2423_v30 }
  0xda   :  { %2798 = vst [vmem:[%s6415_s3 + $0x60] sm:$0xff] %v1658_v33  ;;  %1312 = vmatmul.bf16.gmra.mxu0 %v3181_v29  ;;  %v3212_v33 = vld [vmem:[%s6414_s2 + $0xf0] sm:$0xf] }
  0xdb   :  { %2080 = vmatmul.bf16.gmra.mxu2 %v3181_v29 }
  0xdd   :  { %v1659_v36 = vpop.f32.mrf.mxu1  ;;  %v2427_v39 = vpop.f32.mrf.mxu3 }
  0xde   :  { %v2041_v37 = vpop.f32.mrf.mxu2 }
  0xdf   :  { %v2426_v38 = vadd.f32 %v2425_v31, %v2041_v37  ;;  %v1275_v40 = vpop.f32.mrf.mxu0  ;;  %v3217_v31 = vor.u32 %v3870_v24, %v3214_v25  ;;  %v3213_v37 = vor.u32 %v3871_v34, %v3212_v33  ;;  %v3877_v24 = vld [vmem:[%s6414_s2 + $0x124] sm:$0xf0]  ;;  %v3246_v33 = vld [vmem:[%s6414_s2 + $0x138] sm:$0xf0] }
  0xe0   :  { %v1660_v42 = vadd.f32 %v1659_v36, %v1275_v40 }
  0xe1   :  { %2799 = vst.msk [vmem:[%s6415_s3 + $0x68] sm:$0xff] %vm2786_vm2, %v2426_v38 }
  0xe2   :  { %2800 = vst [vmem:[%s6415_s3 + $0x70] sm:$0xff] %v1660_v42  ;;  %3777 = vmatmul.msk.bf16.gmra.mxu3 %vm1016_vm1, %v3193_v41  ;;  %v3872_v42 = vld [vmem:[%s6414_s2 + $0x104] sm:$0xf] }
  0xe5   :  { %v1662_v45 = vpop.f32.mrf.mxu1  ;;  %v2430_v49 = vpop.f32.mrf.mxu3 }
  0xe6   :  { %v2043_v46 = vpop.f32.mrf.mxu2 }
  0xe7   :  { %v2428_v48 = vadd.f32 %v2427_v39, %v2043_v46  ;;  %v1278_v50 = vpop.f32.mrf.mxu0 }
  0xe8   :  { %v1663_v51 = vadd.f32 %v1662_v45, %v1278_v50  ;;  %3702 = vmatmul.msk.bf16.gmra.mxu1 %vm1016_vm1, %v3193_v41 }
  0xe9   :  { %2801 = vst.msk [vmem:[%s6415_s3 + $0x78] sm:$0xff] %vm2786_vm2, %v2428_v48 }
  0xea   :  { %2802 = vst [vmem:[%s6415_s3 + $0x80] sm:$0xff] %v1663_v51  ;;  %1317 = vmatmul.bf16.gmra.mxu0 %v3189_v47  ;;  %v3220_v51 = vld [vmem:[%s6414_s2 + $0x100] sm:$0xf] }
  0xeb   :  { %2085 = vmatmul.bf16.gmra.mxu2 %v3189_v47 }
  0xed   :  { %v1664_v54 = vpop.f32.mrf.mxu1  ;;  %v2432_v57 = vpop.f32.mrf.mxu3 }
  0xee   :  { %v2046_v55 = vpop.f32.mrf.mxu2 }
  0xef   :  { %v2431_v56 = vadd.f32 %v2430_v49, %v2046_v55  ;;  %v1280_v58 = vpop.f32.mrf.mxu0  ;;  %v3225_v49 = vor.u32 %v3872_v42, %v3222_v43  ;;  %v3221_v55 = vor.u32 %v3873_v52, %v3220_v51  ;;  %v3879_v42 = vld [vmem:[%s6414_s2 + $0x134] sm:$0xf0]  ;;  %v3254_v51 = vld [vmem:[%s6414_s2 + $0x148] sm:$0xf0] }
  0xf0   :  { %v1665_v60 = vadd.f32 %v1664_v54, %v1280_v58 }
  0xf1   :  { %2803 = vst.msk [vmem:[%s6415_s3 + $0x88] sm:$0xff] %vm2786_vm2, %v2431_v56 }
  0xf2   :  { %2804 = vst [vmem:[%s6415_s3 + $0x90] sm:$0xff] %v1665_v60  ;;  %3778 = vmatmul.msk.bf16.gmra.mxu3 %vm1016_vm1, %v3201_v59  ;;  %v3874_v60 = vld [vmem:[%s6414_s2 + $0x114] sm:$0xf] }
  0xf5   :  { %v1667_v63 = vpop.f32.mrf.mxu1  ;;  %v2435_v3 = vpop.f32.mrf.mxu3 }
  0xf6   :  { %v2048_v0 = vpop.f32.mrf.mxu2 }
  0xf7   :  { %v2433_v2 = vadd.f32 %v2432_v57, %v2048_v0  ;;  %v1283_v4 = vpop.f32.mrf.mxu0 }
  0xf8   :  { %v1668_v5 = vadd.f32 %v1667_v63, %v1283_v4  ;;  %3703 = vmatmul.msk.bf16.gmra.mxu1 %vm1016_vm1, %v3201_v59 }
  0xf9   :  { %2805 = vst.msk [vmem:[%s6415_s3 + $0x98] sm:$0xff] %vm2786_vm2, %v2433_v2 }
  0xfa   :  { %2806 = vst [vmem:[%s6415_s3 + $0xa0] sm:$0xff] %v1668_v5  ;;  %1322 = vmatmul.bf16.gmra.mxu0 %v3197_v1  ;;  %v3228_v5 = vld [vmem:[%s6414_s2 + $0x110] sm:$0xf] }
  0xfb   :  { %2090 = vmatmul.bf16.gmra.mxu2 %v3197_v1 }
  0xfd   :  { %v1669_v8 = vpop.f32.mrf.mxu1  ;;  %v2437_v11 = vpop.f32.mrf.mxu3 }
  0xfe   :  { %v2051_v9 = vpop.f32.mrf.mxu2 }
  0xff   :  { %v2436_v10 = vadd.f32 %v2435_v3, %v2051_v9  ;;  %v1285_v12 = vpop.f32.mrf.mxu0  ;;  %v3233_v3 = vor.u32 %v3874_v60, %v3230_v61  ;;  %v3229_v9 = vor.u32 %v3875_v6, %v3228_v5  ;;  %v3881_v60 = vld [vmem:[%s6414_s2 + $0x144] sm:$0xf0]  ;;  %v3262_v5 = vld [vmem:[%s6414_s2 + $0x158] sm:$0xf0] }
 0x100   :  { %v1670_v14 = vadd.f32 %v1669_v8, %v1285_v12 }
 0x101   :  { %2807 = vst.msk [vmem:[%s6415_s3 + $0xa8] sm:$0xff] %vm2786_vm2, %v2436_v10 }
 0x102   :  { %2808 = vst [vmem:[%s6415_s3 + $0xb0] sm:$0xff] %v1670_v14  ;;  %3779 = vmatmul.msk.bf16.gmra.mxu3 %vm1016_vm1, %v3209_v13  ;;  %v3876_v14 = vld [vmem:[%s6414_s2 + $0x124] sm:$0xf] }
 0x105   :  { %v1672_v17 = vpop.f32.mrf.mxu1  ;;  %v2440_v21 = vpop.f32.mrf.mxu3 }
 0x106   :  { %v2053_v18 = vpop.f32.mrf.mxu2 }
 0x107   :  { %v2438_v20 = vadd.f32 %v2437_v11, %v2053_v18  ;;  %v1288_v22 = vpop.f32.mrf.mxu0 }
 0x108   :  { %v1673_v23 = vadd.f32 %v1672_v17, %v1288_v22  ;;  %3704 = vmatmul.msk.bf16.gmra.mxu1 %vm1016_vm1, %v3209_v13 }
 0x109   :  { %2809 = vst.msk [vmem:[%s6415_s3 + $0xb8] sm:$0xff] %vm2786_vm2, %v2438_v20 }
 0x10a   :  { %2810 = vst [vmem:[%s6415_s3 + $0xc0] sm:$0xff] %v1673_v23  ;;  %1327 = vmatmul.bf16.gmra.mxu0 %v3205_v19  ;;  %v3236_v23 = vld [vmem:[%s6414_s2 + $0x120] sm:$0xf] }
 0x10b   :  { %2095 = vmatmul.bf16.gmra.mxu2 %v3205_v19 }
 0x10d   :  { %v1674_v26 = vpop.f32.mrf.mxu1  ;;  %v2442_v29 = vpop.f32.mrf.mxu3 }
 0x10e   :  { %v2056_v27 = vpop.f32.mrf.mxu2 }
 0x10f   :  { %v2441_v28 = vadd.f32 %v2440_v21, %v2056_v27  ;;  %v1290_v30 = vpop.f32.mrf.mxu0  ;;  %v3241_v21 = vor.u32 %v3876_v14, %v3238_v15  ;;  %v3237_v27 = vor.u32 %v3877_v24, %v3236_v23  ;;  %v3883_v14 = vld [vmem:[%s6414_s2 + $0x154] sm:$0xf0]  ;;  %v3270_v23 = vld [vmem:[%s6414_s2 + $0x168] sm:$0xf0] }
 0x110   :  { %v1675_v32 = vadd.f32 %v1674_v26, %v1290_v30 }
 0x111   :  { %2811 = vst.msk [vmem:[%s6415_s3 + $0xc8] sm:$0xff] %vm2786_vm2, %v2441_v28 }
 0x112   :  { %2812 = vst [vmem:[%s6415_s3 + $0xd0] sm:$0xff] %v1675_v32  ;;  %3780 = vmatmul.msk.bf16.gmra.mxu3 %vm1016_vm1, %v3217_v31  ;;  %v3878_v32 = vld [vmem:[%s6414_s2 + $0x134] sm:$0xf] }
 0x115   :  { %v1677_v35 = vpop.f32.mrf.mxu1  ;;  %v2445_v39 = vpop.f32.mrf.mxu3 }
 0x116   :  { %v2058_v36 = vpop.f32.mrf.mxu2 }
 0x117   :  { %v2443_v38 = vadd.f32 %v2442_v29, %v2058_v36  ;;  %v1293_v40 = vpop.f32.mrf.mxu0 }
 0x118   :  { %v1678_v41 = vadd.f32 %v1677_v35, %v1293_v40  ;;  %3705 = vmatmul.msk.bf16.gmra.mxu1 %vm1016_vm1, %v3217_v31 }
 0x119   :  { %2813 = vst.msk [vmem:[%s6415_s3 + $0xd8] sm:$0xff] %vm2786_vm2, %v2443_v38 }
 0x11a   :  { %2814 = vst [vmem:[%s6415_s3 + $0xe0] sm:$0xff] %v1678_v41  ;;  %1332 = vmatmul.bf16.gmra.mxu0 %v3213_v37  ;;  %v3244_v41 = vld [vmem:[%s6414_s2 + $0x130] sm:$0xf] }
 0x11b   :  { %2100 = vmatmul.bf16.gmra.mxu2 %v3213_v37 }
 0x11d   :  { %v1679_v44 = vpop.f32.mrf.mxu1  ;;  %v2447_v47 = vpop.f32.mrf.mxu3 }
 0x11e   :  { %v2061_v45 = vpop.f32.mrf.mxu2 }
 0x11f   :  { %v2446_v46 = vadd.f32 %v2445_v39, %v2061_v45  ;;  %v1295_v48 = vpop.f32.mrf.mxu0  ;;  %v3249_v39 = vor.u32 %v3878_v32, %v3246_v33  ;;  %v3245_v45 = vor.u32 %v3879_v42, %v3244_v41  ;;  %v3885_v32 = vld [vmem:[%s6414_s2 + $0x164] sm:$0xf0]  ;;  %v3278_v41 = vld [vmem:[%s6414_s2 + $0x178] sm:$0xf0] }
 0x120   :  { %v1680_v50 = vadd.f32 %v1679_v44, %v1295_v48 }
 0x121   :  { %2815 = vst.msk [vmem:[%s6415_s3 + $0xe8] sm:$0xff] %vm2786_vm2, %v2446_v46 }
 0x122   :  { %2816 = vst [vmem:[%s6415_s3 + $0xf0] sm:$0xff] %v1680_v50  ;;  %3781 = vmatmul.msk.bf16.gmra.mxu3 %vm1016_vm1, %v3225_v49  ;;  %v3880_v50 = vld [vmem:[%s6414_s2 + $0x144] sm:$0xf] }
 0x125   :  { %v1682_v53 = vpop.f32.mrf.mxu1  ;;  %v2450_v57 = vpop.f32.mrf.mxu3 }
 0x126   :  { %v2063_v54 = vpop.f32.mrf.mxu2 }
 0x127   :  { %v2448_v56 = vadd.f32 %v2447_v47, %v2063_v54  ;;  %v1298_v58 = vpop.f32.mrf.mxu0 }
 0x128   :  { %v1683_v59 = vadd.f32 %v1682_v53, %v1298_v58  ;;  %3706 = vmatmul.msk.bf16.gmra.mxu1 %vm1016_vm1, %v3225_v49 }
 0x129   :  { %2817 = vst.msk [vmem:[%s6415_s3 + $0xf8] sm:$0xff] %vm2786_vm2, %v2448_v56 }
 0x12a   :  { %2818 = vst [vmem:[%s6415_s3 + $0x100] sm:$0xff] %v1683_v59  ;;  %1337 = vmatmul.bf16.gmra.mxu0 %v3221_v55  ;;  %v3252_v59 = vld [vmem:[%s6414_s2 + $0x140] sm:$0xf] }
 0x12b   :  { %2105 = vmatmul.bf16.gmra.mxu2 %v3221_v55 }
 0x12d   :  { %v1684_v62 = vpop.f32.mrf.mxu1  ;;  %v2452_v1 = vpop.f32.mrf.mxu3 }
 0x12e   :  { %v2066_v63 = vpop.f32.mrf.mxu2 }
 0x12f   :  { %v2451_v0 = vadd.f32 %v2450_v57, %v2066_v63  ;;  %v1300_v2 = vpop.f32.mrf.mxu0  ;;  %v3257_v57 = vor.u32 %v3880_v50, %v3254_v51  ;;  %v3253_v63 = vor.u32 %v3881_v60, %v3252_v59  ;;  %v3887_v50 = vld [vmem:[%s6414_s2 + $0x174] sm:$0xf0]  ;;  %v3286_v59 = vld [vmem:[%s6414_s2 + $0x188] sm:$0xf0] }
 0x130   :  { %v1685_v4 = vadd.f32 %v1684_v62, %v1300_v2 }
 0x131   :  { %2819 = vst.msk [vmem:[%s6415_s3 + $0x108] sm:$0xff] %vm2786_vm2, %v2451_v0 }
 0x132   :  { %2820 = vst [vmem:[%s6415_s3 + $0x110] sm:$0xff] %v1685_v4  ;;  %3782 = vmatmul.msk.bf16.gmra.mxu3 %vm1016_vm1, %v3233_v3  ;;  %v3882_v4 = vld [vmem:[%s6414_s2 + $0x154] sm:$0xf] }
 0x135   :  { %v1687_v7 = vpop.f32.mrf.mxu1  ;;  %v2455_v11 = vpop.f32.mrf.mxu3 }
 0x136   :  { %v2068_v8 = vpop.f32.mrf.mxu2 }
 0x137   :  { %v2453_v10 = vadd.f32 %v2452_v1, %v2068_v8  ;;  %v1303_v12 = vpop.f32.mrf.mxu0 }
 0x138   :  { %v1688_v13 = vadd.f32 %v1687_v7, %v1303_v12  ;;  %3707 = vmatmul.msk.bf16.gmra.mxu1 %vm1016_vm1, %v3233_v3 }
 0x139   :  { %2821 = vst.msk [vmem:[%s6415_s3 + $0x118] sm:$0xff] %vm2786_vm2, %v2453_v10 }
 0x13a   :  { %2822 = vst [vmem:[%s6415_s3 + $0x120] sm:$0xff] %v1688_v13  ;;  %1342 = vmatmul.bf16.gmra.mxu0 %v3229_v9  ;;  %v3260_v13 = vld [vmem:[%s6414_s2 + $0x150] sm:$0xf] }
 0x13b   :  { %2110 = vmatmul.bf16.gmra.mxu2 %v3229_v9 }
 0x13d   :  { %v1689_v16 = vpop.f32.mrf.mxu1  ;;  %v2457_v19 = vpop.f32.mrf.mxu3 }
 0x13e   :  { %v2071_v17 = vpop.f32.mrf.mxu2 }
 0x13f   :  { %v2456_v18 = vadd.f32 %v2455_v11, %v2071_v17  ;;  %v1305_v20 = vpop.f32.mrf.mxu0  ;;  %v3265_v11 = vor.u32 %v3882_v4, %v3262_v5  ;;  %v3261_v17 = vor.u32 %v3883_v14, %v3260_v13  ;;  %v3889_v4 = vld [vmem:[%s6414_s2 + $0x184] sm:$0xf0]  ;;  %v3294_v13 = vld [vmem:[%s6414_s2 + $0x198] sm:$0xf0] }
 0x140   :  { %v1690_v22 = vadd.f32 %v1689_v16, %v1305_v20 }
 0x141   :  { %2823 = vst.msk [vmem:[%s6415_s3 + $0x128] sm:$0xff] %vm2786_vm2, %v2456_v18 }
 0x142   :  { %2824 = vst [vmem:[%s6415_s3 + $0x130] sm:$0xff] %v1690_v22  ;;  %3783 = vmatmul.msk.bf16.gmra.mxu3 %vm1016_vm1, %v3241_v21  ;;  %v3884_v22 = vld [vmem:[%s6414_s2 + $0x164] sm:$0xf] }
 0x145   :  { %v1692_v25 = vpop.f32.mrf.mxu1  ;;  %v2460_v29 = vpop.f32.mrf.mxu3 }
 0x146   :  { %v2073_v26 = vpop.f32.mrf.mxu2 }
 0x147   :  { %v2458_v28 = vadd.f32 %v2457_v19, %v2073_v26  ;;  %v1308_v30 = vpop.f32.mrf.mxu0 }
 0x148   :  { %v1693_v31 = vadd.f32 %v1692_v25, %v1308_v30  ;;  %3708 = vmatmul.msk.bf16.gmra.mxu1 %vm1016_vm1, %v3241_v21 }
 0x149   :  { %2825 = vst.msk [vmem:[%s6415_s3 + $0x138] sm:$0xff] %vm2786_vm2, %v2458_v28 }
 0x14a   :  { %2826 = vst [vmem:[%s6415_s3 + $0x140] sm:$0xff] %v1693_v31  ;;  %1347 = vmatmul.bf16.gmra.mxu0 %v3237_v27  ;;  %v3268_v31 = vld [vmem:[%s6414_s2 + $0x160] sm:$0xf] }
 0x14b   :  { %2115 = vmatmul.bf16.gmra.mxu2 %v3237_v27 }
 0x14d   :  { %v1694_v34 = vpop.f32.mrf.mxu1  ;;  %v2462_v37 = vpop.f32.mrf.mxu3 }
 0x14e   :  { %v2076_v35 = vpop.f32.mrf.mxu2 }
 0x14f   :  { %v2461_v36 = vadd.f32 %v2460_v29, %v2076_v35  ;;  %v1310_v38 = vpop.f32.mrf.mxu0  ;;  %v3273_v29 = vor.u32 %v3884_v22, %v3270_v23  ;;  %v3269_v35 = vor.u32 %v3885_v32, %v3268_v31  ;;  %v3891_v22 = vld [vmem:[%s6414_s2 + $0x194] sm:$0xf0]  ;;  %v3302_v31 = vld [vmem:[%s6414_s2 + $0x1a8] sm:$0xf0] }
 0x150   :  { %v1695_v40 = vadd.f32 %v1694_v34, %v1310_v38 }
 0x151   :  { %2827 = vst.msk [vmem:[%s6415_s3 + $0x148] sm:$0xff] %vm2786_vm2, %v2461_v36 }
 0x152   :  { %2828 = vst [vmem:[%s6415_s3 + $0x150] sm:$0xff] %v1695_v40  ;;  %3784 = vmatmul.msk.bf16.gmra.mxu3 %vm1016_vm1, %v3249_v39  ;;  %v3886_v40 = vld [vmem:[%s6414_s2 + $0x174] sm:$0xf] }
 0x155   :  { %v1697_v43 = vpop.f32.mrf.mxu1  ;;  %v2465_v47 = vpop.f32.mrf.mxu3 }
 0x156   :  { %v2078_v44 = vpop.f32.mrf.mxu2 }
 0x157   :  { %v2463_v46 = vadd.f32 %v2462_v37, %v2078_v44  ;;  %v1313_v48 = vpop.f32.mrf.mxu0 }
 0x158   :  { %v1698_v49 = vadd.f32 %v1697_v43, %v1313_v48  ;;  %3709 = vmatmul.msk.bf16.gmra.mxu1 %vm1016_vm1, %v3249_v39 }
 0x159   :  { %2829 = vst.msk [vmem:[%s6415_s3 + $0x158] sm:$0xff] %vm2786_vm2, %v2463_v46 }
 0x15a   :  { %2830 = vst [vmem:[%s6415_s3 + $0x160] sm:$0xff] %v1698_v49  ;;  %1352 = vmatmul.bf16.gmra.mxu0 %v3245_v45  ;;  %v3276_v49 = vld [vmem:[%s6414_s2 + $0x170] sm:$0xf] }
 0x15b   :  { %2120 = vmatmul.bf16.gmra.mxu2 %v3245_v45 }
 0x15d   :  { %v1699_v52 = vpop.f32.mrf.mxu1  ;;  %v2467_v55 = vpop.f32.mrf.mxu3 }
 0x15e   :  { %v2081_v53 = vpop.f32.mrf.mxu2 }
 0x15f   :  { %v2466_v54 = vadd.f32 %v2465_v47, %v2081_v53  ;;  %v1315_v56 = vpop.f32.mrf.mxu0  ;;  %v3281_v47 = vor.u32 %v3886_v40, %v3278_v41  ;;  %v3277_v53 = vor.u32 %v3887_v50, %v3276_v49  ;;  %v3893_v40 = vld [vmem:[%s6414_s2 + $0x1a4] sm:$0xf0]  ;;  %v3310_v49 = vld [vmem:[%s6414_s2 + $0x1b8] sm:$0xf0] }
 0x160   :  { %v1700_v58 = vadd.f32 %v1699_v52, %v1315_v56 }
 0x161   :  { %2831 = vst.msk [vmem:[%s6415_s3 + $0x168] sm:$0xff] %vm2786_vm2, %v2466_v54 }
 0x162   :  { %2832 = vst [vmem:[%s6415_s3 + $0x170] sm:$0xff] %v1700_v58  ;;  %3785 = vmatmul.msk.bf16.gmra.mxu3 %vm1016_vm1, %v3257_v57  ;;  %v3888_v58 = vld [vmem:[%s6414_s2 + $0x184] sm:$0xf] }
 0x165   :  { %v1702_v61 = vpop.f32.mrf.mxu1  ;;  %v2470_v1 = vpop.f32.mrf.mxu3 }
 0x166   :  { %v2083_v62 = vpop.f32.mrf.mxu2 }
 0x167   :  { %v2468_v0 = vadd.f32 %v2467_v55, %v2083_v62  ;;  %v1318_v2 = vpop.f32.mrf.mxu0 }
 0x168   :  { %v1703_v3 = vadd.f32 %v1702_v61, %v1318_v2  ;;  %3710 = vmatmul.msk.bf16.gmra.mxu1 %vm1016_vm1, %v3257_v57 }
 0x169   :  { %2833 = vst.msk [vmem:[%s6415_s3 + $0x178] sm:$0xff] %vm2786_vm2, %v2468_v0 }
 0x16a   :  { %2834 = vst [vmem:[%s6415_s3 + $0x180] sm:$0xff] %v1703_v3  ;;  %1357 = vmatmul.bf16.gmra.mxu0 %v3253_v63  ;;  %v3284_v3 = vld [vmem:[%s6414_s2 + $0x180] sm:$0xf] }
 0x16b   :  { %2125 = vmatmul.bf16.gmra.mxu2 %v3253_v63 }
 0x16d   :  { %v1704_v6 = vpop.f32.mrf.mxu1  ;;  %v2472_v9 = vpop.f32.mrf.mxu3 }
 0x16e   :  { %v2086_v7 = vpop.f32.mrf.mxu2 }
 0x16f   :  { %v2471_v8 = vadd.f32 %v2470_v1, %v2086_v7  ;;  %v1320_v10 = vpop.f32.mrf.mxu0  ;;  %v3289_v1 = vor.u32 %v3888_v58, %v3286_v59  ;;  %v3285_v7 = vor.u32 %v3889_v4, %v3284_v3  ;;  %v3895_v58 = vld [vmem:[%s6414_s2 + $0x1b4] sm:$0xf0]  ;;  %v3318_v3 = vld [vmem:[%s6414_s2 + $0x1c8] sm:$0xf0] }
 0x170   :  { %v1705_v12 = vadd.f32 %v1704_v6, %v1320_v10 }
 0x171   :  { %2835 = vst.msk [vmem:[%s6415_s3 + $0x188] sm:$0xff] %vm2786_vm2, %v2471_v8 }
 0x172   :  { %2836 = vst [vmem:[%s6415_s3 + $0x190] sm:$0xff] %v1705_v12  ;;  %3786 = vmatmul.msk.bf16.gmra.mxu3 %vm1016_vm1, %v3265_v11  ;;  %v3890_v12 = vld [vmem:[%s6414_s2 + $0x194] sm:$0xf] }
 0x175   :  { %v1707_v15 = vpop.f32.mrf.mxu1  ;;  %v2475_v19 = vpop.f32.mrf.mxu3 }
 0x176   :  { %v2088_v16 = vpop.f32.mrf.mxu2 }
 0x177   :  { %v2473_v18 = vadd.f32 %v2472_v9, %v2088_v16  ;;  %v1323_v20 = vpop.f32.mrf.mxu0 }
 0x178   :  { %v1708_v21 = vadd.f32 %v1707_v15, %v1323_v20  ;;  %3711 = vmatmul.msk.bf16.gmra.mxu1 %vm1016_vm1, %v3265_v11 }
 0x179   :  { %2837 = vst.msk [vmem:[%s6415_s3 + $0x198] sm:$0xff] %vm2786_vm2, %v2473_v18 }
 0x17a   :  { %2838 = vst [vmem:[%s6415_s3 + $0x1a0] sm:$0xff] %v1708_v21  ;;  %1362 = vmatmul.bf16.gmra.mxu0 %v3261_v17  ;;  %v3292_v21 = vld [vmem:[%s6414_s2 + $0x190] sm:$0xf] }
 0x17b   :  { %2130 = vmatmul.bf16.gmra.mxu2 %v3261_v17 }
 0x17d   :  { %v1709_v24 = vpop.f32.mrf.mxu1  ;;  %v2477_v27 = vpop.f32.mrf.mxu3 }
 0x17e   :  { %v2091_v25 = vpop.f32.mrf.mxu2 }
 0x17f   :  { %v2476_v26 = vadd.f32 %v2475_v19, %v2091_v25  ;;  %v1325_v28 = vpop.f32.mrf.mxu0  ;;  %v3297_v19 = vor.u32 %v3890_v12, %v3294_v13  ;;  %v3293_v25 = vor.u32 %v3891_v22, %v3292_v21  ;;  %v3897_v12 = vld [vmem:[%s6414_s2 + $0x1c4] sm:$0xf0]  ;;  %v3326_v21 = vld [vmem:[%s6414_s2 + $0x1d8] sm:$0xf0] }
 0x180   :  { %v1710_v30 = vadd.f32 %v1709_v24, %v1325_v28 }
 0x181   :  { %2839 = vst.msk [vmem:[%s6415_s3 + $0x1a8] sm:$0xff] %vm2786_vm2, %v2476_v26 }
 0x182   :  { %2840 = vst [vmem:[%s6415_s3 + $0x1b0] sm:$0xff] %v1710_v30  ;;  %3787 = vmatmul.msk.bf16.gmra.mxu3 %vm1016_vm1, %v3273_v29  ;;  %v3892_v30 = vld [vmem:[%s6414_s2 + $0x1a4] sm:$0xf] }
 0x185   :  { %v1712_v33 = vpop.f32.mrf.mxu1  ;;  %v2480_v37 = vpop.f32.mrf.mxu3 }
 0x186   :  { %v2093_v34 = vpop.f32.mrf.mxu2 }
 0x187   :  { %v2478_v36 = vadd.f32 %v2477_v27, %v2093_v34  ;;  %v1328_v38 = vpop.f32.mrf.mxu0 }
 0x188   :  { %v1713_v39 = vadd.f32 %v1712_v33, %v1328_v38  ;;  %3712 = vmatmul.msk.bf16.gmra.mxu1 %vm1016_vm1, %v3273_v29 }
 0x189   :  { %2841 = vst.msk [vmem:[%s6415_s3 + $0x1b8] sm:$0xff] %vm2786_vm2, %v2478_v36 }
 0x18a   :  { %2842 = vst [vmem:[%s6415_s3 + $0x1c0] sm:$0xff] %v1713_v39  ;;  %1367 = vmatmul.bf16.gmra.mxu0 %v3269_v35  ;;  %v3300_v39 = vld [vmem:[%s6414_s2 + $0x1a0] sm:$0xf] }
 0x18b   :  { %2135 = vmatmul.bf16.gmra.mxu2 %v3269_v35 }
 0x18d   :  { %v1714_v42 = vpop.f32.mrf.mxu1  ;;  %v2482_v45 = vpop.f32.mrf.mxu3 }
 0x18e   :  { %v2096_v43 = vpop.f32.mrf.mxu2 }
 0x18f   :  { %v2481_v44 = vadd.f32 %v2480_v37, %v2096_v43  ;;  %v1330_v46 = vpop.f32.mrf.mxu0  ;;  %v3305_v37 = vor.u32 %v3892_v30, %v3302_v31  ;;  %v3301_v43 = vor.u32 %v3893_v40, %v3300_v39  ;;  %v3899_v30 = vld [vmem:[%s6414_s2 + $0x1d4] sm:$0xf0]  ;;  %v3334_v39 = vld [vmem:[%s6414_s2 + $0x1e8] sm:$0xf0] }
 0x190   :  { %v1715_v48 = vadd.f32 %v1714_v42, %v1330_v46 }
 0x191   :  { %2843 = vst.msk [vmem:[%s6415_s3 + $0x1c8] sm:$0xff] %vm2786_vm2, %v2481_v44 }
 0x192   :  { %2844 = vst [vmem:[%s6415_s3 + $0x1d0] sm:$0xff] %v1715_v48  ;;  %3788 = vmatmul.msk.bf16.gmra.mxu3 %vm1016_vm1, %v3281_v47  ;;  %v3894_v48 = vld [vmem:[%s6414_s2 + $0x1b4] sm:$0xf] }
 0x195   :  { %v1717_v51 = vpop.f32.mrf.mxu1  ;;  %v2485_v55 = vpop.f32.mrf.mxu3 }
 0x196   :  { %v2098_v52 = vpop.f32.mrf.mxu2 }
 0x197   :  { %v2483_v54 = vadd.f32 %v2482_v45, %v2098_v52  ;;  %v1333_v56 = vpop.f32.mrf.mxu0 }
 0x198   :  { %v1718_v57 = vadd.f32 %v1717_v51, %v1333_v56  ;;  %3713 = vmatmul.msk.bf16.gmra.mxu1 %vm1016_vm1, %v3281_v47 }
 0x199   :  { %2845 = vst.msk [vmem:[%s6415_s3 + $0x1d8] sm:$0xff] %vm2786_vm2, %v2483_v54 }
 0x19a   :  { %2846 = vst [vmem:[%s6415_s3 + $0x1e0] sm:$0xff] %v1718_v57  ;;  %1372 = vmatmul.bf16.gmra.mxu0 %v3277_v53  ;;  %v3308_v57 = vld [vmem:[%s6414_s2 + $0x1b0] sm:$0xf] }
 0x19b   :  { %2140 = vmatmul.bf16.gmra.mxu2 %v3277_v53 }
 0x19d   :  { %v1719_v60 = vpop.f32.mrf.mxu1  ;;  %v2487_v63 = vpop.f32.mrf.mxu3 }
 0x19e   :  { %v2101_v61 = vpop.f32.mrf.mxu2 }
 0x19f   :  { %v2486_v62 = vadd.f32 %v2485_v55, %v2101_v61  ;;  %v1335_v0 = vpop.f32.mrf.mxu0  ;;  %v3313_v55 = vor.u32 %v3894_v48, %v3310_v49  ;;  %v3309_v61 = vor.u32 %v3895_v58, %v3308_v57  ;;  %v3901_v48 = vld [vmem:[%s6414_s2 + $0x1e4] sm:$0xf0]  ;;  %v3342_v57 = vld [vmem:[%s6414_s2 + $0x1f8] sm:$0xf0] }
 0x1a0   :  { %v1720_v2 = vadd.f32 %v1719_v60, %v1335_v0 }
 0x1a1   :  { %2847 = vst.msk [vmem:[%s6415_s3 + $0x1e8] sm:$0xff] %vm2786_vm2, %v2486_v62 }
 0x1a2   :  { %2848 = vst [vmem:[%s6415_s3 + $0x1f0] sm:$0xff] %v1720_v2  ;;  %3789 = vmatmul.msk.bf16.gmra.mxu3 %vm1016_vm1, %v3289_v1  ;;  %v3896_v2 = vld [vmem:[%s6414_s2 + $0x1c4] sm:$0xf] }
 0x1a5   :  { %v1722_v5 = vpop.f32.mrf.mxu1  ;;  %v2490_v9 = vpop.f32.mrf.mxu3 }
 0x1a6   :  { %v2103_v6 = vpop.f32.mrf.mxu2 }
 0x1a7   :  { %v2488_v8 = vadd.f32 %v2487_v63, %v2103_v6  ;;  %v1338_v10 = vpop.f32.mrf.mxu0 }
 0x1a8   :  { %v1723_v11 = vadd.f32 %v1722_v5, %v1338_v10  ;;  %3714 = vmatmul.msk.bf16.gmra.mxu1 %vm1016_vm1, %v3289_v1 }
 0x1a9   :  { %2849 = vst.msk [vmem:[%s6415_s3 + $0x1f8] sm:$0xff] %vm2786_vm2, %v2488_v8 }
 0x1aa   :  { %2850 = vst [vmem:[%s6415_s3 + $0x200] sm:$0xff] %v1723_v11  ;;  %1377 = vmatmul.bf16.gmra.mxu0 %v3285_v7  ;;  %v3316_v11 = vld [vmem:[%s6414_s2 + $0x1c0] sm:$0xf] }
 0x1ab   :  { %2145 = vmatmul.bf16.gmra.mxu2 %v3285_v7 }
 0x1ad   :  { %v1724_v14 = vpop.f32.mrf.mxu1  ;;  %v2492_v17 = vpop.f32.mrf.mxu3 }
 0x1ae   :  { %v2106_v15 = vpop.f32.mrf.mxu2 }
 0x1af   :  { %v2491_v16 = vadd.f32 %v2490_v9, %v2106_v15  ;;  %v1340_v18 = vpop.f32.mrf.mxu0  ;;  %v3321_v9 = vor.u32 %v3896_v2, %v3318_v3  ;;  %v3317_v15 = vor.u32 %v3897_v12, %v3316_v11  ;;  %v3903_v2 = vld [vmem:[%s6414_s2 + $0x1f4] sm:$0xf0]  ;;  %v3350_v11 = vld [vmem:[%s6414_s2 + $0x208] sm:$0xf0] }
 0x1b0   :  { %v1725_v20 = vadd.f32 %v1724_v14, %v1340_v18 }
 0x1b1   :  { %2851 = vst.msk [vmem:[%s6415_s3 + $0x208] sm:$0xff] %vm2786_vm2, %v2491_v16 }
 0x1b2   :  { %2852 = vst [vmem:[%s6415_s3 + $0x210] sm:$0xff] %v1725_v20  ;;  %3790 = vmatmul.msk.bf16.gmra.mxu3 %vm1016_vm1, %v3297_v19  ;;  %v3898_v20 = vld [vmem:[%s6414_s2 + $0x1d4] sm:$0xf] }
 0x1b5   :  { %v1727_v23 = vpop.f32.mrf.mxu1  ;;  %v2495_v27 = vpop.f32.mrf.mxu3 }
 0x1b6   :  { %v2108_v24 = vpop.f32.mrf.mxu2 }
 0x1b7   :  { %v2493_v26 = vadd.f32 %v2492_v17, %v2108_v24  ;;  %v1343_v28 = vpop.f32.mrf.mxu0 }
 0x1b8   :  { %v1728_v29 = vadd.f32 %v1727_v23, %v1343_v28  ;;  %3715 = vmatmul.msk.bf16.gmra.mxu1 %vm1016_vm1, %v3297_v19 }
 0x1b9   :  { %2853 = vst.msk [vmem:[%s6415_s3 + $0x218] sm:$0xff] %vm2786_vm2, %v2493_v26 }
 0x1ba   :  { %2854 = vst [vmem:[%s6415_s3 + $0x220] sm:$0xff] %v1728_v29  ;;  %1382 = vmatmul.bf16.gmra.mxu0 %v3293_v25  ;;  %v3324_v29 = vld [vmem:[%s6414_s2 + $0x1d0] sm:$0xf] }
 0x1bb   :  { %2150 = vmatmul.bf16.gmra.mxu2 %v3293_v25 }
 0x1bd   :  { %v1729_v32 = vpop.f32.mrf.mxu1  ;;  %v2497_v35 = vpop.f32.mrf.mxu3 }
 0x1be   :  { %v2111_v33 = vpop.f32.mrf.mxu2 }
 0x1bf   :  { %v2496_v34 = vadd.f32 %v2495_v27, %v2111_v33  ;;  %v1345_v36 = vpop.f32.mrf.mxu0  ;;  %v3329_v27 = vor.u32 %v3898_v20, %v3326_v21  ;;  %v3325_v33 = vor.u32 %v3899_v30, %v3324_v29  ;;  %v3905_v20 = vld [vmem:[%s6414_s2 + $0x204] sm:$0xf0]  ;;  %v3358_v29 = vld [vmem:[%s6414_s2 + $0x218] sm:$0xf0] }
 0x1c0   :  { %v1730_v38 = vadd.f32 %v1729_v32, %v1345_v36 }
 0x1c1   :  { %2855 = vst.msk [vmem:[%s6415_s3 + $0x228] sm:$0xff] %vm2786_vm2, %v2496_v34 }
 0x1c2   :  { %2856 = vst [vmem:[%s6415_s3 + $0x230] sm:$0xff] %v1730_v38  ;;  %3791 = vmatmul.msk.bf16.gmra.mxu3 %vm1016_vm1, %v3305_v37  ;;  %v3900_v38 = vld [vmem:[%s6414_s2 + $0x1e4] sm:$0xf] }
 0x1c5   :  { %v1732_v41 = vpop.f32.mrf.mxu1  ;;  %v2500_v45 = vpop.f32.mrf.mxu3 }
 0x1c6   :  { %v2113_v42 = vpop.f32.mrf.mxu2 }
 0x1c7   :  { %v2498_v44 = vadd.f32 %v2497_v35, %v2113_v42  ;;  %v1348_v46 = vpop.f32.mrf.mxu0 }
 0x1c8   :  { %v1733_v47 = vadd.f32 %v1732_v41, %v1348_v46  ;;  %3716 = vmatmul.msk.bf16.gmra.mxu1 %vm1016_vm1, %v3305_v37 }
 0x1c9   :  { %2857 = vst.msk [vmem:[%s6415_s3 + $0x238] sm:$0xff] %vm2786_vm2, %v2498_v44 }
 0x1ca   :  { %2858 = vst [vmem:[%s6415_s3 + $0x240] sm:$0xff] %v1733_v47  ;;  %1387 = vmatmul.bf16.gmra.mxu0 %v3301_v43  ;;  %v3332_v47 = vld [vmem:[%s6414_s2 + $0x1e0] sm:$0xf] }
 0x1cb   :  { %2155 = vmatmul.bf16.gmra.mxu2 %v3301_v43 }
 0x1cd   :  { %v1734_v50 = vpop.f32.mrf.mxu1  ;;  %v2502_v53 = vpop.f32.mrf.mxu3 }
 0x1ce   :  { %v2116_v51 = vpop.f32.mrf.mxu2 }
 0x1cf   :  { %v2501_v52 = vadd.f32 %v2500_v45, %v2116_v51  ;;  %v1350_v54 = vpop.f32.mrf.mxu0  ;;  %v3337_v45 = vor.u32 %v3900_v38, %v3334_v39  ;;  %v3333_v51 = vor.u32 %v3901_v48, %v3332_v47  ;;  %v3907_v38 = vld [vmem:[%s6414_s2 + $0x214] sm:$0xf0]  ;;  %v3366_v47 = vld [vmem:[%s6414_s2 + $0x228] sm:$0xf0] }
 0x1d0   :  { %v1735_v56 = vadd.f32 %v1734_v50, %v1350_v54 }
 0x1d1   :  { %2859 = vst.msk [vmem:[%s6415_s3 + $0x248] sm:$0xff] %vm2786_vm2, %v2501_v52 }
 0x1d2   :  { %2860 = vst [vmem:[%s6415_s3 + $0x250] sm:$0xff] %v1735_v56  ;;  %3792 = vmatmul.msk.bf16.gmra.mxu3 %vm1016_vm1, %v3313_v55  ;;  %v3902_v56 = vld [vmem:[%s6414_s2 + $0x1f4] sm:$0xf] }
 0x1d5   :  { %v1737_v59 = vpop.f32.mrf.mxu1  ;;  %v2505_v63 = vpop.f32.mrf.mxu3 }
 0x1d6   :  { %v2118_v60 = vpop.f32.mrf.mxu2 }
 0x1d7   :  { %v2503_v62 = vadd.f32 %v2502_v53, %v2118_v60  ;;  %v1353_v0 = vpop.f32.mrf.mxu0 }
 0x1d8   :  { %v1738_v1 = vadd.f32 %v1737_v59, %v1353_v0  ;;  %3717 = vmatmul.msk.bf16.gmra.mxu1 %vm1016_vm1, %v3313_v55 }
 0x1d9   :  { %2861 = vst.msk [vmem:[%s6415_s3 + $0x258] sm:$0xff] %vm2786_vm2, %v2503_v62 }
 0x1da   :  { %2862 = vst [vmem:[%s6415_s3 + $0x260] sm:$0xff] %v1738_v1  ;;  %1392 = vmatmul.bf16.gmra.mxu0 %v3309_v61  ;;  %v3340_v1 = vld [vmem:[%s6414_s2 + $0x1f0] sm:$0xf] }
 0x1db   :  { %2160 = vmatmul.bf16.gmra.mxu2 %v3309_v61 }
 0x1dd   :  { %v1739_v4 = vpop.f32.mrf.mxu1  ;;  %v2507_v7 = vpop.f32.mrf.mxu3 }
 0x1de   :  { %v2121_v5 = vpop.f32.mrf.mxu2 }
 0x1df   :  { %v2506_v6 = vadd.f32 %v2505_v63, %v2121_v5  ;;  %v1355_v8 = vpop.f32.mrf.mxu0  ;;  %v3345_v63 = vor.u32 %v3902_v56, %v3342_v57  ;;  %v3341_v5 = vor.u32 %v3903_v2, %v3340_v1  ;;  %v3909_v56 = vld [vmem:[%s6414_s2 + $0x224] sm:$0xf0]  ;;  %v3374_v1 = vld [vmem:[%s6414_s2 + $0x238] sm:$0xf0] }
 0x1e0   :  { %v1740_v10 = vadd.f32 %v1739_v4, %v1355_v8 }
 0x1e1   :  { %2863 = vst.msk [vmem:[%s6415_s3 + $0x268] sm:$0xff] %vm2786_vm2, %v2506_v6 }
 0x1e2   :  { %2864 = vst [vmem:[%s6415_s3 + $0x270] sm:$0xff] %v1740_v10  ;;  %3793 = vmatmul.msk.bf16.gmra.mxu3 %vm1016_vm1, %v3321_v9  ;;  %v3904_v10 = vld [vmem:[%s6414_s2 + $0x204] sm:$0xf] }
 0x1e5   :  { %v1742_v13 = vpop.f32.mrf.mxu1  ;;  %v2510_v17 = vpop.f32.mrf.mxu3 }
 0x1e6   :  { %v2123_v14 = vpop.f32.mrf.mxu2 }
 0x1e7   :  { %v2508_v16 = vadd.f32 %v2507_v7, %v2123_v14  ;;  %v1358_v18 = vpop.f32.mrf.mxu0 }
 0x1e8   :  { %v1743_v19 = vadd.f32 %v1742_v13, %v1358_v18  ;;  %3718 = vmatmul.msk.bf16.gmra.mxu1 %vm1016_vm1, %v3321_v9 }
 0x1e9   :  { %2865 = vst.msk [vmem:[%s6415_s3 + $0x278] sm:$0xff] %vm2786_vm2, %v2508_v16 }
 0x1ea   :  { %2866 = vst [vmem:[%s6415_s3 + $0x280] sm:$0xff] %v1743_v19  ;;  %1397 = vmatmul.bf16.gmra.mxu0 %v3317_v15  ;;  %v3348_v19 = vld [vmem:[%s6414_s2 + $0x200] sm:$0xf] }
 0x1eb   :  { %2165 = vmatmul.bf16.gmra.mxu2 %v3317_v15 }
 0x1ed   :  { %v1744_v22 = vpop.f32.mrf.mxu1  ;;  %v2512_v25 = vpop.f32.mrf.mxu3 }
 0x1ee   :  { %v2126_v23 = vpop.f32.mrf.mxu2 }
 0x1ef   :  { %v2511_v24 = vadd.f32 %v2510_v17, %v2126_v23  ;;  %v1360_v26 = vpop.f32.mrf.mxu0  ;;  %v3353_v17 = vor.u32 %v3904_v10, %v3350_v11  ;;  %v3349_v23 = vor.u32 %v3905_v20, %v3348_v19  ;;  %v3911_v10 = vld [vmem:[%s6414_s2 + $0x234] sm:$0xf0]  ;;  %v3382_v19 = vld [vmem:[%s6414_s2 + $0x248] sm:$0xf0] }
 0x1f0   :  { %v1745_v28 = vadd.f32 %v1744_v22, %v1360_v26 }
 0x1f1   :  { %2867 = vst.msk [vmem:[%s6415_s3 + $0x288] sm:$0xff] %vm2786_vm2, %v2511_v24 }
 0x1f2   :  { %2868 = vst [vmem:[%s6415_s3 + $0x290] sm:$0xff] %v1745_v28  ;;  %3794 = vmatmul.msk.bf16.gmra.mxu3 %vm1016_vm1, %v3329_v27  ;;  %v3906_v28 = vld [vmem:[%s6414_s2 + $0x214] sm:$0xf] }
 0x1f5   :  { %v1747_v31 = vpop.f32.mrf.mxu1  ;;  %v2515_v35 = vpop.f32.mrf.mxu3 }
 0x1f6   :  { %v2128_v32 = vpop.f32.mrf.mxu2 }
 0x1f7   :  { %v2513_v34 = vadd.f32 %v2512_v25, %v2128_v32  ;;  %v1363_v36 = vpop.f32.mrf.mxu0 }
 0x1f8   :  { %v1748_v37 = vadd.f32 %v1747_v31, %v1363_v36  ;;  %3719 = vmatmul.msk.bf16.gmra.mxu1 %vm1016_vm1, %v3329_v27 }
 0x1f9   :  { %2869 = vst.msk [vmem:[%s6415_s3 + $0x298] sm:$0xff] %vm2786_vm2, %v2513_v34 }
 0x1fa   :  { %2870 = vst [vmem:[%s6415_s3 + $0x2a0] sm:$0xff] %v1748_v37  ;;  %1402 = vmatmul.bf16.gmra.mxu0 %v3325_v33  ;;  %v3356_v37 = vld [vmem:[%s6414_s2 + $0x210] sm:$0xf] }
 0x1fb   :  { %2170 = vmatmul.bf16.gmra.mxu2 %v3325_v33 }
 0x1fd   :  { %v1749_v40 = vpop.f32.mrf.mxu1  ;;  %v2517_v43 = vpop.f32.mrf.mxu3 }
 0x1fe   :  { %v2131_v41 = vpop.f32.mrf.mxu2 }
 0x1ff   :  { %v2516_v42 = vadd.f32 %v2515_v35, %v2131_v41  ;;  %v1365_v44 = vpop.f32.mrf.mxu0  ;;  %v3361_v35 = vor.u32 %v3906_v28, %v3358_v29  ;;  %v3357_v41 = vor.u32 %v3907_v38, %v3356_v37  ;;  %v3913_v28 = vld [vmem:[%s6414_s2 + $0x244] sm:$0xf0]  ;;  %v3390_v37 = vld [vmem:[%s6414_s2 + $0x258] sm:$0xf0] }
 0x200   :  { %v1750_v46 = vadd.f32 %v1749_v40, %v1365_v44 }
 0x201   :  { %2871 = vst.msk [vmem:[%s6415_s3 + $0x2a8] sm:$0xff] %vm2786_vm2, %v2516_v42 }
 0x202   :  { %2872 = vst [vmem:[%s6415_s3 + $0x2b0] sm:$0xff] %v1750_v46  ;;  %3795 = vmatmul.msk.bf16.gmra.mxu3 %vm1016_vm1, %v3337_v45  ;;  %v3908_v46 = vld [vmem:[%s6414_s2 + $0x224] sm:$0xf] }
 0x205   :  { %v1752_v49 = vpop.f32.mrf.mxu1  ;;  %v2520_v53 = vpop.f32.mrf.mxu3 }
 0x206   :  { %v2133_v50 = vpop.f32.mrf.mxu2 }
 0x207   :  { %v2518_v52 = vadd.f32 %v2517_v43, %v2133_v50  ;;  %v1368_v54 = vpop.f32.mrf.mxu0 }
 0x208   :  { %v1753_v55 = vadd.f32 %v1752_v49, %v1368_v54  ;;  %3720 = vmatmul.msk.bf16.gmra.mxu1 %vm1016_vm1, %v3337_v45 }
 0x209   :  { %2873 = vst.msk [vmem:[%s6415_s3 + $0x2b8] sm:$0xff] %vm2786_vm2, %v2518_v52 }
 0x20a   :  { %2874 = vst [vmem:[%s6415_s3 + $0x2c0] sm:$0xff] %v1753_v55  ;;  %1407 = vmatmul.bf16.gmra.mxu0 %v3333_v51  ;;  %v3364_v55 = vld [vmem:[%s6414_s2 + $0x220] sm:$0xf] }
 0x20b   :  { %2175 = vmatmul.bf16.gmra.mxu2 %v3333_v51 }
 0x20d   :  { %v1754_v58 = vpop.f32.mrf.mxu1  ;;  %v2522_v61 = vpop.f32.mrf.mxu3 }
 0x20e   :  { %v2136_v59 = vpop.f32.mrf.mxu2 }
 0x20f   :  { %v2521_v60 = vadd.f32 %v2520_v53, %v2136_v59  ;;  %v1370_v62 = vpop.f32.mrf.mxu0  ;;  %v3369_v53 = vor.u32 %v3908_v46, %v3366_v47  ;;  %v3365_v59 = vor.u32 %v3909_v56, %v3364_v55  ;;  %v3915_v46 = vld [vmem:[%s6414_s2 + $0x254] sm:$0xf0]  ;;  %v3398_v55 = vld [vmem:[%s6414_s2 + $0x268] sm:$0xf0] }
 0x210   :  { %v1755_v0 = vadd.f32 %v1754_v58, %v1370_v62 }
 0x211   :  { %2875 = vst.msk [vmem:[%s6415_s3 + $0x2c8] sm:$0xff] %vm2786_vm2, %v2521_v60 }
 0x212   :  { %2876 = vst [vmem:[%s6415_s3 + $0x2d0] sm:$0xff] %v1755_v0  ;;  %3796 = vmatmul.msk.bf16.gmra.mxu3 %vm1016_vm1, %v3345_v63  ;;  %v3910_v0 = vld [vmem:[%s6414_s2 + $0x234] sm:$0xf] }
 0x215   :  { %v1757_v3 = vpop.f32.mrf.mxu1  ;;  %v2525_v7 = vpop.f32.mrf.mxu3 }
 0x216   :  { %v2138_v4 = vpop.f32.mrf.mxu2 }
 0x217   :  { %v2523_v6 = vadd.f32 %v2522_v61, %v2138_v4  ;;  %v1373_v8 = vpop.f32.mrf.mxu0 }
 0x218   :  { %v1758_v9 = vadd.f32 %v1757_v3, %v1373_v8  ;;  %3721 = vmatmul.msk.bf16.gmra.mxu1 %vm1016_vm1, %v3345_v63 }
 0x219   :  { %2877 = vst.msk [vmem:[%s6415_s3 + $0x2d8] sm:$0xff] %vm2786_vm2, %v2523_v6 }
 0x21a   :  { %2878 = vst [vmem:[%s6415_s3 + $0x2e0] sm:$0xff] %v1758_v9  ;;  %1412 = vmatmul.bf16.gmra.mxu0 %v3341_v5  ;;  %v3372_v9 = vld [vmem:[%s6414_s2 + $0x230] sm:$0xf] }
 0x21b   :  { %2180 = vmatmul.bf16.gmra.mxu2 %v3341_v5 }
 0x21d   :  { %v1759_v12 = vpop.f32.mrf.mxu1  ;;  %v2527_v15 = vpop.f32.mrf.mxu3 }
 0x21e   :  { %v2141_v13 = vpop.f32.mrf.mxu2 }
 0x21f   :  { %v2526_v14 = vadd.f32 %v2525_v7, %v2141_v13  ;;  %v1375_v16 = vpop.f32.mrf.mxu0  ;;  %v3377_v7 = vor.u32 %v3910_v0, %v3374_v1  ;;  %v3373_v13 = vor.u32 %v3911_v10, %v3372_v9  ;;  %v3917_v0 = vld [vmem:[%s6414_s2 + $0x264] sm:$0xf0]  ;;  %v3406_v9 = vld [vmem:[%s6414_s2 + $0x278] sm:$0xf0] }
 0x220   :  { %v1760_v18 = vadd.f32 %v1759_v12, %v1375_v16 }
 0x221   :  { %2879 = vst.msk [vmem:[%s6415_s3 + $0x2e8] sm:$0xff] %vm2786_vm2, %v2526_v14 }
 0x222   :  { %2880 = vst [vmem:[%s6415_s3 + $0x2f0] sm:$0xff] %v1760_v18  ;;  %3797 = vmatmul.msk.bf16.gmra.mxu3 %vm1016_vm1, %v3353_v17  ;;  %v3912_v18 = vld [vmem:[%s6414_s2 + $0x244] sm:$0xf] }
 0x225   :  { %v1762_v21 = vpop.f32.mrf.mxu1  ;;  %v2530_v25 = vpop.f32.mrf.mxu3 }
 0x226   :  { %v2143_v22 = vpop.f32.mrf.mxu2 }
 0x227   :  { %v2528_v24 = vadd.f32 %v2527_v15, %v2143_v22  ;;  %v1378_v26 = vpop.f32.mrf.mxu0 }
 0x228   :  { %v1763_v27 = vadd.f32 %v1762_v21, %v1378_v26  ;;  %3722 = vmatmul.msk.bf16.gmra.mxu1 %vm1016_vm1, %v3353_v17 }
 0x229   :  { %2881 = vst.msk [vmem:[%s6415_s3 + $0x2f8] sm:$0xff] %vm2786_vm2, %v2528_v24 }
 0x22a   :  { %2882 = vst [vmem:[%s6415_s3 + $0x300] sm:$0xff] %v1763_v27  ;;  %1417 = vmatmul.bf16.gmra.mxu0 %v3349_v23  ;;  %v3380_v27 = vld [vmem:[%s6414_s2 + $0x240] sm:$0xf] }
 0x22b   :  { %2185 = vmatmul.bf16.gmra.mxu2 %v3349_v23 }
 0x22d   :  { %v1764_v30 = vpop.f32.mrf.mxu1  ;;  %v2532_v33 = vpop.f32.mrf.mxu3 }
 0x22e   :  { %v2146_v31 = vpop.f32.mrf.mxu2 }
 0x22f   :  { %v2531_v32 = vadd.f32 %v2530_v25, %v2146_v31  ;;  %v1380_v34 = vpop.f32.mrf.mxu0  ;;  %v3385_v25 = vor.u32 %v3912_v18, %v3382_v19  ;;  %v3381_v31 = vor.u32 %v3913_v28, %v3380_v27  ;;  %v3919_v18 = vld [vmem:[%s6414_s2 + $0x274] sm:$0xf0]  ;;  %v3414_v27 = vld [vmem:[%s6414_s2 + $0x288] sm:$0xf0] }
 0x230   :  { %v1765_v36 = vadd.f32 %v1764_v30, %v1380_v34 }
 0x231   :  { %2883 = vst.msk [vmem:[%s6415_s3 + $0x308] sm:$0xff] %vm2786_vm2, %v2531_v32 }
 0x232   :  { %2884 = vst [vmem:[%s6415_s3 + $0x310] sm:$0xff] %v1765_v36  ;;  %3798 = vmatmul.msk.bf16.gmra.mxu3 %vm1016_vm1, %v3361_v35  ;;  %v3914_v36 = vld [vmem:[%s6414_s2 + $0x254] sm:$0xf] }
 0x235   :  { %v1767_v39 = vpop.f32.mrf.mxu1  ;;  %v2535_v43 = vpop.f32.mrf.mxu3 }
 0x236   :  { %v2148_v40 = vpop.f32.mrf.mxu2 }
 0x237   :  { %v2533_v42 = vadd.f32 %v2532_v33, %v2148_v40  ;;  %v1383_v44 = vpop.f32.mrf.mxu0 }
 0x238   :  { %v1768_v45 = vadd.f32 %v1767_v39, %v1383_v44  ;;  %3723 = vmatmul.msk.bf16.gmra.mxu1 %vm1016_vm1, %v3361_v35 }
 0x239   :  { %2885 = vst.msk [vmem:[%s6415_s3 + $0x318] sm:$0xff] %vm2786_vm2, %v2533_v42 }
 0x23a   :  { %2886 = vst [vmem:[%s6415_s3 + $0x320] sm:$0xff] %v1768_v45  ;;  %1422 = vmatmul.bf16.gmra.mxu0 %v3357_v41  ;;  %v3388_v45 = vld [vmem:[%s6414_s2 + $0x250] sm:$0xf] }
 0x23b   :  { %2190 = vmatmul.bf16.gmra.mxu2 %v3357_v41 }
 0x23d   :  { %v1769_v48 = vpop.f32.mrf.mxu1  ;;  %v2537_v51 = vpop.f32.mrf.mxu3 }
 0x23e   :  { %v2151_v49 = vpop.f32.mrf.mxu2 }
 0x23f   :  { %v2536_v50 = vadd.f32 %v2535_v43, %v2151_v49  ;;  %v1385_v52 = vpop.f32.mrf.mxu0  ;;  %v3393_v43 = vor.u32 %v3914_v36, %v3390_v37  ;;  %v3389_v49 = vor.u32 %v3915_v46, %v3388_v45  ;;  %v3921_v36 = vld [vmem:[%s6414_s2 + $0x284] sm:$0xf0]  ;;  %v3422_v45 = vld [vmem:[%s6414_s2 + $0x298] sm:$0xf0] }
 0x240   :  { %v1770_v54 = vadd.f32 %v1769_v48, %v1385_v52 }
 0x241   :  { %2887 = vst.msk [vmem:[%s6415_s3 + $0x328] sm:$0xff] %vm2786_vm2, %v2536_v50 }
 0x242   :  { %2888 = vst [vmem:[%s6415_s3 + $0x330] sm:$0xff] %v1770_v54  ;;  %3799 = vmatmul.msk.bf16.gmra.mxu3 %vm1016_vm1, %v3369_v53  ;;  %v3916_v54 = vld [vmem:[%s6414_s2 + $0x264] sm:$0xf] }
 0x245   :  { %v1772_v57 = vpop.f32.mrf.mxu1  ;;  %v2540_v61 = vpop.f32.mrf.mxu3 }
 0x246   :  { %v2153_v58 = vpop.f32.mrf.mxu2 }
 0x247   :  { %v2538_v60 = vadd.f32 %v2537_v51, %v2153_v58  ;;  %v1388_v62 = vpop.f32.mrf.mxu0 }
 0x248   :  { %v1773_v63 = vadd.f32 %v1772_v57, %v1388_v62  ;;  %3724 = vmatmul.msk.bf16.gmra.mxu1 %vm1016_vm1, %v3369_v53 }
 0x249   :  { %2889 = vst.msk [vmem:[%s6415_s3 + $0x338] sm:$0xff] %vm2786_vm2, %v2538_v60 }
 0x24a   :  { %2890 = vst [vmem:[%s6415_s3 + $0x340] sm:$0xff] %v1773_v63  ;;  %1427 = vmatmul.bf16.gmra.mxu0 %v3365_v59  ;;  %v3396_v63 = vld [vmem:[%s6414_s2 + $0x260] sm:$0xf] }
 0x24b   :  { %2195 = vmatmul.bf16.gmra.mxu2 %v3365_v59 }
 0x24d   :  { %v1774_v2 = vpop.f32.mrf.mxu1  ;;  %v2542_v5 = vpop.f32.mrf.mxu3 }
 0x24e   :  { %v2156_v3 = vpop.f32.mrf.mxu2 }
 0x24f   :  { %v2541_v4 = vadd.f32 %v2540_v61, %v2156_v3  ;;  %v1390_v6 = vpop.f32.mrf.mxu0  ;;  %v3401_v61 = vor.u32 %v3916_v54, %v3398_v55  ;;  %v3397_v3 = vor.u32 %v3917_v0, %v3396_v63  ;;  %v3923_v54 = vld [vmem:[%s6414_s2 + $0x294] sm:$0xf0]  ;;  %v3430_v63 = vld [vmem:[%s6414_s2 + $0x2a8] sm:$0xf0] }
 0x250   :  { %v1775_v8 = vadd.f32 %v1774_v2, %v1390_v6 }
 0x251   :  { %2891 = vst.msk [vmem:[%s6415_s3 + $0x348] sm:$0xff] %vm2786_vm2, %v2541_v4 }
 0x252   :  { %2892 = vst [vmem:[%s6415_s3 + $0x350] sm:$0xff] %v1775_v8  ;;  %3800 = vmatmul.msk.bf16.gmra.mxu3 %vm1016_vm1, %v3377_v7  ;;  %v3918_v8 = vld [vmem:[%s6414_s2 + $0x274] sm:$0xf] }
 0x255   :  { %v1777_v11 = vpop.f32.mrf.mxu1  ;;  %v2545_v15 = vpop.f32.mrf.mxu3 }
 0x256   :  { %v2158_v12 = vpop.f32.mrf.mxu2 }
 0x257   :  { %v2543_v14 = vadd.f32 %v2542_v5, %v2158_v12  ;;  %v1393_v16 = vpop.f32.mrf.mxu0 }
 0x258   :  { %v1778_v17 = vadd.f32 %v1777_v11, %v1393_v16  ;;  %3725 = vmatmul.msk.bf16.gmra.mxu1 %vm1016_vm1, %v3377_v7 }
 0x259   :  { %2893 = vst.msk [vmem:[%s6415_s3 + $0x358] sm:$0xff] %vm2786_vm2, %v2543_v14 }
 0x25a   :  { %2894 = vst [vmem:[%s6415_s3 + $0x360] sm:$0xff] %v1778_v17  ;;  %1432 = vmatmul.bf16.gmra.mxu0 %v3373_v13  ;;  %v3404_v17 = vld [vmem:[%s6414_s2 + $0x270] sm:$0xf] }
 0x25b   :  { %2200 = vmatmul.bf16.gmra.mxu2 %v3373_v13 }
 0x25d   :  { %v1779_v20 = vpop.f32.mrf.mxu1  ;;  %v2547_v23 = vpop.f32.mrf.mxu3 }
 0x25e   :  { %v2161_v21 = vpop.f32.mrf.mxu2 }
 0x25f   :  { %v2546_v22 = vadd.f32 %v2545_v15, %v2161_v21  ;;  %v1395_v24 = vpop.f32.mrf.mxu0  ;;  %v3409_v15 = vor.u32 %v3918_v8, %v3406_v9  ;;  %v3405_v21 = vor.u32 %v3919_v18, %v3404_v17  ;;  %v3925_v8 = vld [vmem:[%s6414_s2 + $0x2a4] sm:$0xf0]  ;;  %v3438_v17 = vld [vmem:[%s6414_s2 + $0x2b8] sm:$0xf0] }
 0x260   :  { %v1780_v26 = vadd.f32 %v1779_v20, %v1395_v24 }
 0x261   :  { %2895 = vst.msk [vmem:[%s6415_s3 + $0x368] sm:$0xff] %vm2786_vm2, %v2546_v22 }
 0x262   :  { %2896 = vst [vmem:[%s6415_s3 + $0x370] sm:$0xff] %v1780_v26  ;;  %3801 = vmatmul.msk.bf16.gmra.mxu3 %vm1016_vm1, %v3385_v25  ;;  %v3920_v26 = vld [vmem:[%s6414_s2 + $0x284] sm:$0xf] }
 0x265   :  { %v1782_v29 = vpop.f32.mrf.mxu1  ;;  %v2550_v33 = vpop.f32.mrf.mxu3 }
 0x266   :  { %v2163_v30 = vpop.f32.mrf.mxu2 }
 0x267   :  { %v2548_v32 = vadd.f32 %v2547_v23, %v2163_v30  ;;  %v1398_v34 = vpop.f32.mrf.mxu0 }
 0x268   :  { %v1783_v35 = vadd.f32 %v1782_v29, %v1398_v34  ;;  %3726 = vmatmul.msk.bf16.gmra.mxu1 %vm1016_vm1, %v3385_v25 }
 0x269   :  { %2897 = vst.msk [vmem:[%s6415_s3 + $0x378] sm:$0xff] %vm2786_vm2, %v2548_v32 }
 0x26a   :  { %2898 = vst [vmem:[%s6415_s3 + $0x380] sm:$0xff] %v1783_v35  ;;  %1437 = vmatmul.bf16.gmra.mxu0 %v3381_v31  ;;  %v3412_v35 = vld [vmem:[%s6414_s2 + $0x280] sm:$0xf] }
 0x26b   :  { %2205 = vmatmul.bf16.gmra.mxu2 %v3381_v31 }
 0x26d   :  { %v1784_v38 = vpop.f32.mrf.mxu1  ;;  %v2552_v41 = vpop.f32.mrf.mxu3 }
 0x26e   :  { %v2166_v39 = vpop.f32.mrf.mxu2 }
 0x26f   :  { %v2551_v40 = vadd.f32 %v2550_v33, %v2166_v39  ;;  %v1400_v42 = vpop.f32.mrf.mxu0  ;;  %v3417_v33 = vor.u32 %v3920_v26, %v3414_v27  ;;  %v3413_v39 = vor.u32 %v3921_v36, %v3412_v35  ;;  %v3927_v26 = vld [vmem:[%s6414_s2 + $0x2b4] sm:$0xf0]  ;;  %v3446_v35 = vld [vmem:[%s6414_s2 + $0x2c8] sm:$0xf0] }
 0x270   :  { %v1785_v44 = vadd.f32 %v1784_v38, %v1400_v42 }
 0x271   :  { %2899 = vst.msk [vmem:[%s6415_s3 + $0x388] sm:$0xff] %vm2786_vm2, %v2551_v40 }
 0x272   :  { %2900 = vst [vmem:[%s6415_s3 + $0x390] sm:$0xff] %v1785_v44  ;;  %3802 = vmatmul.msk.bf16.gmra.mxu3 %vm1016_vm1, %v3393_v43  ;;  %v3922_v44 = vld [vmem:[%s6414_s2 + $0x294] sm:$0xf] }
 0x275   :  { %v1787_v47 = vpop.f32.mrf.mxu1  ;;  %v2555_v51 = vpop.f32.mrf.mxu3 }
 0x276   :  { %v2168_v48 = vpop.f32.mrf.mxu2 }
 0x277   :  { %v2553_v50 = vadd.f32 %v2552_v41, %v2168_v48  ;;  %v1403_v52 = vpop.f32.mrf.mxu0 }
 0x278   :  { %v1788_v53 = vadd.f32 %v1787_v47, %v1403_v52  ;;  %3727 = vmatmul.msk.bf16.gmra.mxu1 %vm1016_vm1, %v3393_v43 }
 0x279   :  { %2901 = vst.msk [vmem:[%s6415_s3 + $0x398] sm:$0xff] %vm2786_vm2, %v2553_v50 }
 0x27a   :  { %2902 = vst [vmem:[%s6415_s3 + $0x3a0] sm:$0xff] %v1788_v53  ;;  %1442 = vmatmul.bf16.gmra.mxu0 %v3389_v49  ;;  %v3420_v53 = vld [vmem:[%s6414_s2 + $0x290] sm:$0xf] }
 0x27b   :  { %2210 = vmatmul.bf16.gmra.mxu2 %v3389_v49 }
 0x27d   :  { %v1789_v56 = vpop.f32.mrf.mxu1  ;;  %v2557_v59 = vpop.f32.mrf.mxu3 }
 0x27e   :  { %v2171_v57 = vpop.f32.mrf.mxu2 }
 0x27f   :  { %v2556_v58 = vadd.f32 %v2555_v51, %v2171_v57  ;;  %v1405_v60 = vpop.f32.mrf.mxu0  ;;  %v3425_v51 = vor.u32 %v3922_v44, %v3422_v45  ;;  %v3421_v57 = vor.u32 %v3923_v54, %v3420_v53  ;;  %v3929_v44 = vld [vmem:[%s6414_s2 + $0x2c4] sm:$0xf0]  ;;  %v3454_v53 = vld [vmem:[%s6414_s2 + $0x2d8] sm:$0xf0] }
 0x280   :  { %v1790_v62 = vadd.f32 %v1789_v56, %v1405_v60 }
 0x281   :  { %2903 = vst.msk [vmem:[%s6415_s3 + $0x3a8] sm:$0xff] %vm2786_vm2, %v2556_v58 }
 0x282   :  { %2904 = vst [vmem:[%s6415_s3 + $0x3b0] sm:$0xff] %v1790_v62  ;;  %3803 = vmatmul.msk.bf16.gmra.mxu3 %vm1016_vm1, %v3401_v61  ;;  %v3924_v62 = vld [vmem:[%s6414_s2 + $0x2a4] sm:$0xf] }
 0x285   :  { %v1792_v1 = vpop.f32.mrf.mxu1  ;;  %v2560_v5 = vpop.f32.mrf.mxu3 }
 0x286   :  { %v2173_v2 = vpop.f32.mrf.mxu2 }
 0x287   :  { %v2558_v4 = vadd.f32 %v2557_v59, %v2173_v2  ;;  %v1408_v6 = vpop.f32.mrf.mxu0 }
 0x288   :  { %v1793_v7 = vadd.f32 %v1792_v1, %v1408_v6  ;;  %3728 = vmatmul.msk.bf16.gmra.mxu1 %vm1016_vm1, %v3401_v61 }
 0x289   :  { %2905 = vst.msk [vmem:[%s6415_s3 + $0x3b8] sm:$0xff] %vm2786_vm2, %v2558_v4 }
 0x28a   :  { %2906 = vst [vmem:[%s6415_s3 + $0x3c0] sm:$0xff] %v1793_v7  ;;  %1447 = vmatmul.bf16.gmra.mxu0 %v3397_v3  ;;  %v3428_v7 = vld [vmem:[%s6414_s2 + $0x2a0] sm:$0xf] }
 0x28b   :  { %2215 = vmatmul.bf16.gmra.mxu2 %v3397_v3 }
 0x28d   :  { %v1794_v10 = vpop.f32.mrf.mxu1  ;;  %v2562_v13 = vpop.f32.mrf.mxu3 }
 0x28e   :  { %v2176_v11 = vpop.f32.mrf.mxu2 }
 0x28f   :  { %v2561_v12 = vadd.f32 %v2560_v5, %v2176_v11  ;;  %v1410_v14 = vpop.f32.mrf.mxu0  ;;  %v3433_v5 = vor.u32 %v3924_v62, %v3430_v63  ;;  %v3429_v11 = vor.u32 %v3925_v8, %v3428_v7  ;;  %v3931_v62 = vld [vmem:[%s6414_s2 + $0x2d4] sm:$0xf0]  ;;  %v3462_v7 = vld [vmem:[%s6414_s2 + $0x2e8] sm:$0xf0] }
 0x290   :  { %v1795_v16 = vadd.f32 %v1794_v10, %v1410_v14 }
 0x291   :  { %2907 = vst.msk [vmem:[%s6415_s3 + $0x3c8] sm:$0xff] %vm2786_vm2, %v2561_v12 }
 0x292   :  { %2908 = vst [vmem:[%s6415_s3 + $0x3d0] sm:$0xff] %v1795_v16  ;;  %3804 = vmatmul.msk.bf16.gmra.mxu3 %vm1016_vm1, %v3409_v15  ;;  %v3926_v16 = vld [vmem:[%s6414_s2 + $0x2b4] sm:$0xf] }
 0x295   :  { %v1797_v19 = vpop.f32.mrf.mxu1  ;;  %v2565_v23 = vpop.f32.mrf.mxu3 }
 0x296   :  { %v2178_v20 = vpop.f32.mrf.mxu2 }
 0x297   :  { %v2563_v22 = vadd.f32 %v2562_v13, %v2178_v20  ;;  %v1413_v24 = vpop.f32.mrf.mxu0 }
 0x298   :  { %v1798_v25 = vadd.f32 %v1797_v19, %v1413_v24  ;;  %3729 = vmatmul.msk.bf16.gmra.mxu1 %vm1016_vm1, %v3409_v15 }
 0x299   :  { %2909 = vst.msk [vmem:[%s6415_s3 + $0x3d8] sm:$0xff] %vm2786_vm2, %v2563_v22 }
 0x29a   :  { %2910 = vst [vmem:[%s6415_s3 + $0x3e0] sm:$0xff] %v1798_v25  ;;  %1452 = vmatmul.bf16.gmra.mxu0 %v3405_v21  ;;  %v3436_v25 = vld [vmem:[%s6414_s2 + $0x2b0] sm:$0xf] }
 0x29b   :  { %2220 = vmatmul.bf16.gmra.mxu2 %v3405_v21 }
 0x29d   :  { %v1799_v28 = vpop.f32.mrf.mxu1  ;;  %v2567_v31 = vpop.f32.mrf.mxu3 }
 0x29e   :  { %v2181_v29 = vpop.f32.mrf.mxu2 }
 0x29f   :  { %v2566_v30 = vadd.f32 %v2565_v23, %v2181_v29  ;;  %v1415_v32 = vpop.f32.mrf.mxu0  ;;  %v3441_v23 = vor.u32 %v3926_v16, %v3438_v17  ;;  %v3437_v29 = vor.u32 %v3927_v26, %v3436_v25  ;;  %v3933_v16 = vld [vmem:[%s6414_s2 + $0x2e4] sm:$0xf0]  ;;  %v3470_v25 = vld [vmem:[%s6414_s2 + $0x2f8] sm:$0xf0] }
 0x2a0   :  { %v1800_v34 = vadd.f32 %v1799_v28, %v1415_v32 }
 0x2a1   :  { %2911 = vst.msk [vmem:[%s6415_s3 + $0x3e8] sm:$0xff] %vm2786_vm2, %v2566_v30 }
 0x2a2   :  { %2912 = vst [vmem:[%s6415_s3 + $0x3f0] sm:$0xff] %v1800_v34  ;;  %3805 = vmatmul.msk.bf16.gmra.mxu3 %vm1016_vm1, %v3417_v33  ;;  %v3928_v34 = vld [vmem:[%s6414_s2 + $0x2c4] sm:$0xf] }
 0x2a5   :  { %v1802_v37 = vpop.f32.mrf.mxu1  ;;  %v2570_v41 = vpop.f32.mrf.mxu3 }
 0x2a6   :  { %v2183_v38 = vpop.f32.mrf.mxu2 }
 0x2a7   :  { %v2568_v40 = vadd.f32 %v2567_v31, %v2183_v38  ;;  %v1418_v42 = vpop.f32.mrf.mxu0 }
 0x2a8   :  { %v1803_v43 = vadd.f32 %v1802_v37, %v1418_v42  ;;  %3730 = vmatmul.msk.bf16.gmra.mxu1 %vm1016_vm1, %v3417_v33 }
 0x2a9   :  { %2913 = vst.msk [vmem:[%s6415_s3 + $0x3f8] sm:$0xff] %vm2786_vm2, %v2568_v40 }
 0x2aa   :  { %2914 = vst [vmem:[%s6415_s3 + $0x400] sm:$0xff] %v1803_v43  ;;  %1457 = vmatmul.bf16.gmra.mxu0 %v3413_v39  ;;  %v3444_v43 = vld [vmem:[%s6414_s2 + $0x2c0] sm:$0xf] }
 0x2ab   :  { %2225 = vmatmul.bf16.gmra.mxu2 %v3413_v39 }
 0x2ad   :  { %v1804_v46 = vpop.f32.mrf.mxu1  ;;  %v2572_v49 = vpop.f32.mrf.mxu3 }
 0x2ae   :  { %v2186_v47 = vpop.f32.mrf.mxu2 }
 0x2af   :  { %v2571_v48 = vadd.f32 %v2570_v41, %v2186_v47  ;;  %v1420_v50 = vpop.f32.mrf.mxu0  ;;  %v3449_v41 = vor.u32 %v3928_v34, %v3446_v35  ;;  %v3445_v47 = vor.u32 %v3929_v44, %v3444_v43  ;;  %v3935_v34 = vld [vmem:[%s6414_s2 + $0x2f4] sm:$0xf0]  ;;  %v3478_v43 = vld [vmem:[%s6414_s2 + $0x308] sm:$0xf0] }
 0x2b0   :  { %v1805_v52 = vadd.f32 %v1804_v46, %v1420_v50 }
 0x2b1   :  { %2915 = vst.msk [vmem:[%s6415_s3 + $0x408] sm:$0xff] %vm2786_vm2, %v2571_v48 }
 0x2b2   :  { %2916 = vst [vmem:[%s6415_s3 + $0x410] sm:$0xff] %v1805_v52  ;;  %3806 = vmatmul.msk.bf16.gmra.mxu3 %vm1016_vm1, %v3425_v51  ;;  %v3930_v52 = vld [vmem:[%s6414_s2 + $0x2d4] sm:$0xf] }
 0x2b5   :  { %v1807_v55 = vpop.f32.mrf.mxu1  ;;  %v2575_v59 = vpop.f32.mrf.mxu3 }
 0x2b6   :  { %v2188_v56 = vpop.f32.mrf.mxu2 }
 0x2b7   :  { %v2573_v58 = vadd.f32 %v2572_v49, %v2188_v56  ;;  %v1423_v60 = vpop.f32.mrf.mxu0 }
 0x2b8   :  { %v1808_v61 = vadd.f32 %v1807_v55, %v1423_v60  ;;  %3731 = vmatmul.msk.bf16.gmra.mxu1 %vm1016_vm1, %v3425_v51 }
 0x2b9   :  { %2917 = vst.msk [vmem:[%s6415_s3 + $0x418] sm:$0xff] %vm2786_vm2, %v2573_v58 }
 0x2ba   :  { %2918 = vst [vmem:[%s6415_s3 + $0x420] sm:$0xff] %v1808_v61  ;;  %1462 = vmatmul.bf16.gmra.mxu0 %v3421_v57  ;;  %v3452_v61 = vld [vmem:[%s6414_s2 + $0x2d0] sm:$0xf] }
 0x2bb   :  { %2230 = vmatmul.bf16.gmra.mxu2 %v3421_v57 }
 0x2bd   :  { %v1809_v0 = vpop.f32.mrf.mxu1  ;;  %v2577_v3 = vpop.f32.mrf.mxu3 }
 0x2be   :  { %v2191_v1 = vpop.f32.mrf.mxu2 }
 0x2bf   :  { %v2576_v2 = vadd.f32 %v2575_v59, %v2191_v1  ;;  %v1425_v4 = vpop.f32.mrf.mxu0  ;;  %v3457_v59 = vor.u32 %v3930_v52, %v3454_v53  ;;  %v3453_v1 = vor.u32 %v3931_v62, %v3452_v61  ;;  %v3937_v52 = vld [vmem:[%s6414_s2 + $0x304] sm:$0xf0]  ;;  %v3486_v61 = vld [vmem:[%s6414_s2 + $0x318] sm:$0xf0] }
 0x2c0   :  { %v1810_v6 = vadd.f32 %v1809_v0, %v1425_v4 }
 0x2c1   :  { %2919 = vst.msk [vmem:[%s6415_s3 + $0x428] sm:$0xff] %vm2786_vm2, %v2576_v2 }
 0x2c2   :  { %2920 = vst [vmem:[%s6415_s3 + $0x430] sm:$0xff] %v1810_v6  ;;  %3807 = vmatmul.msk.bf16.gmra.mxu3 %vm1016_vm1, %v3433_v5  ;;  %v3932_v6 = vld [vmem:[%s6414_s2 + $0x2e4] sm:$0xf] }
 0x2c5   :  { %v1812_v9 = vpop.f32.mrf.mxu1  ;;  %v2580_v13 = vpop.f32.mrf.mxu3 }
 0x2c6   :  { %v2193_v10 = vpop.f32.mrf.mxu2 }
 0x2c7   :  { %v2578_v12 = vadd.f32 %v2577_v3, %v2193_v10  ;;  %v1428_v14 = vpop.f32.mrf.mxu0 }
 0x2c8   :  { %v1813_v15 = vadd.f32 %v1812_v9, %v1428_v14  ;;  %3732 = vmatmul.msk.bf16.gmra.mxu1 %vm1016_vm1, %v3433_v5 }
 0x2c9   :  { %2921 = vst.msk [vmem:[%s6415_s3 + $0x438] sm:$0xff] %vm2786_vm2, %v2578_v12 }
 0x2ca   :  { %2922 = vst [vmem:[%s6415_s3 + $0x440] sm:$0xff] %v1813_v15  ;;  %1467 = vmatmul.bf16.gmra.mxu0 %v3429_v11  ;;  %v3460_v15 = vld [vmem:[%s6414_s2 + $0x2e0] sm:$0xf] }
 0x2cb   :  { %2235 = vmatmul.bf16.gmra.mxu2 %v3429_v11 }
 0x2cd   :  { %v1814_v18 = vpop.f32.mrf.mxu1  ;;  %v2582_v21 = vpop.f32.mrf.mxu3 }
 0x2ce   :  { %v2196_v19 = vpop.f32.mrf.mxu2 }
 0x2cf   :  { %v2581_v20 = vadd.f32 %v2580_v13, %v2196_v19  ;;  %v1430_v22 = vpop.f32.mrf.mxu0  ;;  %v3465_v13 = vor.u32 %v3932_v6, %v3462_v7  ;;  %v3461_v19 = vor.u32 %v3933_v16, %v3460_v15  ;;  %v3939_v6 = vld [vmem:[%s6414_s2 + $0x314] sm:$0xf0]  ;;  %v3494_v15 = vld [vmem:[%s6414_s2 + $0x328] sm:$0xf0] }
 0x2d0   :  { %v1815_v24 = vadd.f32 %v1814_v18, %v1430_v22 }
 0x2d1   :  { %2923 = vst.msk [vmem:[%s6415_s3 + $0x448] sm:$0xff] %vm2786_vm2, %v2581_v20 }
 0x2d2   :  { %2924 = vst [vmem:[%s6415_s3 + $0x450] sm:$0xff] %v1815_v24  ;;  %3808 = vmatmul.msk.bf16.gmra.mxu3 %vm1016_vm1, %v3441_v23  ;;  %v3934_v24 = vld [vmem:[%s6414_s2 + $0x2f4] sm:$0xf] }
 0x2d5   :  { %v1817_v27 = vpop.f32.mrf.mxu1  ;;  %v2585_v31 = vpop.f32.mrf.mxu3 }
 0x2d6   :  { %v2198_v28 = vpop.f32.mrf.mxu2 }
 0x2d7   :  { %v2583_v30 = vadd.f32 %v2582_v21, %v2198_v28  ;;  %v1433_v32 = vpop.f32.mrf.mxu0 }
 0x2d8   :  { %v1818_v33 = vadd.f32 %v1817_v27, %v1433_v32  ;;  %3733 = vmatmul.msk.bf16.gmra.mxu1 %vm1016_vm1, %v3441_v23 }
 0x2d9   :  { %2925 = vst.msk [vmem:[%s6415_s3 + $0x458] sm:$0xff] %vm2786_vm2, %v2583_v30 }
 0x2da   :  { %2926 = vst [vmem:[%s6415_s3 + $0x460] sm:$0xff] %v1818_v33  ;;  %1472 = vmatmul.bf16.gmra.mxu0 %v3437_v29  ;;  %v3468_v33 = vld [vmem:[%s6414_s2 + $0x2f0] sm:$0xf] }
 0x2db   :  { %2240 = vmatmul.bf16.gmra.mxu2 %v3437_v29 }
 0x2dd   :  { %v1819_v36 = vpop.f32.mrf.mxu1  ;;  %v2587_v39 = vpop.f32.mrf.mxu3 }
 0x2de   :  { %v2201_v37 = vpop.f32.mrf.mxu2 }
 0x2df   :  { %v2586_v38 = vadd.f32 %v2585_v31, %v2201_v37  ;;  %v1435_v40 = vpop.f32.mrf.mxu0  ;;  %v3473_v31 = vor.u32 %v3934_v24, %v3470_v25  ;;  %v3469_v37 = vor.u32 %v3935_v34, %v3468_v33  ;;  %v3941_v24 = vld [vmem:[%s6414_s2 + $0x324] sm:$0xf0]  ;;  %v3502_v33 = vld [vmem:[%s6414_s2 + $0x338] sm:$0xf0] }
 0x2e0   :  { %v1820_v42 = vadd.f32 %v1819_v36, %v1435_v40 }
 0x2e1   :  { %2927 = vst.msk [vmem:[%s6415_s3 + $0x468] sm:$0xff] %vm2786_vm2, %v2586_v38 }
 0x2e2   :  { %2928 = vst [vmem:[%s6415_s3 + $0x470] sm:$0xff] %v1820_v42  ;;  %3809 = vmatmul.msk.bf16.gmra.mxu3 %vm1016_vm1, %v3449_v41  ;;  %v3936_v42 = vld [vmem:[%s6414_s2 + $0x304] sm:$0xf] }
 0x2e5   :  { %v1822_v45 = vpop.f32.mrf.mxu1  ;;  %v2590_v49 = vpop.f32.mrf.mxu3 }
 0x2e6   :  { %v2203_v46 = vpop.f32.mrf.mxu2 }
 0x2e7   :  { %v2588_v48 = vadd.f32 %v2587_v39, %v2203_v46  ;;  %v1438_v50 = vpop.f32.mrf.mxu0 }
 0x2e8   :  { %v1823_v51 = vadd.f32 %v1822_v45, %v1438_v50  ;;  %3734 = vmatmul.msk.bf16.gmra.mxu1 %vm1016_vm1, %v3449_v41 }
 0x2e9   :  { %2929 = vst.msk [vmem:[%s6415_s3 + $0x478] sm:$0xff] %vm2786_vm2, %v2588_v48 }
 0x2ea   :  { %2930 = vst [vmem:[%s6415_s3 + $0x480] sm:$0xff] %v1823_v51  ;;  %1477 = vmatmul.bf16.gmra.mxu0 %v3445_v47  ;;  %v3476_v51 = vld [vmem:[%s6414_s2 + $0x300] sm:$0xf] }
 0x2eb   :  { %2245 = vmatmul.bf16.gmra.mxu2 %v3445_v47 }
 0x2ed   :  { %v1824_v54 = vpop.f32.mrf.mxu1  ;;  %v2592_v57 = vpop.f32.mrf.mxu3 }
 0x2ee   :  { %v2206_v55 = vpop.f32.mrf.mxu2 }
 0x2ef   :  { %v2591_v56 = vadd.f32 %v2590_v49, %v2206_v55  ;;  %v1440_v58 = vpop.f32.mrf.mxu0  ;;  %v3481_v49 = vor.u32 %v3936_v42, %v3478_v43  ;;  %v3477_v55 = vor.u32 %v3937_v52, %v3476_v51  ;;  %v3943_v42 = vld [vmem:[%s6414_s2 + $0x334] sm:$0xf0]  ;;  %v3510_v51 = vld [vmem:[%s6414_s2 + $0x348] sm:$0xf0] }
 0x2f0   :  { %v1825_v60 = vadd.f32 %v1824_v54, %v1440_v58 }
 0x2f1   :  { %2931 = vst.msk [vmem:[%s6415_s3 + $0x488] sm:$0xff] %vm2786_vm2, %v2591_v56 }
 0x2f2   :  { %2932 = vst [vmem:[%s6415_s3 + $0x490] sm:$0xff] %v1825_v60  ;;  %3810 = vmatmul.msk.bf16.gmra.mxu3 %vm1016_vm1, %v3457_v59  ;;  %v3938_v60 = vld [vmem:[%s6414_s2 + $0x314] sm:$0xf] }
 0x2f5   :  { %v1827_v63 = vpop.f32.mrf.mxu1  ;;  %v2595_v3 = vpop.f32.mrf.mxu3 }
 0x2f6   :  { %v2208_v0 = vpop.f32.mrf.mxu2 }
 0x2f7   :  { %v2593_v2 = vadd.f32 %v2592_v57, %v2208_v0  ;;  %v1443_v4 = vpop.f32.mrf.mxu0 }
 0x2f8   :  { %v1828_v5 = vadd.f32 %v1827_v63, %v1443_v4  ;;  %3735 = vmatmul.msk.bf16.gmra.mxu1 %vm1016_vm1, %v3457_v59 }
 0x2f9   :  { %2933 = vst.msk [vmem:[%s6415_s3 + $0x498] sm:$0xff] %vm2786_vm2, %v2593_v2 }
 0x2fa   :  { %2934 = vst [vmem:[%s6415_s3 + $0x4a0] sm:$0xff] %v1828_v5  ;;  %1482 = vmatmul.bf16.gmra.mxu0 %v3453_v1  ;;  %v3484_v5 = vld [vmem:[%s6414_s2 + $0x310] sm:$0xf] }
 0x2fb   :  { %2250 = vmatmul.bf16.gmra.mxu2 %v3453_v1 }
 0x2fd   :  { %v1829_v8 = vpop.f32.mrf.mxu1  ;;  %v2597_v11 = vpop.f32.mrf.mxu3 }
 0x2fe   :  { %v2211_v9 = vpop.f32.mrf.mxu2 }
 0x2ff   :  { %v2596_v10 = vadd.f32 %v2595_v3, %v2211_v9  ;;  %v1445_v12 = vpop.f32.mrf.mxu0  ;;  %v3489_v3 = vor.u32 %v3938_v60, %v3486_v61  ;;  %v3485_v9 = vor.u32 %v3939_v6, %v3484_v5  ;;  %v3945_v60 = vld [vmem:[%s6414_s2 + $0x344] sm:$0xf0]  ;;  %v3518_v5 = vld [vmem:[%s6414_s2 + $0x358] sm:$0xf0] }
 0x300   :  { %v1830_v14 = vadd.f32 %v1829_v8, %v1445_v12 }
 0x301   :  { %2935 = vst.msk [vmem:[%s6415_s3 + $0x4a8] sm:$0xff] %vm2786_vm2, %v2596_v10 }
 0x302   :  { %2936 = vst [vmem:[%s6415_s3 + $0x4b0] sm:$0xff] %v1830_v14  ;;  %3811 = vmatmul.msk.bf16.gmra.mxu3 %vm1016_vm1, %v3465_v13  ;;  %v3940_v14 = vld [vmem:[%s6414_s2 + $0x324] sm:$0xf] }
 0x305   :  { %v1832_v17 = vpop.f32.mrf.mxu1  ;;  %v2600_v21 = vpop.f32.mrf.mxu3 }
 0x306   :  { %v2213_v18 = vpop.f32.mrf.mxu2 }
 0x307   :  { %v2598_v20 = vadd.f32 %v2597_v11, %v2213_v18  ;;  %v1448_v22 = vpop.f32.mrf.mxu0 }
 0x308   :  { %v1833_v23 = vadd.f32 %v1832_v17, %v1448_v22  ;;  %3736 = vmatmul.msk.bf16.gmra.mxu1 %vm1016_vm1, %v3465_v13 }
 0x309   :  { %2937 = vst.msk [vmem:[%s6415_s3 + $0x4b8] sm:$0xff] %vm2786_vm2, %v2598_v20 }
 0x30a   :  { %2938 = vst [vmem:[%s6415_s3 + $0x4c0] sm:$0xff] %v1833_v23  ;;  %1487 = vmatmul.bf16.gmra.mxu0 %v3461_v19  ;;  %v3492_v23 = vld [vmem:[%s6414_s2 + $0x320] sm:$0xf] }
 0x30b   :  { %2255 = vmatmul.bf16.gmra.mxu2 %v3461_v19 }
 0x30d   :  { %v1834_v26 = vpop.f32.mrf.mxu1  ;;  %v2602_v29 = vpop.f32.mrf.mxu3 }
 0x30e   :  { %v2216_v27 = vpop.f32.mrf.mxu2 }
 0x30f   :  { %v2601_v28 = vadd.f32 %v2600_v21, %v2216_v27  ;;  %v1450_v30 = vpop.f32.mrf.mxu0  ;;  %v3497_v21 = vor.u32 %v3940_v14, %v3494_v15  ;;  %v3493_v27 = vor.u32 %v3941_v24, %v3492_v23  ;;  %v3947_v14 = vld [vmem:[%s6414_s2 + $0x354] sm:$0xf0]  ;;  %v3526_v23 = vld [vmem:[%s6414_s2 + $0x368] sm:$0xf0] }
 0x310   :  { %v1835_v32 = vadd.f32 %v1834_v26, %v1450_v30 }
 0x311   :  { %2939 = vst.msk [vmem:[%s6415_s3 + $0x4c8] sm:$0xff] %vm2786_vm2, %v2601_v28 }
 0x312   :  { %2940 = vst [vmem:[%s6415_s3 + $0x4d0] sm:$0xff] %v1835_v32  ;;  %3812 = vmatmul.msk.bf16.gmra.mxu3 %vm1016_vm1, %v3473_v31  ;;  %v3942_v32 = vld [vmem:[%s6414_s2 + $0x334] sm:$0xf] }
 0x315   :  { %v1837_v35 = vpop.f32.mrf.mxu1  ;;  %v2605_v39 = vpop.f32.mrf.mxu3 }
 0x316   :  { %v2218_v36 = vpop.f32.mrf.mxu2 }
 0x317   :  { %v2603_v38 = vadd.f32 %v2602_v29, %v2218_v36  ;;  %v1453_v40 = vpop.f32.mrf.mxu0 }
 0x318   :  { %v1838_v41 = vadd.f32 %v1837_v35, %v1453_v40  ;;  %3737 = vmatmul.msk.bf16.gmra.mxu1 %vm1016_vm1, %v3473_v31 }
 0x319   :  { %2941 = vst.msk [vmem:[%s6415_s3 + $0x4d8] sm:$0xff] %vm2786_vm2, %v2603_v38 }
 0x31a   :  { %2942 = vst [vmem:[%s6415_s3 + $0x4e0] sm:$0xff] %v1838_v41  ;;  %1492 = vmatmul.bf16.gmra.mxu0 %v3469_v37  ;;  %v3500_v41 = vld [vmem:[%s6414_s2 + $0x330] sm:$0xf] }
 0x31b   :  { %2260 = vmatmul.bf16.gmra.mxu2 %v3469_v37 }
 0x31d   :  { %v1839_v44 = vpop.f32.mrf.mxu1  ;;  %v2607_v47 = vpop.f32.mrf.mxu3 }
 0x31e   :  { %v2221_v45 = vpop.f32.mrf.mxu2 }
 0x31f   :  { %v2606_v46 = vadd.f32 %v2605_v39, %v2221_v45  ;;  %v1455_v48 = vpop.f32.mrf.mxu0  ;;  %v3505_v39 = vor.u32 %v3942_v32, %v3502_v33  ;;  %v3501_v45 = vor.u32 %v3943_v42, %v3500_v41  ;;  %v3949_v32 = vld [vmem:[%s6414_s2 + $0x364] sm:$0xf0]  ;;  %v3534_v41 = vld [vmem:[%s6414_s2 + $0x378] sm:$0xf0] }
 0x320   :  { %v1840_v50 = vadd.f32 %v1839_v44, %v1455_v48 }
 0x321   :  { %2943 = vst.msk [vmem:[%s6415_s3 + $0x4e8] sm:$0xff] %vm2786_vm2, %v2606_v46 }
 0x322   :  { %2944 = vst [vmem:[%s6415_s3 + $0x4f0] sm:$0xff] %v1840_v50  ;;  %3813 = vmatmul.msk.bf16.gmra.mxu3 %vm1016_vm1, %v3481_v49  ;;  %v3944_v50 = vld [vmem:[%s6414_s2 + $0x344] sm:$0xf] }
 0x325   :  { %v1842_v53 = vpop.f32.mrf.mxu1  ;;  %v2610_v57 = vpop.f32.mrf.mxu3 }
 0x326   :  { %v2223_v54 = vpop.f32.mrf.mxu2 }
 0x327   :  { %v2608_v56 = vadd.f32 %v2607_v47, %v2223_v54  ;;  %v1458_v58 = vpop.f32.mrf.mxu0 }
 0x328   :  { %v1843_v59 = vadd.f32 %v1842_v53, %v1458_v58  ;;  %3738 = vmatmul.msk.bf16.gmra.mxu1 %vm1016_vm1, %v3481_v49 }
 0x329   :  { %2945 = vst.msk [vmem:[%s6415_s3 + $0x4f8] sm:$0xff] %vm2786_vm2, %v2608_v56 }
 0x32a   :  { %2946 = vst [vmem:[%s6415_s3 + $0x500] sm:$0xff] %v1843_v59  ;;  %1497 = vmatmul.bf16.gmra.mxu0 %v3477_v55  ;;  %v3508_v59 = vld [vmem:[%s6414_s2 + $0x340] sm:$0xf] }
 0x32b   :  { %2265 = vmatmul.bf16.gmra.mxu2 %v3477_v55 }
 0x32d   :  { %v1844_v62 = vpop.f32.mrf.mxu1  ;;  %v2612_v1 = vpop.f32.mrf.mxu3 }
 0x32e   :  { %v2226_v63 = vpop.f32.mrf.mxu2 }
 0x32f   :  { %v2611_v0 = vadd.f32 %v2610_v57, %v2226_v63  ;;  %v1460_v2 = vpop.f32.mrf.mxu0  ;;  %v3513_v57 = vor.u32 %v3944_v50, %v3510_v51  ;;  %v3509_v63 = vor.u32 %v3945_v60, %v3508_v59  ;;  %v3951_v50 = vld [vmem:[%s6414_s2 + $0x374] sm:$0xf0]  ;;  %v3542_v59 = vld [vmem:[%s6414_s2 + $0x388] sm:$0xf0] }
 0x330   :  { %v1845_v4 = vadd.f32 %v1844_v62, %v1460_v2 }
 0x331   :  { %2947 = vst.msk [vmem:[%s6415_s3 + $0x508] sm:$0xff] %vm2786_vm2, %v2611_v0 }
 0x332   :  { %2948 = vst [vmem:[%s6415_s3 + $0x510] sm:$0xff] %v1845_v4  ;;  %3814 = vmatmul.msk.bf16.gmra.mxu3 %vm1016_vm1, %v3489_v3  ;;  %v3946_v4 = vld [vmem:[%s6414_s2 + $0x354] sm:$0xf] }
 0x335   :  { %v1847_v7 = vpop.f32.mrf.mxu1  ;;  %v2615_v11 = vpop.f32.mrf.mxu3 }
 0x336   :  { %v2228_v8 = vpop.f32.mrf.mxu2 }
 0x337   :  { %v2613_v10 = vadd.f32 %v2612_v1, %v2228_v8  ;;  %v1463_v12 = vpop.f32.mrf.mxu0 }
 0x338   :  { %v1848_v13 = vadd.f32 %v1847_v7, %v1463_v12  ;;  %3739 = vmatmul.msk.bf16.gmra.mxu1 %vm1016_vm1, %v3489_v3 }
 0x339   :  { %2949 = vst.msk [vmem:[%s6415_s3 + $0x518] sm:$0xff] %vm2786_vm2, %v2613_v10 }
 0x33a   :  { %2950 = vst [vmem:[%s6415_s3 + $0x520] sm:$0xff] %v1848_v13  ;;  %1502 = vmatmul.bf16.gmra.mxu0 %v3485_v9  ;;  %v3516_v13 = vld [vmem:[%s6414_s2 + $0x350] sm:$0xf] }
 0x33b   :  { %2270 = vmatmul.bf16.gmra.mxu2 %v3485_v9 }
 0x33d   :  { %v1849_v16 = vpop.f32.mrf.mxu1  ;;  %v2617_v19 = vpop.f32.mrf.mxu3 }
 0x33e   :  { %v2231_v17 = vpop.f32.mrf.mxu2 }
 0x33f   :  { %v2616_v18 = vadd.f32 %v2615_v11, %v2231_v17  ;;  %v1465_v20 = vpop.f32.mrf.mxu0  ;;  %v3521_v11 = vor.u32 %v3946_v4, %v3518_v5  ;;  %v3517_v17 = vor.u32 %v3947_v14, %v3516_v13  ;;  %v3953_v4 = vld [vmem:[%s6414_s2 + $0x384] sm:$0xf0]  ;;  %v3550_v13 = vld [vmem:[%s6414_s2 + $0x398] sm:$0xf0] }
 0x340   :  { %v1850_v22 = vadd.f32 %v1849_v16, %v1465_v20 }
 0x341   :  { %2951 = vst.msk [vmem:[%s6415_s3 + $0x528] sm:$0xff] %vm2786_vm2, %v2616_v18 }
 0x342   :  { %2952 = vst [vmem:[%s6415_s3 + $0x530] sm:$0xff] %v1850_v22  ;;  %3815 = vmatmul.msk.bf16.gmra.mxu3 %vm1016_vm1, %v3497_v21  ;;  %v3948_v22 = vld [vmem:[%s6414_s2 + $0x364] sm:$0xf] }
 0x345   :  { %v1852_v25 = vpop.f32.mrf.mxu1  ;;  %v2620_v29 = vpop.f32.mrf.mxu3 }
 0x346   :  { %v2233_v26 = vpop.f32.mrf.mxu2 }
 0x347   :  { %v2618_v28 = vadd.f32 %v2617_v19, %v2233_v26  ;;  %v1468_v30 = vpop.f32.mrf.mxu0 }
 0x348   :  { %v1853_v31 = vadd.f32 %v1852_v25, %v1468_v30  ;;  %3740 = vmatmul.msk.bf16.gmra.mxu1 %vm1016_vm1, %v3497_v21 }
 0x349   :  { %2953 = vst.msk [vmem:[%s6415_s3 + $0x538] sm:$0xff] %vm2786_vm2, %v2618_v28 }
 0x34a   :  { %2954 = vst [vmem:[%s6415_s3 + $0x540] sm:$0xff] %v1853_v31  ;;  %1507 = vmatmul.bf16.gmra.mxu0 %v3493_v27  ;;  %v3524_v31 = vld [vmem:[%s6414_s2 + $0x360] sm:$0xf] }
 0x34b   :  { %2275 = vmatmul.bf16.gmra.mxu2 %v3493_v27 }
 0x34d   :  { %v1854_v34 = vpop.f32.mrf.mxu1  ;;  %v2622_v37 = vpop.f32.mrf.mxu3 }
 0x34e   :  { %v2236_v35 = vpop.f32.mrf.mxu2 }
 0x34f   :  { %v2621_v36 = vadd.f32 %v2620_v29, %v2236_v35  ;;  %v1470_v38 = vpop.f32.mrf.mxu0  ;;  %v3529_v29 = vor.u32 %v3948_v22, %v3526_v23  ;;  %v3525_v35 = vor.u32 %v3949_v32, %v3524_v31  ;;  %v3955_v22 = vld [vmem:[%s6414_s2 + $0x394] sm:$0xf0]  ;;  %v3558_v31 = vld [vmem:[%s6414_s2 + $0x3a8] sm:$0xf0] }
 0x350   :  { %v1855_v40 = vadd.f32 %v1854_v34, %v1470_v38 }
 0x351   :  { %2955 = vst.msk [vmem:[%s6415_s3 + $0x548] sm:$0xff] %vm2786_vm2, %v2621_v36 }
 0x352   :  { %2956 = vst [vmem:[%s6415_s3 + $0x550] sm:$0xff] %v1855_v40  ;;  %3816 = vmatmul.msk.bf16.gmra.mxu3 %vm1016_vm1, %v3505_v39  ;;  %v3950_v40 = vld [vmem:[%s6414_s2 + $0x374] sm:$0xf] }
 0x355   :  { %v1857_v43 = vpop.f32.mrf.mxu1  ;;  %v2625_v47 = vpop.f32.mrf.mxu3 }
 0x356   :  { %v2238_v44 = vpop.f32.mrf.mxu2 }
 0x357   :  { %v2623_v46 = vadd.f32 %v2622_v37, %v2238_v44  ;;  %v1473_v48 = vpop.f32.mrf.mxu0 }
 0x358   :  { %v1858_v49 = vadd.f32 %v1857_v43, %v1473_v48  ;;  %3741 = vmatmul.msk.bf16.gmra.mxu1 %vm1016_vm1, %v3505_v39 }
 0x359   :  { %2957 = vst.msk [vmem:[%s6415_s3 + $0x558] sm:$0xff] %vm2786_vm2, %v2623_v46 }
 0x35a   :  { %2958 = vst [vmem:[%s6415_s3 + $0x560] sm:$0xff] %v1858_v49  ;;  %1512 = vmatmul.bf16.gmra.mxu0 %v3501_v45  ;;  %v3532_v49 = vld [vmem:[%s6414_s2 + $0x370] sm:$0xf] }
 0x35b   :  { %2280 = vmatmul.bf16.gmra.mxu2 %v3501_v45 }
 0x35d   :  { %v1859_v52 = vpop.f32.mrf.mxu1  ;;  %v2627_v55 = vpop.f32.mrf.mxu3 }
 0x35e   :  { %v2241_v53 = vpop.f32.mrf.mxu2 }
 0x35f   :  { %v2626_v54 = vadd.f32 %v2625_v47, %v2241_v53  ;;  %v1475_v56 = vpop.f32.mrf.mxu0  ;;  %v3537_v47 = vor.u32 %v3950_v40, %v3534_v41  ;;  %v3533_v53 = vor.u32 %v3951_v50, %v3532_v49  ;;  %v3957_v40 = vld [vmem:[%s6414_s2 + $0x3a4] sm:$0xf0]  ;;  %v3566_v49 = vld [vmem:[%s6414_s2 + $0x3b8] sm:$0xf0] }
 0x360   :  { %v1860_v58 = vadd.f32 %v1859_v52, %v1475_v56 }
 0x361   :  { %2959 = vst.msk [vmem:[%s6415_s3 + $0x568] sm:$0xff] %vm2786_vm2, %v2626_v54 }
 0x362   :  { %2960 = vst [vmem:[%s6415_s3 + $0x570] sm:$0xff] %v1860_v58  ;;  %3817 = vmatmul.msk.bf16.gmra.mxu3 %vm1016_vm1, %v3513_v57  ;;  %v3952_v58 = vld [vmem:[%s6414_s2 + $0x384] sm:$0xf] }
 0x365   :  { %v1862_v61 = vpop.f32.mrf.mxu1  ;;  %v2630_v1 = vpop.f32.mrf.mxu3 }
 0x366   :  { %v2243_v62 = vpop.f32.mrf.mxu2 }
 0x367   :  { %v2628_v0 = vadd.f32 %v2627_v55, %v2243_v62  ;;  %v1478_v2 = vpop.f32.mrf.mxu0 }
 0x368   :  { %v1863_v3 = vadd.f32 %v1862_v61, %v1478_v2  ;;  %3742 = vmatmul.msk.bf16.gmra.mxu1 %vm1016_vm1, %v3513_v57 }
 0x369   :  { %2961 = vst.msk [vmem:[%s6415_s3 + $0x578] sm:$0xff] %vm2786_vm2, %v2628_v0 }
 0x36a   :  { %2962 = vst [vmem:[%s6415_s3 + $0x580] sm:$0xff] %v1863_v3  ;;  %1517 = vmatmul.bf16.gmra.mxu0 %v3509_v63  ;;  %v3540_v3 = vld [vmem:[%s6414_s2 + $0x380] sm:$0xf] }
 0x36b   :  { %2285 = vmatmul.bf16.gmra.mxu2 %v3509_v63 }
 0x36d   :  { %v1864_v6 = vpop.f32.mrf.mxu1  ;;  %v2632_v9 = vpop.f32.mrf.mxu3 }
 0x36e   :  { %v2246_v7 = vpop.f32.mrf.mxu2 }
 0x36f   :  { %v2631_v8 = vadd.f32 %v2630_v1, %v2246_v7  ;;  %v1480_v10 = vpop.f32.mrf.mxu0  ;;  %v3545_v1 = vor.u32 %v3952_v58, %v3542_v59  ;;  %v3541_v7 = vor.u32 %v3953_v4, %v3540_v3  ;;  %v3959_v58 = vld [vmem:[%s6414_s2 + $0x3b4] sm:$0xf0]  ;;  %v3574_v3 = vld [vmem:[%s6414_s2 + $0x3c8] sm:$0xf0] }
 0x370   :  { %v1865_v12 = vadd.f32 %v1864_v6, %v1480_v10 }
 0x371   :  { %2963 = vst.msk [vmem:[%s6415_s3 + $0x588] sm:$0xff] %vm2786_vm2, %v2631_v8 }
 0x372   :  { %2964 = vst [vmem:[%s6415_s3 + $0x590] sm:$0xff] %v1865_v12  ;;  %3818 = vmatmul.msk.bf16.gmra.mxu3 %vm1016_vm1, %v3521_v11  ;;  %v3954_v12 = vld [vmem:[%s6414_s2 + $0x394] sm:$0xf] }
 0x375   :  { %v1867_v15 = vpop.f32.mrf.mxu1  ;;  %v2635_v19 = vpop.f32.mrf.mxu3 }
 0x376   :  { %v2248_v16 = vpop.f32.mrf.mxu2 }
 0x377   :  { %v2633_v18 = vadd.f32 %v2632_v9, %v2248_v16  ;;  %v1483_v20 = vpop.f32.mrf.mxu0 }
 0x378   :  { %v1868_v21 = vadd.f32 %v1867_v15, %v1483_v20  ;;  %3743 = vmatmul.msk.bf16.gmra.mxu1 %vm1016_vm1, %v3521_v11 }
 0x379   :  { %2965 = vst.msk [vmem:[%s6415_s3 + $0x598] sm:$0xff] %vm2786_vm2, %v2633_v18 }
 0x37a   :  { %2966 = vst [vmem:[%s6415_s3 + $0x5a0] sm:$0xff] %v1868_v21  ;;  %1522 = vmatmul.bf16.gmra.mxu0 %v3517_v17  ;;  %v3548_v21 = vld [vmem:[%s6414_s2 + $0x390] sm:$0xf] }
 0x37b   :  { %2290 = vmatmul.bf16.gmra.mxu2 %v3517_v17 }
 0x37d   :  { %v1869_v24 = vpop.f32.mrf.mxu1  ;;  %v2637_v27 = vpop.f32.mrf.mxu3 }
 0x37e   :  { %v2251_v25 = vpop.f32.mrf.mxu2 }
 0x37f   :  { %v2636_v26 = vadd.f32 %v2635_v19, %v2251_v25  ;;  %v1485_v28 = vpop.f32.mrf.mxu0  ;;  %v3553_v19 = vor.u32 %v3954_v12, %v3550_v13  ;;  %v3549_v25 = vor.u32 %v3955_v22, %v3548_v21  ;;  %v3961_v12 = vld [vmem:[%s6414_s2 + $0x3c4] sm:$0xf0]  ;;  %v3582_v21 = vld [vmem:[%s6414_s2 + $0x3d8] sm:$0xf0] }
 0x380   :  { %v1870_v30 = vadd.f32 %v1869_v24, %v1485_v28 }
 0x381   :  { %2967 = vst.msk [vmem:[%s6415_s3 + $0x5a8] sm:$0xff] %vm2786_vm2, %v2636_v26 }
 0x382   :  { %2968 = vst [vmem:[%s6415_s3 + $0x5b0] sm:$0xff] %v1870_v30  ;;  %3819 = vmatmul.msk.bf16.gmra.mxu3 %vm1016_vm1, %v3529_v29  ;;  %v3956_v30 = vld [vmem:[%s6414_s2 + $0x3a4] sm:$0xf] }
 0x385   :  { %v1872_v33 = vpop.f32.mrf.mxu1  ;;  %v2640_v37 = vpop.f32.mrf.mxu3 }
 0x386   :  { %v2253_v34 = vpop.f32.mrf.mxu2 }
 0x387   :  { %v2638_v36 = vadd.f32 %v2637_v27, %v2253_v34  ;;  %v1488_v38 = vpop.f32.mrf.mxu0 }
 0x388   :  { %v1873_v39 = vadd.f32 %v1872_v33, %v1488_v38  ;;  %3744 = vmatmul.msk.bf16.gmra.mxu1 %vm1016_vm1, %v3529_v29 }
 0x389   :  { %2969 = vst.msk [vmem:[%s6415_s3 + $0x5b8] sm:$0xff] %vm2786_vm2, %v2638_v36 }
 0x38a   :  { %2970 = vst [vmem:[%s6415_s3 + $0x5c0] sm:$0xff] %v1873_v39  ;;  %1527 = vmatmul.bf16.gmra.mxu0 %v3525_v35  ;;  %v3556_v39 = vld [vmem:[%s6414_s2 + $0x3a0] sm:$0xf] }
 0x38b   :  { %2295 = vmatmul.bf16.gmra.mxu2 %v3525_v35 }
 0x38d   :  { %v1874_v42 = vpop.f32.mrf.mxu1  ;;  %v2642_v45 = vpop.f32.mrf.mxu3 }
 0x38e   :  { %v2256_v43 = vpop.f32.mrf.mxu2 }
 0x38f   :  { %v2641_v44 = vadd.f32 %v2640_v37, %v2256_v43  ;;  %v1490_v46 = vpop.f32.mrf.mxu0  ;;  %v3561_v37 = vor.u32 %v3956_v30, %v3558_v31  ;;  %v3557_v43 = vor.u32 %v3957_v40, %v3556_v39  ;;  %v3963_v30 = vld [vmem:[%s6414_s2 + $0x3d4] sm:$0xf0]  ;;  %v3590_v39 = vld [vmem:[%s6414_s2 + $0x3e8] sm:$0xf0] }
 0x390   :  { %v1875_v48 = vadd.f32 %v1874_v42, %v1490_v46 }
 0x391   :  { %2971 = vst.msk [vmem:[%s6415_s3 + $0x5c8] sm:$0xff] %vm2786_vm2, %v2641_v44 }
 0x392   :  { %2972 = vst [vmem:[%s6415_s3 + $0x5d0] sm:$0xff] %v1875_v48  ;;  %3820 = vmatmul.msk.bf16.gmra.mxu3 %vm1016_vm1, %v3537_v47  ;;  %v3958_v48 = vld [vmem:[%s6414_s2 + $0x3b4] sm:$0xf] }
 0x395   :  { %v1877_v51 = vpop.f32.mrf.mxu1  ;;  %v2645_v55 = vpop.f32.mrf.mxu3 }
 0x396   :  { %v2258_v52 = vpop.f32.mrf.mxu2 }
 0x397   :  { %v2643_v54 = vadd.f32 %v2642_v45, %v2258_v52  ;;  %v1493_v56 = vpop.f32.mrf.mxu0 }
 0x398   :  { %v1878_v57 = vadd.f32 %v1877_v51, %v1493_v56  ;;  %3745 = vmatmul.msk.bf16.gmra.mxu1 %vm1016_vm1, %v3537_v47 }
 0x399   :  { %2973 = vst.msk [vmem:[%s6415_s3 + $0x5d8] sm:$0xff] %vm2786_vm2, %v2643_v54 }
 0x39a   :  { %2974 = vst [vmem:[%s6415_s3 + $0x5e0] sm:$0xff] %v1878_v57  ;;  %1532 = vmatmul.bf16.gmra.mxu0 %v3533_v53  ;;  %v3564_v57 = vld [vmem:[%s6414_s2 + $0x3b0] sm:$0xf] }
 0x39b   :  { %2300 = vmatmul.bf16.gmra.mxu2 %v3533_v53 }
 0x39d   :  { %v1879_v60 = vpop.f32.mrf.mxu1  ;;  %v2647_v63 = vpop.f32.mrf.mxu3 }
 0x39e   :  { %v2261_v61 = vpop.f32.mrf.mxu2 }
 0x39f   :  { %v2646_v62 = vadd.f32 %v2645_v55, %v2261_v61  ;;  %v1495_v0 = vpop.f32.mrf.mxu0  ;;  %v3569_v55 = vor.u32 %v3958_v48, %v3566_v49  ;;  %v3565_v61 = vor.u32 %v3959_v58, %v3564_v57  ;;  %v3965_v48 = vld [vmem:[%s6414_s2 + $0x3e4] sm:$0xf0]  ;;  %v3598_v57 = vld [vmem:[%s6414_s2 + $0x3f8] sm:$0xf0] }
 0x3a0   :  { %v1880_v2 = vadd.f32 %v1879_v60, %v1495_v0 }
 0x3a1   :  { %2975 = vst.msk [vmem:[%s6415_s3 + $0x5e8] sm:$0xff] %vm2786_vm2, %v2646_v62 }
 0x3a2   :  { %2976 = vst [vmem:[%s6415_s3 + $0x5f0] sm:$0xff] %v1880_v2  ;;  %3821 = vmatmul.msk.bf16.gmra.mxu3 %vm1016_vm1, %v3545_v1  ;;  %v3960_v2 = vld [vmem:[%s6414_s2 + $0x3c4] sm:$0xf] }
 0x3a5   :  { %v1882_v5 = vpop.f32.mrf.mxu1  ;;  %v2650_v9 = vpop.f32.mrf.mxu3 }
 0x3a6   :  { %v2263_v6 = vpop.f32.mrf.mxu2 }
 0x3a7   :  { %v2648_v8 = vadd.f32 %v2647_v63, %v2263_v6  ;;  %v1498_v10 = vpop.f32.mrf.mxu0 }
 0x3a8   :  { %v1883_v11 = vadd.f32 %v1882_v5, %v1498_v10  ;;  %3746 = vmatmul.msk.bf16.gmra.mxu1 %vm1016_vm1, %v3545_v1 }
 0x3a9   :  { %2977 = vst.msk [vmem:[%s6415_s3 + $0x5f8] sm:$0xff] %vm2786_vm2, %v2648_v8 }
 0x3aa   :  { %2978 = vst [vmem:[%s6415_s3 + $0x600] sm:$0xff] %v1883_v11  ;;  %1537 = vmatmul.bf16.gmra.mxu0 %v3541_v7  ;;  %v3572_v11 = vld [vmem:[%s6414_s2 + $0x3c0] sm:$0xf] }
 0x3ab   :  { %2305 = vmatmul.bf16.gmra.mxu2 %v3541_v7 }
 0x3ad   :  { %v1884_v14 = vpop.f32.mrf.mxu1  ;;  %v2652_v17 = vpop.f32.mrf.mxu3 }
 0x3ae   :  { %v2266_v15 = vpop.f32.mrf.mxu2 }
 0x3af   :  { %v2651_v16 = vadd.f32 %v2650_v9, %v2266_v15  ;;  %v1500_v18 = vpop.f32.mrf.mxu0  ;;  %v3577_v9 = vor.u32 %v3960_v2, %v3574_v3  ;;  %v3573_v15 = vor.u32 %v3961_v12, %v3572_v11  ;;  %v3967_v2 = vld [vmem:[%s6414_s2 + $0x3f4] sm:$0xf0]  ;;  %v3606_v11 = vld [vmem:[%s6414_s2 + $0x408] sm:$0xf0] }
 0x3b0   :  { %v1885_v20 = vadd.f32 %v1884_v14, %v1500_v18 }
 0x3b1   :  { %2979 = vst.msk [vmem:[%s6415_s3 + $0x608] sm:$0xff] %vm2786_vm2, %v2651_v16 }
 0x3b2   :  { %2980 = vst [vmem:[%s6415_s3 + $0x610] sm:$0xff] %v1885_v20  ;;  %3822 = vmatmul.msk.bf16.gmra.mxu3 %vm1016_vm1, %v3553_v19  ;;  %v3962_v20 = vld [vmem:[%s6414_s2 + $0x3d4] sm:$0xf] }
 0x3b5   :  { %v1887_v23 = vpop.f32.mrf.mxu1  ;;  %v2655_v27 = vpop.f32.mrf.mxu3 }
 0x3b6   :  { %v2268_v24 = vpop.f32.mrf.mxu2 }
 0x3b7   :  { %v2653_v26 = vadd.f32 %v2652_v17, %v2268_v24  ;;  %v1503_v28 = vpop.f32.mrf.mxu0 }
 0x3b8   :  { %v1888_v29 = vadd.f32 %v1887_v23, %v1503_v28  ;;  %3747 = vmatmul.msk.bf16.gmra.mxu1 %vm1016_vm1, %v3553_v19 }
 0x3b9   :  { %2981 = vst.msk [vmem:[%s6415_s3 + $0x618] sm:$0xff] %vm2786_vm2, %v2653_v26 }
 0x3ba   :  { %2982 = vst [vmem:[%s6415_s3 + $0x620] sm:$0xff] %v1888_v29  ;;  %1542 = vmatmul.bf16.gmra.mxu0 %v3549_v25  ;;  %v3580_v29 = vld [vmem:[%s6414_s2 + $0x3d0] sm:$0xf] }
 0x3bb   :  { %2310 = vmatmul.bf16.gmra.mxu2 %v3549_v25 }
 0x3bd   :  { %v1889_v32 = vpop.f32.mrf.mxu1  ;;  %v2657_v35 = vpop.f32.mrf.mxu3 }
 0x3be   :  { %v2271_v33 = vpop.f32.mrf.mxu2 }
 0x3bf   :  { %v2656_v34 = vadd.f32 %v2655_v27, %v2271_v33  ;;  %v1505_v36 = vpop.f32.mrf.mxu0  ;;  %v3585_v27 = vor.u32 %v3962_v20, %v3582_v21  ;;  %v3581_v33 = vor.u32 %v3963_v30, %v3580_v29  ;;  %v3969_v20 = vld [vmem:[%s6414_s2 + $0x404] sm:$0xf0]  ;;  %v3614_v29 = vld [vmem:[%s6414_s2 + $0x418] sm:$0xf0] }
 0x3c0   :  { %v1890_v38 = vadd.f32 %v1889_v32, %v1505_v36 }
 0x3c1   :  { %2983 = vst.msk [vmem:[%s6415_s3 + $0x628] sm:$0xff] %vm2786_vm2, %v2656_v34 }
 0x3c2   :  { %2984 = vst [vmem:[%s6415_s3 + $0x630] sm:$0xff] %v1890_v38  ;;  %3823 = vmatmul.msk.bf16.gmra.mxu3 %vm1016_vm1, %v3561_v37  ;;  %v3964_v38 = vld [vmem:[%s6414_s2 + $0x3e4] sm:$0xf] }
 0x3c5   :  { %v1892_v41 = vpop.f32.mrf.mxu1  ;;  %v2660_v45 = vpop.f32.mrf.mxu3 }
 0x3c6   :  { %v2273_v42 = vpop.f32.mrf.mxu2 }
 0x3c7   :  { %v2658_v44 = vadd.f32 %v2657_v35, %v2273_v42  ;;  %v1508_v46 = vpop.f32.mrf.mxu0 }
 0x3c8   :  { %v1893_v47 = vadd.f32 %v1892_v41, %v1508_v46  ;;  %3748 = vmatmul.msk.bf16.gmra.mxu1 %vm1016_vm1, %v3561_v37 }
 0x3c9   :  { %2985 = vst.msk [vmem:[%s6415_s3 + $0x638] sm:$0xff] %vm2786_vm2, %v2658_v44 }
 0x3ca   :  { %2986 = vst [vmem:[%s6415_s3 + $0x640] sm:$0xff] %v1893_v47  ;;  %1547 = vmatmul.bf16.gmra.mxu0 %v3557_v43  ;;  %v3588_v47 = vld [vmem:[%s6414_s2 + $0x3e0] sm:$0xf] }
 0x3cb   :  { %2315 = vmatmul.bf16.gmra.mxu2 %v3557_v43 }
 0x3cd   :  { %v1894_v50 = vpop.f32.mrf.mxu1  ;;  %v2662_v53 = vpop.f32.mrf.mxu3 }
 0x3ce   :  { %v2276_v51 = vpop.f32.mrf.mxu2 }
 0x3cf   :  { %v2661_v52 = vadd.f32 %v2660_v45, %v2276_v51  ;;  %v1510_v54 = vpop.f32.mrf.mxu0  ;;  %v3593_v45 = vor.u32 %v3964_v38, %v3590_v39  ;;  %v3589_v51 = vor.u32 %v3965_v48, %v3588_v47  ;;  %v3971_v38 = vld [vmem:[%s6414_s2 + $0x414] sm:$0xf0]  ;;  %v3622_v47 = vld [vmem:[%s6414_s2 + $0x428] sm:$0xf0] }
 0x3d0   :  { %v1895_v56 = vadd.f32 %v1894_v50, %v1510_v54 }
 0x3d1   :  { %2987 = vst.msk [vmem:[%s6415_s3 + $0x648] sm:$0xff] %vm2786_vm2, %v2661_v52 }
 0x3d2   :  { %2988 = vst [vmem:[%s6415_s3 + $0x650] sm:$0xff] %v1895_v56  ;;  %3824 = vmatmul.msk.bf16.gmra.mxu3 %vm1016_vm1, %v3569_v55  ;;  %v3966_v56 = vld [vmem:[%s6414_s2 + $0x3f4] sm:$0xf] }
 0x3d5   :  { %v1897_v59 = vpop.f32.mrf.mxu1  ;;  %v2665_v63 = vpop.f32.mrf.mxu3 }
 0x3d6   :  { %v2278_v60 = vpop.f32.mrf.mxu2 }
 0x3d7   :  { %v2663_v62 = vadd.f32 %v2662_v53, %v2278_v60  ;;  %v1513_v0 = vpop.f32.mrf.mxu0 }
 0x3d8   :  { %v1898_v1 = vadd.f32 %v1897_v59, %v1513_v0  ;;  %3749 = vmatmul.msk.bf16.gmra.mxu1 %vm1016_vm1, %v3569_v55 }
 0x3d9   :  { %2989 = vst.msk [vmem:[%s6415_s3 + $0x658] sm:$0xff] %vm2786_vm2, %v2663_v62 }
 0x3da   :  { %2990 = vst [vmem:[%s6415_s3 + $0x660] sm:$0xff] %v1898_v1  ;;  %1552 = vmatmul.bf16.gmra.mxu0 %v3565_v61  ;;  %v3596_v1 = vld [vmem:[%s6414_s2 + $0x3f0] sm:$0xf] }
 0x3db   :  { %2320 = vmatmul.bf16.gmra.mxu2 %v3565_v61 }
 0x3dd   :  { %v1899_v4 = vpop.f32.mrf.mxu1  ;;  %v2667_v7 = vpop.f32.mrf.mxu3 }
 0x3de   :  { %v2281_v5 = vpop.f32.mrf.mxu2 }
 0x3df   :  { %v2666_v6 = vadd.f32 %v2665_v63, %v2281_v5  ;;  %v1515_v8 = vpop.f32.mrf.mxu0  ;;  %v3601_v63 = vor.u32 %v3966_v56, %v3598_v57  ;;  %v3597_v5 = vor.u32 %v3967_v2, %v3596_v1  ;;  %v3973_v56 = vld [vmem:[%s6414_s2 + $0x424] sm:$0xf0]  ;;  %v3630_v1 = vld [vmem:[%s6414_s2 + $0x438] sm:$0xf0] }
 0x3e0   :  { %v1900_v10 = vadd.f32 %v1899_v4, %v1515_v8 }
 0x3e1   :  { %2991 = vst.msk [vmem:[%s6415_s3 + $0x668] sm:$0xff] %vm2786_vm2, %v2666_v6 }
 0x3e2   :  { %2992 = vst [vmem:[%s6415_s3 + $0x670] sm:$0xff] %v1900_v10  ;;  %3825 = vmatmul.msk.bf16.gmra.mxu3 %vm1016_vm1, %v3577_v9  ;;  %v3968_v10 = vld [vmem:[%s6414_s2 + $0x404] sm:$0xf] }
 0x3e5   :  { %v1902_v13 = vpop.f32.mrf.mxu1  ;;  %v2670_v17 = vpop.f32.mrf.mxu3 }
 0x3e6   :  { %v2283_v14 = vpop.f32.mrf.mxu2 }
 0x3e7   :  { %v2668_v16 = vadd.f32 %v2667_v7, %v2283_v14  ;;  %v1518_v18 = vpop.f32.mrf.mxu0 }
 0x3e8   :  { %v1903_v19 = vadd.f32 %v1902_v13, %v1518_v18  ;;  %3750 = vmatmul.msk.bf16.gmra.mxu1 %vm1016_vm1, %v3577_v9 }
 0x3e9   :  { %2993 = vst.msk [vmem:[%s6415_s3 + $0x678] sm:$0xff] %vm2786_vm2, %v2668_v16 }
 0x3ea   :  { %2994 = vst [vmem:[%s6415_s3 + $0x680] sm:$0xff] %v1903_v19  ;;  %1557 = vmatmul.bf16.gmra.mxu0 %v3573_v15  ;;  %v3604_v19 = vld [vmem:[%s6414_s2 + $0x400] sm:$0xf] }
 0x3eb   :  { %2325 = vmatmul.bf16.gmra.mxu2 %v3573_v15 }
 0x3ed   :  { %v1904_v22 = vpop.f32.mrf.mxu1  ;;  %v2672_v25 = vpop.f32.mrf.mxu3 }
 0x3ee   :  { %v2286_v23 = vpop.f32.mrf.mxu2 }
 0x3ef   :  { %v2671_v24 = vadd.f32 %v2670_v17, %v2286_v23  ;;  %v1520_v26 = vpop.f32.mrf.mxu0  ;;  %v3609_v17 = vor.u32 %v3968_v10, %v3606_v11  ;;  %v3605_v23 = vor.u32 %v3969_v20, %v3604_v19  ;;  %v3975_v10 = vld [vmem:[%s6414_s2 + $0x434] sm:$0xf0]  ;;  %v3638_v19 = vld [vmem:[%s6414_s2 + $0x448] sm:$0xf0] }
 0x3f0   :  { %v1905_v28 = vadd.f32 %v1904_v22, %v1520_v26 }
 0x3f1   :  { %2995 = vst.msk [vmem:[%s6415_s3 + $0x688] sm:$0xff] %vm2786_vm2, %v2671_v24 }
 0x3f2   :  { %2996 = vst [vmem:[%s6415_s3 + $0x690] sm:$0xff] %v1905_v28  ;;  %3826 = vmatmul.msk.bf16.gmra.mxu3 %vm1016_vm1, %v3585_v27  ;;  %v3970_v28 = vld [vmem:[%s6414_s2 + $0x414] sm:$0xf] }
 0x3f5   :  { %v1907_v31 = vpop.f32.mrf.mxu1  ;;  %v2675_v35 = vpop.f32.mrf.mxu3 }
 0x3f6   :  { %v2288_v32 = vpop.f32.mrf.mxu2 }
 0x3f7   :  { %v2673_v34 = vadd.f32 %v2672_v25, %v2288_v32  ;;  %v1523_v36 = vpop.f32.mrf.mxu0 }
 0x3f8   :  { %v1908_v37 = vadd.f32 %v1907_v31, %v1523_v36  ;;  %3751 = vmatmul.msk.bf16.gmra.mxu1 %vm1016_vm1, %v3585_v27 }
 0x3f9   :  { %2997 = vst.msk [vmem:[%s6415_s3 + $0x698] sm:$0xff] %vm2786_vm2, %v2673_v34 }
 0x3fa   :  { %2998 = vst [vmem:[%s6415_s3 + $0x6a0] sm:$0xff] %v1908_v37  ;;  %1562 = vmatmul.bf16.gmra.mxu0 %v3581_v33  ;;  %v3612_v37 = vld [vmem:[%s6414_s2 + $0x410] sm:$0xf] }
 0x3fb   :  { %2330 = vmatmul.bf16.gmra.mxu2 %v3581_v33 }
 0x3fd   :  { %v1909_v40 = vpop.f32.mrf.mxu1  ;;  %v2677_v43 = vpop.f32.mrf.mxu3 }
 0x3fe   :  { %v2291_v41 = vpop.f32.mrf.mxu2 }
 0x3ff   :  { %v2676_v42 = vadd.f32 %v2675_v35, %v2291_v41  ;;  %v1525_v44 = vpop.f32.mrf.mxu0  ;;  %v3617_v35 = vor.u32 %v3970_v28, %v3614_v29  ;;  %v3613_v41 = vor.u32 %v3971_v38, %v3612_v37  ;;  %v3977_v28 = vld [vmem:[%s6414_s2 + $0x444] sm:$0xf0]  ;;  %v3646_v37 = vld [vmem:[%s6414_s2 + $0x458] sm:$0xf0] }
 0x400   :  { %v1910_v46 = vadd.f32 %v1909_v40, %v1525_v44 }
 0x401   :  { %2999 = vst.msk [vmem:[%s6415_s3 + $0x6a8] sm:$0xff] %vm2786_vm2, %v2676_v42 }
 0x402   :  { %3000 = vst [vmem:[%s6415_s3 + $0x6b0] sm:$0xff] %v1910_v46  ;;  %3827 = vmatmul.msk.bf16.gmra.mxu3 %vm1016_vm1, %v3593_v45  ;;  %v3972_v46 = vld [vmem:[%s6414_s2 + $0x424] sm:$0xf] }
 0x405   :  { %v1912_v49 = vpop.f32.mrf.mxu1  ;;  %v2680_v53 = vpop.f32.mrf.mxu3 }
 0x406   :  { %v2293_v50 = vpop.f32.mrf.mxu2 }
 0x407   :  { %v2678_v52 = vadd.f32 %v2677_v43, %v2293_v50  ;;  %v1528_v54 = vpop.f32.mrf.mxu0 }
 0x408   :  { %v1913_v55 = vadd.f32 %v1912_v49, %v1528_v54  ;;  %3752 = vmatmul.msk.bf16.gmra.mxu1 %vm1016_vm1, %v3593_v45 }
 0x409   :  { %3001 = vst.msk [vmem:[%s6415_s3 + $0x6b8] sm:$0xff] %vm2786_vm2, %v2678_v52 }
 0x40a   :  { %3002 = vst [vmem:[%s6415_s3 + $0x6c0] sm:$0xff] %v1913_v55  ;;  %1567 = vmatmul.bf16.gmra.mxu0 %v3589_v51  ;;  %v3620_v55 = vld [vmem:[%s6414_s2 + $0x420] sm:$0xf] }
 0x40b   :  { %2335 = vmatmul.bf16.gmra.mxu2 %v3589_v51 }
 0x40d   :  { %v1914_v58 = vpop.f32.mrf.mxu1  ;;  %v2682_v61 = vpop.f32.mrf.mxu3 }
 0x40e   :  { %v2296_v59 = vpop.f32.mrf.mxu2 }
 0x40f   :  { %v2681_v60 = vadd.f32 %v2680_v53, %v2296_v59  ;;  %v1530_v62 = vpop.f32.mrf.mxu0  ;;  %v3625_v53 = vor.u32 %v3972_v46, %v3622_v47  ;;  %v3621_v59 = vor.u32 %v3973_v56, %v3620_v55  ;;  %v3979_v46 = vld [vmem:[%s6414_s2 + $0x454] sm:$0xf0]  ;;  %v3654_v55 = vld [vmem:[%s6414_s2 + $0x468] sm:$0xf0] }
 0x410   :  { %v1915_v0 = vadd.f32 %v1914_v58, %v1530_v62 }
 0x411   :  { %3003 = vst.msk [vmem:[%s6415_s3 + $0x6c8] sm:$0xff] %vm2786_vm2, %v2681_v60 }
 0x412   :  { %3004 = vst [vmem:[%s6415_s3 + $0x6d0] sm:$0xff] %v1915_v0  ;;  %3828 = vmatmul.msk.bf16.gmra.mxu3 %vm1016_vm1, %v3601_v63  ;;  %v3974_v0 = vld [vmem:[%s6414_s2 + $0x434] sm:$0xf] }
 0x415   :  { %v1917_v3 = vpop.f32.mrf.mxu1  ;;  %v2685_v7 = vpop.f32.mrf.mxu3 }
 0x416   :  { %v2298_v4 = vpop.f32.mrf.mxu2 }
 0x417   :  { %v2683_v6 = vadd.f32 %v2682_v61, %v2298_v4  ;;  %v1533_v8 = vpop.f32.mrf.mxu0 }
 0x418   :  { %v1918_v9 = vadd.f32 %v1917_v3, %v1533_v8  ;;  %3753 = vmatmul.msk.bf16.gmra.mxu1 %vm1016_vm1, %v3601_v63 }
 0x419   :  { %3005 = vst.msk [vmem:[%s6415_s3 + $0x6d8] sm:$0xff] %vm2786_vm2, %v2683_v6 }
 0x41a   :  { %3006 = vst [vmem:[%s6415_s3 + $0x6e0] sm:$0xff] %v1918_v9  ;;  %1572 = vmatmul.bf16.gmra.mxu0 %v3597_v5  ;;  %v3628_v9 = vld [vmem:[%s6414_s2 + $0x430] sm:$0xf] }
 0x41b   :  { %2340 = vmatmul.bf16.gmra.mxu2 %v3597_v5 }
 0x41d   :  { %v1919_v12 = vpop.f32.mrf.mxu1  ;;  %v2687_v15 = vpop.f32.mrf.mxu3 }
 0x41e   :  { %v2301_v13 = vpop.f32.mrf.mxu2 }
 0x41f   :  { %v2686_v14 = vadd.f32 %v2685_v7, %v2301_v13  ;;  %v1535_v16 = vpop.f32.mrf.mxu0  ;;  %v3633_v7 = vor.u32 %v3974_v0, %v3630_v1  ;;  %v3629_v13 = vor.u32 %v3975_v10, %v3628_v9  ;;  %v3981_v0 = vld [vmem:[%s6414_s2 + $0x464] sm:$0xf0]  ;;  %v3662_v9 = vld [vmem:[%s6414_s2 + $0x478] sm:$0xf0] }
 0x420   :  { %v1920_v18 = vadd.f32 %v1919_v12, %v1535_v16 }
 0x421   :  { %3007 = vst.msk [vmem:[%s6415_s3 + $0x6e8] sm:$0xff] %vm2786_vm2, %v2686_v14 }
 0x422   :  { %3008 = vst [vmem:[%s6415_s3 + $0x6f0] sm:$0xff] %v1920_v18  ;;  %3829 = vmatmul.msk.bf16.gmra.mxu3 %vm1016_vm1, %v3609_v17  ;;  %v3976_v18 = vld [vmem:[%s6414_s2 + $0x444] sm:$0xf] }
 0x425   :  { %v1922_v21 = vpop.f32.mrf.mxu1  ;;  %v2690_v25 = vpop.f32.mrf.mxu3 }
 0x426   :  { %v2303_v22 = vpop.f32.mrf.mxu2 }
 0x427   :  { %v2688_v24 = vadd.f32 %v2687_v15, %v2303_v22  ;;  %v1538_v26 = vpop.f32.mrf.mxu0 }
 0x428   :  { %v1923_v27 = vadd.f32 %v1922_v21, %v1538_v26  ;;  %3754 = vmatmul.msk.bf16.gmra.mxu1 %vm1016_vm1, %v3609_v17 }
 0x429   :  { %3009 = vst.msk [vmem:[%s6415_s3 + $0x6f8] sm:$0xff] %vm2786_vm2, %v2688_v24 }
 0x42a   :  { %3010 = vst [vmem:[%s6415_s3 + $0x700] sm:$0xff] %v1923_v27  ;;  %1577 = vmatmul.bf16.gmra.mxu0 %v3605_v23  ;;  %v3636_v27 = vld [vmem:[%s6414_s2 + $0x440] sm:$0xf] }
 0x42b   :  { %2345 = vmatmul.bf16.gmra.mxu2 %v3605_v23 }
 0x42d   :  { %v1924_v30 = vpop.f32.mrf.mxu1  ;;  %v2692_v33 = vpop.f32.mrf.mxu3 }
 0x42e   :  { %v2306_v31 = vpop.f32.mrf.mxu2 }
 0x42f   :  { %v2691_v32 = vadd.f32 %v2690_v25, %v2306_v31  ;;  %v1540_v34 = vpop.f32.mrf.mxu0  ;;  %v3641_v25 = vor.u32 %v3976_v18, %v3638_v19  ;;  %v3637_v31 = vor.u32 %v3977_v28, %v3636_v27  ;;  %v3983_v18 = vld [vmem:[%s6414_s2 + $0x474] sm:$0xf0]  ;;  %v3670_v27 = vld [vmem:[%s6414_s2 + $0x488] sm:$0xf0] }
 0x430   :  { %v1925_v36 = vadd.f32 %v1924_v30, %v1540_v34 }
 0x431   :  { %3011 = vst.msk [vmem:[%s6415_s3 + $0x708] sm:$0xff] %vm2786_vm2, %v2691_v32 }
 0x432   :  { %3012 = vst [vmem:[%s6415_s3 + $0x710] sm:$0xff] %v1925_v36  ;;  %3830 = vmatmul.msk.bf16.gmra.mxu3 %vm1016_vm1, %v3617_v35  ;;  %v3978_v36 = vld [vmem:[%s6414_s2 + $0x454] sm:$0xf] }
 0x435   :  { %v1927_v39 = vpop.f32.mrf.mxu1  ;;  %v2695_v43 = vpop.f32.mrf.mxu3 }
 0x436   :  { %v2308_v40 = vpop.f32.mrf.mxu2 }
 0x437   :  { %v2693_v42 = vadd.f32 %v2692_v33, %v2308_v40  ;;  %v1543_v44 = vpop.f32.mrf.mxu0 }
 0x438   :  { %v1928_v45 = vadd.f32 %v1927_v39, %v1543_v44  ;;  %3755 = vmatmul.msk.bf16.gmra.mxu1 %vm1016_vm1, %v3617_v35 }
 0x439   :  { %3013 = vst.msk [vmem:[%s6415_s3 + $0x718] sm:$0xff] %vm2786_vm2, %v2693_v42 }
 0x43a   :  { %3014 = vst [vmem:[%s6415_s3 + $0x720] sm:$0xff] %v1928_v45  ;;  %1582 = vmatmul.bf16.gmra.mxu0 %v3613_v41  ;;  %v3644_v45 = vld [vmem:[%s6414_s2 + $0x450] sm:$0xf] }
 0x43b   :  { %2350 = vmatmul.bf16.gmra.mxu2 %v3613_v41 }
 0x43d   :  { %v1929_v48 = vpop.f32.mrf.mxu1  ;;  %v2697_v51 = vpop.f32.mrf.mxu3 }
 0x43e   :  { %v2311_v49 = vpop.f32.mrf.mxu2 }
 0x43f   :  { %v2696_v50 = vadd.f32 %v2695_v43, %v2311_v49  ;;  %v1545_v52 = vpop.f32.mrf.mxu0  ;;  %v3649_v43 = vor.u32 %v3978_v36, %v3646_v37  ;;  %v3645_v49 = vor.u32 %v3979_v46, %v3644_v45  ;;  %v3985_v36 = vld [vmem:[%s6414_s2 + $0x484] sm:$0xf0]  ;;  %v3678_v45 = vld [vmem:[%s6414_s2 + $0x498] sm:$0xf0] }
 0x440   :  { %v1930_v54 = vadd.f32 %v1929_v48, %v1545_v52 }
 0x441   :  { %3015 = vst.msk [vmem:[%s6415_s3 + $0x728] sm:$0xff] %vm2786_vm2, %v2696_v50 }
 0x442   :  { %3016 = vst [vmem:[%s6415_s3 + $0x730] sm:$0xff] %v1930_v54  ;;  %3831 = vmatmul.msk.bf16.gmra.mxu3 %vm1016_vm1, %v3625_v53  ;;  %v3980_v54 = vld [vmem:[%s6414_s2 + $0x464] sm:$0xf] }
 0x445   :  { %v1932_v57 = vpop.f32.mrf.mxu1  ;;  %v2700_v61 = vpop.f32.mrf.mxu3 }
 0x446   :  { %v2313_v58 = vpop.f32.mrf.mxu2 }
 0x447   :  { %v2698_v60 = vadd.f32 %v2697_v51, %v2313_v58  ;;  %v1548_v62 = vpop.f32.mrf.mxu0 }
 0x448   :  { %v1933_v63 = vadd.f32 %v1932_v57, %v1548_v62  ;;  %3756 = vmatmul.msk.bf16.gmra.mxu1 %vm1016_vm1, %v3625_v53 }
 0x449   :  { %3017 = vst.msk [vmem:[%s6415_s3 + $0x738] sm:$0xff] %vm2786_vm2, %v2698_v60 }
 0x44a   :  { %3018 = vst [vmem:[%s6415_s3 + $0x740] sm:$0xff] %v1933_v63  ;;  %1587 = vmatmul.bf16.gmra.mxu0 %v3621_v59  ;;  %v3652_v63 = vld [vmem:[%s6414_s2 + $0x460] sm:$0xf] }
 0x44b   :  { %2355 = vmatmul.bf16.gmra.mxu2 %v3621_v59 }
 0x44d   :  { %v1934_v2 = vpop.f32.mrf.mxu1  ;;  %v2702_v5 = vpop.f32.mrf.mxu3 }
 0x44e   :  { %v2316_v3 = vpop.f32.mrf.mxu2 }
 0x44f   :  { %v2701_v4 = vadd.f32 %v2700_v61, %v2316_v3  ;;  %v1550_v6 = vpop.f32.mrf.mxu0  ;;  %v3657_v61 = vor.u32 %v3980_v54, %v3654_v55  ;;  %v3653_v3 = vor.u32 %v3981_v0, %v3652_v63  ;;  %v3987_v54 = vld [vmem:[%s6414_s2 + $0x494] sm:$0xf0]  ;;  %v3686_v63 = vld [vmem:[%s6414_s2 + $0x4a8] sm:$0xf0] }
 0x450   :  { %v1935_v8 = vadd.f32 %v1934_v2, %v1550_v6 }
 0x451   :  { %3019 = vst.msk [vmem:[%s6415_s3 + $0x748] sm:$0xff] %vm2786_vm2, %v2701_v4 }
 0x452   :  { %3020 = vst [vmem:[%s6415_s3 + $0x750] sm:$0xff] %v1935_v8  ;;  %3832 = vmatmul.msk.bf16.gmra.mxu3 %vm1016_vm1, %v3633_v7  ;;  %v3982_v8 = vld [vmem:[%s6414_s2 + $0x474] sm:$0xf] }
 0x455   :  { %v1937_v11 = vpop.f32.mrf.mxu1  ;;  %v2705_v15 = vpop.f32.mrf.mxu3 }
 0x456   :  { %v2318_v12 = vpop.f32.mrf.mxu2 }
 0x457   :  { %v2703_v14 = vadd.f32 %v2702_v5, %v2318_v12  ;;  %v1553_v16 = vpop.f32.mrf.mxu0 }
 0x458   :  { %v1938_v17 = vadd.f32 %v1937_v11, %v1553_v16  ;;  %3757 = vmatmul.msk.bf16.gmra.mxu1 %vm1016_vm1, %v3633_v7 }
 0x459   :  { %3021 = vst.msk [vmem:[%s6415_s3 + $0x758] sm:$0xff] %vm2786_vm2, %v2703_v14 }
 0x45a   :  { %3022 = vst [vmem:[%s6415_s3 + $0x760] sm:$0xff] %v1938_v17  ;;  %1592 = vmatmul.bf16.gmra.mxu0 %v3629_v13  ;;  %v3660_v17 = vld [vmem:[%s6414_s2 + $0x470] sm:$0xf] }
 0x45b   :  { %2360 = vmatmul.bf16.gmra.mxu2 %v3629_v13 }
 0x45d   :  { %v1939_v20 = vpop.f32.mrf.mxu1  ;;  %v2707_v23 = vpop.f32.mrf.mxu3 }
 0x45e   :  { %v2321_v21 = vpop.f32.mrf.mxu2 }
 0x45f   :  { %v2706_v22 = vadd.f32 %v2705_v15, %v2321_v21  ;;  %v1555_v24 = vpop.f32.mrf.mxu0  ;;  %v3665_v15 = vor.u32 %v3982_v8, %v3662_v9  ;;  %v3661_v21 = vor.u32 %v3983_v18, %v3660_v17  ;;  %v3989_v8 = vld [vmem:[%s6414_s2 + $0x4a4] sm:$0xf0] }
 0x460   :  { %v1940_v26 = vadd.f32 %v1939_v20, %v1555_v24 }
 0x461   :  { %3023 = vst.msk [vmem:[%s6415_s3 + $0x768] sm:$0xff] %vm2786_vm2, %v2706_v22 }
 0x462   :  { %3024 = vst [vmem:[%s6415_s3 + $0x770] sm:$0xff] %v1940_v26  ;;  %3833 = vmatmul.msk.bf16.gmra.mxu3 %vm1016_vm1, %v3641_v25  ;;  %v3984_v26 = vld [vmem:[%s6414_s2 + $0x484] sm:$0xf] }
 0x465   :  { %v1942_v29 = vpop.f32.mrf.mxu1  ;;  %v2710_v33 = vpop.f32.mrf.mxu3 }
 0x466   :  { %v2323_v30 = vpop.f32.mrf.mxu2 }
 0x467   :  { %v2708_v32 = vadd.f32 %v2707_v23, %v2323_v30  ;;  %v1558_v34 = vpop.f32.mrf.mxu0 }
 0x468   :  { %v1943_v35 = vadd.f32 %v1942_v29, %v1558_v34  ;;  %3758 = vmatmul.msk.bf16.gmra.mxu1 %vm1016_vm1, %v3641_v25 }
 0x469   :  { %3025 = vst.msk [vmem:[%s6415_s3 + $0x778] sm:$0xff] %vm2786_vm2, %v2708_v32 }
 0x46a   :  { %3026 = vst [vmem:[%s6415_s3 + $0x780] sm:$0xff] %v1943_v35  ;;  %1597 = vmatmul.bf16.gmra.mxu0 %v3637_v31  ;;  %v3668_v35 = vld [vmem:[%s6414_s2 + $0x480] sm:$0xf] }
 0x46b   :  { %2365 = vmatmul.bf16.gmra.mxu2 %v3637_v31 }
 0x46d   :  { %v1944_v38 = vpop.f32.mrf.mxu1  ;;  %v2712_v41 = vpop.f32.mrf.mxu3 }
 0x46e   :  { %v2326_v39 = vpop.f32.mrf.mxu2 }
 0x46f   :  { %v2711_v40 = vadd.f32 %v2710_v33, %v2326_v39  ;;  %v1560_v42 = vpop.f32.mrf.mxu0  ;;  %v3673_v33 = vor.u32 %v3984_v26, %v3670_v27  ;;  %v3669_v39 = vor.u32 %v3985_v36, %v3668_v35 }
 0x470   :  { %v1945_v44 = vadd.f32 %v1944_v38, %v1560_v42 }
 0x471   :  { %3027 = vst.msk [vmem:[%s6415_s3 + $0x788] sm:$0xff] %vm2786_vm2, %v2711_v40 }
 0x472   :  { %3028 = vst [vmem:[%s6415_s3 + $0x790] sm:$0xff] %v1945_v44  ;;  %3834 = vmatmul.msk.bf16.gmra.mxu3 %vm1016_vm1, %v3649_v43  ;;  %v3986_v44 = vld [vmem:[%s6414_s2 + $0x494] sm:$0xf] }
 0x475   :  { %v1947_v47 = vpop.f32.mrf.mxu1  ;;  %v2715_v51 = vpop.f32.mrf.mxu3 }
 0x476   :  { %v2328_v48 = vpop.f32.mrf.mxu2 }
 0x477   :  { %v2713_v50 = vadd.f32 %v2712_v41, %v2328_v48  ;;  %v1563_v52 = vpop.f32.mrf.mxu0 }
 0x478   :  { %v1948_v53 = vadd.f32 %v1947_v47, %v1563_v52  ;;  %3759 = vmatmul.msk.bf16.gmra.mxu1 %vm1016_vm1, %v3649_v43 }
 0x479   :  { %3029 = vst.msk [vmem:[%s6415_s3 + $0x798] sm:$0xff] %vm2786_vm2, %v2713_v50 }
 0x47a   :  { %3030 = vst [vmem:[%s6415_s3 + $0x7a0] sm:$0xff] %v1948_v53  ;;  %1602 = vmatmul.bf16.gmra.mxu0 %v3645_v49  ;;  %v3676_v53 = vld [vmem:[%s6414_s2 + $0x490] sm:$0xf] }
 0x47b   :  { %2370 = vmatmul.bf16.gmra.mxu2 %v3645_v49 }
 0x47d   :  { %v1949_v56 = vpop.f32.mrf.mxu1  ;;  %v2717_v59 = vpop.f32.mrf.mxu3 }
 0x47e   :  { %v2331_v57 = vpop.f32.mrf.mxu2 }
 0x47f   :  { %v2716_v58 = vadd.f32 %v2715_v51, %v2331_v57  ;;  %v1565_v60 = vpop.f32.mrf.mxu0  ;;  %v3681_v51 = vor.u32 %v3986_v44, %v3678_v45  ;;  %v3677_v57 = vor.u32 %v3987_v54, %v3676_v53 }
 0x480   :  { %v1950_v62 = vadd.f32 %v1949_v56, %v1565_v60 }
 0x481   :  { %3031 = vst.msk [vmem:[%s6415_s3 + $0x7a8] sm:$0xff] %vm2786_vm2, %v2716_v58 }
 0x482   :  { %3032 = vst [vmem:[%s6415_s3 + $0x7b0] sm:$0xff] %v1950_v62  ;;  %3835 = vmatmul.msk.bf16.gmra.mxu3 %vm1016_vm1, %v3657_v61  ;;  %v3988_v62 = vld [vmem:[%s6414_s2 + $0x4a4] sm:$0xf] }
 0x485   :  { %v1952_v1 = vpop.f32.mrf.mxu1  ;;  %v2720_v5 = vpop.f32.mrf.mxu3 }
 0x486   :  { %v2333_v2 = vpop.f32.mrf.mxu2 }
 0x487   :  { %v2718_v4 = vadd.f32 %v2717_v59, %v2333_v2  ;;  %v1568_v6 = vpop.f32.mrf.mxu0 }
 0x488   :  { %v1953_v7 = vadd.f32 %v1952_v1, %v1568_v6  ;;  %3760 = vmatmul.msk.bf16.gmra.mxu1 %vm1016_vm1, %v3657_v61 }
 0x489   :  { %3033 = vst.msk [vmem:[%s6415_s3 + $0x7b8] sm:$0xff] %vm2786_vm2, %v2718_v4 }
 0x48a   :  { %3034 = vst [vmem:[%s6415_s3 + $0x7c0] sm:$0xff] %v1953_v7  ;;  %1607 = vmatmul.bf16.gmra.mxu0 %v3653_v3  ;;  %v3684_v7 = vld [vmem:[%s6414_s2 + $0x4a0] sm:$0xf] }
 0x48b   :  { %2375 = vmatmul.bf16.gmra.mxu2 %v3653_v3 }
 0x48d   :  { %v1954_v10 = vpop.f32.mrf.mxu1  ;;  %v2722_v13 = vpop.f32.mrf.mxu3 }
 0x48e   :  { %v2336_v11 = vpop.f32.mrf.mxu2 }
 0x48f   :  { %v2721_v12 = vadd.f32 %v2720_v5, %v2336_v11  ;;  %v1570_v14 = vpop.f32.mrf.mxu0  ;;  %v3689_v5 = vor.u32 %v3988_v62, %v3686_v63  ;;  %v3685_v11 = vor.u32 %v3989_v8, %v3684_v7 }
 0x490   :  { %v1955_v16 = vadd.f32 %v1954_v10, %v1570_v14 }
 0x491   :  { %3035 = vst.msk [vmem:[%s6415_s3 + $0x7c8] sm:$0xff] %vm2786_vm2, %v2721_v12 }
 0x492   :  { %3036 = vst [vmem:[%s6415_s3 + $0x7d0] sm:$0xff] %v1955_v16  ;;  %3836 = vmatmul.msk.bf16.gmra.mxu3 %vm1016_vm1, %v3665_v15 }
 0x495   :  { %v1957_v19 = vpop.f32.mrf.mxu1  ;;  %v2725_v23 = vpop.f32.mrf.mxu3 }
 0x496   :  { %v2338_v20 = vpop.f32.mrf.mxu2 }
 0x497   :  { %v2723_v22 = vadd.f32 %v2722_v13, %v2338_v20  ;;  %v1573_v24 = vpop.f32.mrf.mxu0 }
 0x498   :  { %v1958_v25 = vadd.f32 %v1957_v19, %v1573_v24  ;;  %3761 = vmatmul.msk.bf16.gmra.mxu1 %vm1016_vm1, %v3665_v15 }
 0x499   :  { %3037 = vst.msk [vmem:[%s6415_s3 + $0x7d8] sm:$0xff] %vm2786_vm2, %v2723_v22 }
 0x49a   :  { %3038 = vst [vmem:[%s6415_s3 + $0x7e0] sm:$0xff] %v1958_v25  ;;  %1612 = vmatmul.bf16.gmra.mxu0 %v3661_v21 }
 0x49b   :  { %2380 = vmatmul.bf16.gmra.mxu2 %v3661_v21 }
 0x49d   :  { %v1959_v28 = vpop.f32.mrf.mxu1  ;;  %v2727_v31 = vpop.f32.mrf.mxu3 }
 0x49e   :  { %v2341_v29 = vpop.f32.mrf.mxu2 }
 0x49f   :  { %v2726_v30 = vadd.f32 %v2725_v23, %v2341_v29  ;;  %v1575_v32 = vpop.f32.mrf.mxu0 }
 0x4a0   :  { %v1960_v34 = vadd.f32 %v1959_v28, %v1575_v32 }
 0x4a1   :  { %3039 = vst.msk [vmem:[%s6415_s3 + $0x7e8] sm:$0xff] %vm2786_vm2, %v2726_v30 }
 0x4a2   :  { %3040 = vst [vmem:[%s6415_s3 + $0x7f0] sm:$0xff] %v1960_v34  ;;  %3837 = vmatmul.msk.bf16.gmra.mxu3 %vm1016_vm1, %v3673_v33 }
 0x4a5   :  { %v1962_v37 = vpop.f32.mrf.mxu1  ;;  %v2730_v41 = vpop.f32.mrf.mxu3 }
 0x4a6   :  { %v2343_v38 = vpop.f32.mrf.mxu2 }
 0x4a7   :  { %v2728_v40 = vadd.f32 %v2727_v31, %v2343_v38  ;;  %v1578_v42 = vpop.f32.mrf.mxu0 }
 0x4a8   :  { %v1963_v43 = vadd.f32 %v1962_v37, %v1578_v42  ;;  %3762 = vmatmul.msk.bf16.gmra.mxu1 %vm1016_vm1, %v3673_v33 }
 0x4a9   :  { %3041 = vst.msk [vmem:[%s6415_s3 + $0x7f8] sm:$0xff] %vm2786_vm2, %v2728_v40 }
 0x4aa   :  { %3042 = vst [vmem:[%s6415_s3 + $0x800] sm:$0xff] %v1963_v43  ;;  %1617 = vmatmul.bf16.gmra.mxu0 %v3669_v39 }
 0x4ab   :  { %2385 = vmatmul.bf16.gmra.mxu2 %v3669_v39 }
 0x4ad   :  { %v1964_v46 = vpop.f32.mrf.mxu1  ;;  %v2732_v49 = vpop.f32.mrf.mxu3 }
 0x4ae   :  { %v2346_v47 = vpop.f32.mrf.mxu2 }
 0x4af   :  { %v2731_v48 = vadd.f32 %v2730_v41, %v2346_v47  ;;  %v1580_v50 = vpop.f32.mrf.mxu0 }
 0x4b0   :  { %v1965_v52 = vadd.f32 %v1964_v46, %v1580_v50 }
 0x4b1   :  { %3043 = vst.msk [vmem:[%s6415_s3 + $0x808] sm:$0xff] %vm2786_vm2, %v2731_v48 }
 0x4b2   :  { %3044 = vst [vmem:[%s6415_s3 + $0x810] sm:$0xff] %v1965_v52  ;;  %3838 = vmatmul.msk.bf16.gmra.mxu3 %vm1016_vm1, %v3681_v51 }
 0x4b5   :  { %v1967_v55 = vpop.f32.mrf.mxu1  ;;  %v2735_v59 = vpop.f32.mrf.mxu3 }
 0x4b6   :  { %v2348_v56 = vpop.f32.mrf.mxu2 }
 0x4b7   :  { %v2733_v58 = vadd.f32 %v2732_v49, %v2348_v56  ;;  %v1583_v60 = vpop.f32.mrf.mxu0 }
 0x4b8   :  { %v1968_v61 = vadd.f32 %v1967_v55, %v1583_v60  ;;  %3763 = vmatmul.msk.bf16.gmra.mxu1 %vm1016_vm1, %v3681_v51 }
 0x4b9   :  { %3045 = vst.msk [vmem:[%s6415_s3 + $0x818] sm:$0xff] %vm2786_vm2, %v2733_v58 }
 0x4ba   :  { %3046 = vst [vmem:[%s6415_s3 + $0x820] sm:$0xff] %v1968_v61  ;;  %1622 = vmatmul.bf16.gmra.mxu0 %v3677_v57 }
 0x4bb   :  { %2390 = vmatmul.bf16.gmra.mxu2 %v3677_v57 }
 0x4bd   :  { %v1969_v0 = vpop.f32.mrf.mxu1  ;;  %v2737_v3 = vpop.f32.mrf.mxu3 }
 0x4be   :  { %v2351_v1 = vpop.f32.mrf.mxu2 }
 0x4bf   :  { %v2736_v2 = vadd.f32 %v2735_v59, %v2351_v1  ;;  %v1585_v4 = vpop.f32.mrf.mxu0 }
 0x4c0   :  { %v1970_v6 = vadd.f32 %v1969_v0, %v1585_v4 }
 0x4c1   :  { %3047 = vst.msk [vmem:[%s6415_s3 + $0x828] sm:$0xff] %vm2786_vm2, %v2736_v2 }
 0x4c2   :  { %3048 = vst [vmem:[%s6415_s3 + $0x830] sm:$0xff] %v1970_v6  ;;  %3839 = vmatmul.msk.bf16.gmra.mxu3 %vm1016_vm1, %v3689_v5 }
 0x4c5   :  { %v1972_v9 = vpop.f32.mrf.mxu1  ;;  %v2740_v13 = vpop.f32.mrf.mxu3 }
 0x4c6   :  { %v2353_v10 = vpop.f32.mrf.mxu2 }
 0x4c7   :  { %v2738_v12 = vadd.f32 %v2737_v3, %v2353_v10  ;;  %v1588_v14 = vpop.f32.mrf.mxu0 }
 0x4c8   :  { %v1973_v15 = vadd.f32 %v1972_v9, %v1588_v14  ;;  %3764 = vmatmul.msk.bf16.gmra.mxu1 %vm1016_vm1, %v3689_v5 }
 0x4c9   :  { %3049 = vst.msk [vmem:[%s6415_s3 + $0x838] sm:$0xff] %vm2786_vm2, %v2738_v12 }
 0x4ca   :  { %3050 = vst [vmem:[%s6415_s3 + $0x840] sm:$0xff] %v1973_v15  ;;  %1627 = vmatmul.bf16.gmra.mxu0 %v3685_v11 }
 0x4cb   :  { %2395 = vmatmul.bf16.gmra.mxu2 %v3685_v11 }
 0x4cd   :  { %v1974_v16 = vpop.f32.mrf.mxu1  ;;  %v2742_v19 = vpop.f32.mrf.mxu3 }
 0x4ce   :  { %v2356_v17 = vpop.f32.mrf.mxu2 }
 0x4cf   :  { %v2741_v18 = vadd.f32 %v2740_v13, %v2356_v17  ;;  %v1590_v20 = vpop.f32.mrf.mxu0 }
 0x4d0   :  { %v1975_v21 = vadd.f32 %v1974_v16, %v1590_v20 }
 0x4d1   :  { %3051 = vst.msk [vmem:[%s6415_s3 + $0x848] sm:$0xff] %vm2786_vm2, %v2741_v18 }
 0x4d2   :  { %3052 = vst [vmem:[%s6415_s3 + $0x850] sm:$0xff] %v1975_v21 }
 0x4d5   :  { %v1977_v22 = vpop.f32.mrf.mxu1  ;;  %v2745_v25 = vpop.f32.mrf.mxu3 }
 0x4d6   :  { %v2358_v23 = vpop.f32.mrf.mxu2 }
 0x4d7   :  { %v2743_v24 = vadd.f32 %v2742_v19, %v2358_v23  ;;  %v1593_v26 = vpop.f32.mrf.mxu0 }
 0x4d8   :  { %v1978_v27 = vadd.f32 %v1977_v22, %v1593_v26 }
 0x4d9   :  { %3053 = vst.msk [vmem:[%s6415_s3 + $0x858] sm:$0xff] %vm2786_vm2, %v2743_v24 }
 0x4da   :  { %3054 = vst [vmem:[%s6415_s3 + $0x860] sm:$0xff] %v1978_v27 }
 0x4dd   :  { %v1979_v28 = vpop.f32.mrf.mxu1  ;;  %v2747_v31 = vpop.f32.mrf.mxu3 }
 0x4de   :  { %v2361_v29 = vpop.f32.mrf.mxu2 }
 0x4df   :  { %v2746_v30 = vadd.f32 %v2745_v25, %v2361_v29  ;;  %v1595_v32 = vpop.f32.mrf.mxu0 }
 0x4e0   :  { %v1980_v33 = vadd.f32 %v1979_v28, %v1595_v32 }
 0x4e1   :  { %3055 = vst.msk [vmem:[%s6415_s3 + $0x868] sm:$0xff] %vm2786_vm2, %v2746_v30 }
 0x4e2   :  { %3056 = vst [vmem:[%s6415_s3 + $0x870] sm:$0xff] %v1980_v33 }
 0x4e5   :  { %v1982_v34 = vpop.f32.mrf.mxu1  ;;  %v2750_v37 = vpop.f32.mrf.mxu3 }
 0x4e6   :  { %v2363_v35 = vpop.f32.mrf.mxu2 }
 0x4e7   :  { %v2748_v36 = vadd.f32 %v2747_v31, %v2363_v35  ;;  %v1598_v38 = vpop.f32.mrf.mxu0 }
 0x4e8   :  { %v1983_v39 = vadd.f32 %v1982_v34, %v1598_v38 }
 0x4e9   :  { %3057 = vst.msk [vmem:[%s6415_s3 + $0x878] sm:$0xff] %vm2786_vm2, %v2748_v36 }
 0x4ea   :  { %3058 = vst [vmem:[%s6415_s3 + $0x880] sm:$0xff] %v1983_v39 }
 0x4ed   :  { %v1984_v40 = vpop.f32.mrf.mxu1  ;;  %v2752_v43 = vpop.f32.mrf.mxu3 }
 0x4ee   :  { %v2366_v41 = vpop.f32.mrf.mxu2 }
 0x4ef   :  { %v2751_v42 = vadd.f32 %v2750_v37, %v2366_v41  ;;  %v1600_v44 = vpop.f32.mrf.mxu0 }
 0x4f0   :  { %v1985_v45 = vadd.f32 %v1984_v40, %v1600_v44 }
 0x4f1   :  { %3059 = vst.msk [vmem:[%s6415_s3 + $0x888] sm:$0xff] %vm2786_vm2, %v2751_v42 }
 0x4f2   :  { %3060 = vst [vmem:[%s6415_s3 + $0x890] sm:$0xff] %v1985_v45 }
 0x4f5   :  { %v1987_v46 = vpop.f32.mrf.mxu1  ;;  %v2755_v49 = vpop.f32.mrf.mxu3 }
 0x4f6   :  { %v2368_v47 = vpop.f32.mrf.mxu2 }
 0x4f7   :  { %v2753_v48 = vadd.f32 %v2752_v43, %v2368_v47  ;;  %v1603_v50 = vpop.f32.mrf.mxu0 }
 0x4f8   :  { %v1988_v51 = vadd.f32 %v1987_v46, %v1603_v50 }
 0x4f9   :  { %3061 = vst.msk [vmem:[%s6415_s3 + $0x898] sm:$0xff] %vm2786_vm2, %v2753_v48 }
 0x4fa   :  { %3062 = vst [vmem:[%s6415_s3 + $0x8a0] sm:$0xff] %v1988_v51 }
 0x4fd   :  { %v1989_v52 = vpop.f32.mrf.mxu1  ;;  %v2757_v55 = vpop.f32.mrf.mxu3 }
 0x4fe   :  { %v2371_v53 = vpop.f32.mrf.mxu2 }
 0x4ff   :  { %v2756_v54 = vadd.f32 %v2755_v49, %v2371_v53  ;;  %v1605_v56 = vpop.f32.mrf.mxu0 }
 0x500   :  { %v1990_v57 = vadd.f32 %v1989_v52, %v1605_v56 }
 0x501   :  { %3063 = vst.msk [vmem:[%s6415_s3 + $0x8a8] sm:$0xff] %vm2786_vm2, %v2756_v54 }
 0x502   :  { %3064 = vst [vmem:[%s6415_s3 + $0x8b0] sm:$0xff] %v1990_v57 }
 0x505   :  { %v1992_v58 = vpop.f32.mrf.mxu1  ;;  %v2760_v61 = vpop.f32.mrf.mxu3 }
 0x506   :  { %v2373_v59 = vpop.f32.mrf.mxu2 }
 0x507   :  { %v2758_v60 = vadd.f32 %v2757_v55, %v2373_v59  ;;  %v1608_v62 = vpop.f32.mrf.mxu0 }
 0x508   :  { %v1993_v63 = vadd.f32 %v1992_v58, %v1608_v62 }
 0x509   :  { %3065 = vst.msk [vmem:[%s6415_s3 + $0x8b8] sm:$0xff] %vm2786_vm2, %v2758_v60 }
 0x50a   :  { %3066 = vst [vmem:[%s6415_s3 + $0x8c0] sm:$0xff] %v1993_v63 }
 0x50d   :  { %v1994_v0 = vpop.f32.mrf.mxu1  ;;  %v2762_v3 = vpop.f32.mrf.mxu3 }
 0x50e   :  { %v2376_v1 = vpop.f32.mrf.mxu2 }
 0x50f   :  { %v2761_v2 = vadd.f32 %v2760_v61, %v2376_v1  ;;  %v1610_v4 = vpop.f32.mrf.mxu0 }
 0x510   :  { %v1995_v5 = vadd.f32 %v1994_v0, %v1610_v4 }
 0x511   :  { %3067 = vst.msk [vmem:[%s6415_s3 + $0x8c8] sm:$0xff] %vm2786_vm2, %v2761_v2 }
 0x512   :  { %3068 = vst [vmem:[%s6415_s3 + $0x8d0] sm:$0xff] %v1995_v5 }
 0x515   :  { %v1997_v6 = vpop.f32.mrf.mxu1  ;;  %v2765_v9 = vpop.f32.mrf.mxu3 }
 0x516   :  { %v2378_v7 = vpop.f32.mrf.mxu2 }
 0x517   :  { %v2763_v8 = vadd.f32 %v2762_v3, %v2378_v7  ;;  %v1613_v10 = vpop.f32.mrf.mxu0 }
 0x518   :  { %v1998_v11 = vadd.f32 %v1997_v6, %v1613_v10 }
 0x519   :  { %3069 = vst.msk [vmem:[%s6415_s3 + $0x8d8] sm:$0xff] %vm2786_vm2, %v2763_v8 }
 0x51a   :  { %3070 = vst [vmem:[%s6415_s3 + $0x8e0] sm:$0xff] %v1998_v11 }
 0x51d   :  { %v1999_v12 = vpop.f32.mrf.mxu1  ;;  %v2767_v15 = vpop.f32.mrf.mxu3 }
 0x51e   :  { %v2381_v13 = vpop.f32.mrf.mxu2 }
 0x51f   :  { %v2766_v14 = vadd.f32 %v2765_v9, %v2381_v13  ;;  %v1615_v16 = vpop.f32.mrf.mxu0 }
 0x520   :  { %v2000_v17 = vadd.f32 %v1999_v12, %v1615_v16 }
 0x521   :  { %3071 = vst.msk [vmem:[%s6415_s3 + $0x8e8] sm:$0xff] %vm2786_vm2, %v2766_v14 }
 0x522   :  { %3072 = vst [vmem:[%s6415_s3 + $0x8f0] sm:$0xff] %v2000_v17 }
 0x525   :  { %v2002_v18 = vpop.f32.mrf.mxu1  ;;  %v2770_v21 = vpop.f32.mrf.mxu3 }
 0x526   :  { %v2383_v19 = vpop.f32.mrf.mxu2 }
 0x527   :  { %v2768_v20 = vadd.f32 %v2767_v15, %v2383_v19  ;;  %v1618_v22 = vpop.f32.mrf.mxu0 }
 0x528   :  { %v2003_v23 = vadd.f32 %v2002_v18, %v1618_v22 }
 0x529   :  { %3073 = vst.msk [vmem:[%s6415_s3 + $0x8f8] sm:$0xff] %vm2786_vm2, %v2768_v20 }
 0x52a   :  { %3074 = vst [vmem:[%s6415_s3 + $0x900] sm:$0xff] %v2003_v23 }
 0x52d   :  { %v2004_v24 = vpop.f32.mrf.mxu1  ;;  %v2772_v27 = vpop.f32.mrf.mxu3 }
 0x52e   :  { %v2386_v25 = vpop.f32.mrf.mxu2 }
 0x52f   :  { %v2771_v26 = vadd.f32 %v2770_v21, %v2386_v25  ;;  %v1620_v28 = vpop.f32.mrf.mxu0 }
 0x530   :  { %v2005_v29 = vadd.f32 %v2004_v24, %v1620_v28 }
 0x531   :  { %3075 = vst.msk [vmem:[%s6415_s3 + $0x908] sm:$0xff] %vm2786_vm2, %v2771_v26 }
 0x532   :  { %3076 = vst [vmem:[%s6415_s3 + $0x910] sm:$0xff] %v2005_v29 }
 0x535   :  { %v2007_v30 = vpop.f32.mrf.mxu1  ;;  %v2775_v34 = vpop.f32.mrf.mxu3 }
 0x536   :  { %v2388_v31 = vpop.f32.mrf.mxu2 }
 0x537   :  { %v2773_v32 = vadd.f32 %v2772_v27, %v2388_v31  ;;  %v1623_v33 = vpop.f32.mrf.mxu0 }
 0x538   :  { %v2008_v35 = vadd.f32 %v2007_v30, %v1623_v33 }
 0x539   :  { %3077 = vst.msk [vmem:[%s6415_s3 + $0x918] sm:$0xff] %vm2786_vm2, %v2773_v32 }
 0x53a   :  { %3078 = vst [vmem:[%s6415_s3 + $0x920] sm:$0xff] %v2008_v35 }
 0x53d   :  { %v2009_v36 = vpop.f32.mrf.mxu1  ;;  %v2777_v41 = vpop.f32.mrf.mxu3 }
 0x53e   :  { %v2391_v37 = vpop.f32.mrf.mxu2 }
 0x53f   :  { %v2776_v38 = vadd.f32 %v2775_v34, %v2391_v37  ;;  %v1625_v39 = vpop.f32.mrf.mxu0 }
 0x540   :  { %v2010_v40 = vadd.f32 %v2009_v36, %v1625_v39 }
 0x541   :  { %3079 = vst.msk [vmem:[%s6415_s3 + $0x928] sm:$0xff] %vm2786_vm2, %v2776_v38 }
 0x542   :  { %3080 = vst [vmem:[%s6415_s3 + $0x930] sm:$0xff] %v2010_v40 }
 0x545   :  { %v2012_v42 = vpop.f32.mrf.mxu1  ;;  %v2780_v47 = vpop.f32.mrf.mxu3 }
 0x546   :  { %v2393_v43 = vpop.f32.mrf.mxu2 }
 0x547   :  { %v2778_v44 = vadd.f32 %v2777_v41, %v2393_v43  ;;  %v1628_v45 = vpop.f32.mrf.mxu0 }
 0x548   :  { %v2013_v46 = vadd.f32 %v2012_v42, %v1628_v45 }
 0x549   :  { %3081 = vst.msk [vmem:[%s6415_s3 + $0x938] sm:$0xff] %vm2786_vm2, %v2778_v44 }
 0x54a   :  { %3082 = vst [vmem:[%s6415_s3 + $0x940] sm:$0xff] %v2013_v46 }
 0x54d   :  { %v2014_v49 = vpop.f32.mrf.mxu1  ;;  %v2782_v53 = vpop.f32.mrf.mxu3 }
 0x54e   :  { %v2396_v48 = vpop.f32.mrf.mxu2 }
 0x54f   :  { %v2781_v50 = vadd.f32 %v2780_v47, %v2396_v48  ;;  %v1630_v51 = vpop.f32.mrf.mxu0 }
 0x550   :  { %v2015_v52 = vadd.f32 %v2014_v49, %v1630_v51 }
 0x551   :  { %3083 = vst.msk [vmem:[%s6415_s3 + $0x948] sm:$0xff] %vm2786_vm2, %v2781_v50 }
 0x552   :  { %3084 = vst [vmem:[%s6415_s3 + $0x950] sm:$0xff] %v2015_v52 }
 0x556   :  { %v2398_v54 = vpop.f32.mrf.mxu2 }
 0x557   :  { %v2783_v55 = vadd.f32 %v2782_v53, %v2398_v54 }
 0x559   :  { %3085 = vst.msk [vmem:[%s6415_s3 + $0x958] sm:$0xff] %vm2786_vm2, %v2783_v55 }

</bundles_post_ra>
